<compile_context>
chip_gen: v7x
topology: tpu7x:2x2x1
jax: 0.10.0
libtpu: 0.0.40
codegen_flags: <defaults>
</compile_context>

<pallas_src>
import functools

import jax
import jax.numpy as jnp
from jax.experimental import pallas as pl
from jax.experimental.pallas import tpu as pltpu


def _round_up(x, m):
    return (x + m - 1) // m * m


def _pick_tile_m(M, cap=512):
    """Pick an M tile (and padded M) for the matmul path."""
    if M <= cap:
        if M >= 256:
            # Split into two blocks so both TensorCores (v7x megacore) get work.
            tm = _round_up((M + 1) // 2, 8)
            return tm, 2 * tm
        return M, M                      # single full-dim block
    Mr = _round_up(M, 8)
    best = 0
    for d in range(8, cap + 1, 8):
        if Mr % d == 0:
            best = d
    if best >= 128:
        return best, Mr
    # Fallback: pad M to a multiple of 256 (zero rows get act applied then are
    # sliced off by the caller -- harmless).
    return 256, _round_up(M, 256)


def _pick_conv_rows(ho, w, target_m=2048):
    """Largest divisor tr of ho with tr*w <= target_m (output-row chunking)."""
    best = 1
    for d in range(1, ho + 1):
        if ho % d == 0 and d * w <= target_m:
            best = d
    return best


def _pick_pool_rows(nrows, row_bytes, cap_bytes=512 * 1024):
    """Row-chunk for the maxpool grid: divides nrows, bounded VMEM, >=4 steps
    where possible so the auto-pipeline has something to overlap."""
    want = min(4, nrows)
    best = 1
    for d in range(1, nrows + 1):
        if nrows % d == 0 and d * row_bytes <= cap_bytes and nrows // d >= want:
            best = d
    return best


# --------------------------------------------------------------------------
# Pallas kernels
# --------------------------------------------------------------------------

def _mm_bn_act_kernel(x_ref, w_ref, s_ref, b_ref, o_ref, *, act):
    """One (tm, N) output tile; grid = (M/tm,). Weight block is resident."""
    acc = jnp.dot(x_ref[...], w_ref[...], preferred_element_type=jnp.float32)
    y = acc * s_ref[...] + b_ref[...]                 # folded BatchNorm (f32)
    if act == "relu":
        y = jnp.maximum(y, 0.0)
    elif act == "elu":
        # ELU(alpha=1): x if x > 0 else exp(x) - 1   (overflow-safe)
        y = jnp.where(y > 0.0, y, jnp.exp(jnp.minimum(y, 0.0)) - 1.0)
    o_ref[...] = y.astype(o_ref.dtype)


def matmul_bn_act(x, w, scale, bias, act, tm_cap=512):
    """act((x @ w) * scale + bias); x:(M,K) bf16, w:(K,N), scale/bias:(N,)."""
    M, K = x.shape
    K2, N = w.shape
    assert K == K2
    tm, Mp = _pick_tile_m(M, tm_cap)
    if Mp != M:
        x = jnp.pad(x, ((0, Mp - M), (0, 0)))   # zero rows, sliced off below
    xb = x.astype(jnp.bfloat16)
    wb = w.astype(jnp.bfloat16)
    sp = scale.reshape(1, N).astype(jnp.float32)
    bp = bias.reshape(1, N).astype(jnp.float32)

    out = pl.pallas_call(
        functools.partial(_mm_bn_act_kernel, act=act),
        out_shape=jax.ShapeDtypeStruct((Mp, N), jnp.bfloat16),
        grid_spec=pltpu.PrefetchScalarGridSpec(
            num_scalar_prefetch=0,
            grid=(Mp // tm,),
            in_specs=[
                pl.BlockSpec((tm, K), lambda i: (i, 0)),
                pl.BlockSpec((K, N), lambda i: (0, 0)),   # resident weight
                pl.BlockSpec((1, N), lambda i: (0, 0)),
                pl.BlockSpec((1, N), lambda i: (0, 0)),
            ],
            out_specs=pl.BlockSpec((tm, N), lambda i: (i, 0)),
        ),
        compiler_params=pltpu.CompilerParams(
            dimension_semantics=("parallel",),
            vmem_limit_bytes=32 * 1024 * 1024,
        ),
    )(xb, wb, sp, bp)
    return out[:M] if Mp != M else out


def _conv3x3_same_kernel(x_top_ref, x_mid_ref, x_bot_ref, w_ref, s_ref, b_ref,
                         o_ref, xbuf_ref, *, tr, wdim, cin, cout, act):
    """Implicit-im2col 3x3 SAME conv + folded BN + act for one row chunk.

    xbuf (scratch) slab layout, all stores at W-offset 0 (tile-aligned):
      row 0        : zeros (slack so the smallest tap offset stays in-bounds)
      row 1        : halo row above the chunk (or zeros at the top border)
      rows 2..tr+1 : the tr chunk rows
      row tr+2     : halo row below (or zeros at the bottom border)
      row tr+3     : zeros (slack for the largest tap offset)
    Each row carries 2 trailing zero columns; in the row-flattened view those
    double as the left/right SAME padding of the neighbouring row, so the nine
    taps become contiguous row-slices of the flattened slab.
    """
    wp = wdim + 2
    r = pl.program_id(1)
    last = pl.num_programs(1) - 1

    xbuf_ref[...] = jnp.zeros_like(xbuf_ref)
    xbuf_ref[2:tr + 2, 0:wdim, :] = x_mid_ref[0]

    @pl.when(r > 0)
    def _():
        xbuf_ref[1:2, 0:wdim, :] = x_top_ref[0]

    @pl.when(r < last)
    def _():
        xbuf_ref[tr + 2:tr + 3, 0:wdim, :] = x_bot_ref[0]

    xflat = xbuf_ref[...].reshape((tr + 4) * wp, cin)

    # Tap-decomposed conv: 9 shifted slabs x resident (Cin, Cout) weights,
    # f32 accumulation on the MXU.  Outputs are enumerated over the padded
    # width wp; columns >= wdim are garbage and sliced off before the store.
    acc = jnp.zeros((tr * wp, cout), jnp.float32)
    for dy in range(3):
        for dx in range(3):
            start = (dy + 1) * wp + dx - 1
            tap = xflat[start:start + tr * wp, :]
            acc = acc + jnp.dot(tap, w_ref[dy * 3 + dx],
                                preferred_element_type=jnp.float32)

    y = acc * s_ref[...] + b_ref[...]                 # folded BatchNorm (f32)
    if act == "relu":
        y = jnp.maximum(y, 0.0)
    else:  # elu
        y = jnp.where(y > 0.0, y, jnp.exp(jnp.minimum(y, 0.0)) - 1.0)
    y = y.reshape(tr, wp, cout)[:, 0:wdim, :]
    o_ref[0] = y.astype(o_ref.dtype)


def conv3x3_same_bn_act(x, p, *, act="relu", eps=1e-5, target_m=2048):
    """3x3 stride-1 SAME conv + folded BN + activation, implicit im2col.

    x: (N, H, W, Cin) bf16; p['w']: (3, 3, Cin, Cout) f32.
    Grid = (image, output-row chunk).  Each step DMAs the chunk plus one halo
    row above/below (block indices clamped at the borders, masked in-kernel).
    """
    N, H, W, Cin = x.shape
    kh, kw, _, Cout = p["w"].shape
    assert (kh, kw) == (3, 3)
    tr = _pick_conv_rows(H, W, target_m)
    nchunks = H // tr

    w9 = p["w"].reshape(9, Cin, Cout).astype(jnp.bfloat16)
    inv_std = 1.0 / jnp.sqrt(p["var"] + eps)
    scale = (p["gamma"] * inv_std).reshape(1, Cout).astype(jnp.float32)
    bias = (p["beta"] + p["gamma"] * inv_std * (p["b"] - p["mean"])
            ).reshape(1, Cout).astype(jnp.float32)
    xb = x.astype(jnp.bfloat16)

    kernel = functools.partial(_conv3x3_same_kernel, tr=tr, wdim=W,
                               cin=Cin, cout=Cout, act=act)
    return pl.pallas_call(
        kernel,
        out_shape=jax.ShapeDtypeStruct((N, H, W, Cout), jnp.bfloat16),
        grid_spec=pltpu.PrefetchScalarGridSpec(
            num_scalar_prefetch=0,
            grid=(N, nchunks),
            in_specs=[
                # one-row halo above (clamped; ignored in-kernel when r == 0)
                pl.BlockSpec((1, 1, W, Cin),
                             lambda n, r: (n, jnp.maximum(r * tr - 1, 0), 0, 0)),
                # the tr-row chunk itself
                pl.BlockSpec((1, tr, W, Cin), lambda n, r: (n, r, 0, 0)),
                # one-row halo below (clamped; ignored at the last chunk)
                pl.BlockSpec((1, 1, W, Cin),
                             lambda n, r: (n, jnp.minimum(r * tr + tr, H - 1), 0, 0)),
                pl.BlockSpec((9, Cin, Cout), lambda n, r: (0, 0, 0)),  # resident
                pl.BlockSpec((1, Cout), lambda n, r: (0, 0)),
                pl.BlockSpec((1, Cout), lambda n, r: (0, 0)),
            ],
            out_specs=pl.BlockSpec((1, tr, W, Cout), lambda n, r: (n, r, 0, 0)),
            scratch_shapes=[pltpu.VMEM((tr + 4, W + 2, Cin), jnp.bfloat16)],
        ),
        compiler_params=pltpu.CompilerParams(
            dimension_semantics=("parallel", "parallel"),
            vmem_limit_bytes=32 * 1024 * 1024,
        ),
    )(xb, xb, xb, w9, scale, bias)


def _maxpool_kernel(x_ref, o_ref, *, k, c):
    # x_ref: (hr, k, Wo, k*C) row chunk; o_ref: (hr, Wo, C).
    r = None
    for i in range(k):
        for j in range(k):
            v = x_ref[:, i, :, j * c:(j + 1) * c]      # (hr, Wo, C)
            r = v if r is None else jnp.maximum(r, v)
    o_ref[...] = r


def maxpool2d(x, k):
    """nn.MaxPool2d(kernel_size=k) (stride=k, floor). x: (N, H, W, C) bf16."""
    N, H, W, C = x.shape
    Ho, Wo = H // k, W // k
    x = x[:, :Ho * k, :Wo * k, :]
    # Pure (relayout-free) reshape: split H -> (Ho, k), merge (k, C) lanes.
    xr = x.reshape(N * Ho, k, Wo, k * C)
    nrows = N * Ho
    row_bytes = k * Wo * k * C * jnp.dtype(x.dtype).itemsize
    hr = _pick_pool_rows(nrows, row_bytes)
    out = pl.pallas_call(
        functools.partial(_maxpool_kernel, k=k, c=C),
        out_shape=jax.ShapeDtypeStruct((nrows, Wo, C), x.dtype),
        grid_spec=pltpu.PrefetchScalarGridSpec(
            num_scalar_prefetch=0,
            grid=(nrows // hr,),
            in_specs=[pl.BlockSpec((hr, k, Wo, k * C),
                                   lambda i: (i, 0, 0, 0))],
            out_specs=pl.BlockSpec((hr, Wo, C), lambda i: (i, 0, 0)),
        ),
        compiler_params=pltpu.CompilerParams(
            dimension_semantics=("parallel",),
            vmem_limit_bytes=32 * 1024 * 1024,
        ),
    )(xr)
    return out.reshape(N, Ho, Wo, C)


# --------------------------------------------------------------------------
# Explicit-im2col path (only for tiny cases: conv1 (Cin=3), 1x1 layer1,
# and the small VALID convs of layer2/layer3).
# --------------------------------------------------------------------------

def conv2d_bn_act_im2col(x, p, *, pad, act, eps=1e-5):
    """x: (N, H, W, Cin) bf16; p['w']: (kh, kw, Cin, Cout) f32."""
    N, H, W, Cin = x.shape
    kh, kw, _, Cout = p["w"].shape
    if pad:
        x = jnp.pad(x, ((0, 0), (pad, pad), (pad, pad), (0, 0)))
    Ho = H + 2 * pad - kh + 1
    Wo = W + 2 * pad - kw + 1
    if kh == 1 and kw == 1:
        patches = x.reshape(N * Ho * Wo, Cin)          # 1x1 conv: no im2col
    else:
        taps = [x[:, dy:dy + Ho, dx:dx + Wo, :]
                for dy in range(kh) for dx in range(kw)]
        patches = jnp.stack(taps, axis=3).reshape(N * Ho * Wo, kh * kw * Cin)
    wmat = p["w"].reshape(kh * kw * Cin, Cout)
    # Fold conv bias + BatchNorm (inference mode) into scale/bias (f32).
    inv_std = 1.0 / jnp.sqrt(p["var"] + eps)
    scale = p["gamma"] * inv_std
    bias = p["beta"] + scale * (p["b"] - p["mean"])
    tm_cap = 2048 if Cout <= 128 else 512
    y = matmul_bn_act(patches, wmat, scale, bias, act, tm_cap=tm_cap)
    return y.reshape(N, Ho, Wo, Cout)


# --------------------------------------------------------------------------
# Model definition (VGG16-bn features[:27] + layer1/2/3)
# --------------------------------------------------------------------------

# vgg16_bn.features[:27] = conv/bn/relu stack with three 2x2 maxpools,
# ending after conv(256->512) + BN + ReLU.
VGG_CFG = [
    ("conv", 3, 64), ("conv", 64, 64), ("pool", 2),
    ("conv", 64, 128), ("conv", 128, 128), ("pool", 2),
    ("conv", 128, 256), ("conv", 256, 256), ("conv", 256, 256), ("pool", 2),
    ("conv", 256, 512),
]


def _conv_params(key, kh, kw, cin, cout):
    k1, k2, k3, k4, k5, k6 = jax.random.split(key, 6)
    fan_in = kh * kw * cin
    return dict(
        w=jax.random.normal(k1, (kh, kw, cin, cout), jnp.float32)
          * jnp.sqrt(2.0 / fan_in),
        b=0.01 * jax.random.normal(k2, (cout,), jnp.float32),
        gamma=1.0 + 0.05 * jax.random.normal(k3, (cout,), jnp.float32),
        beta=0.05 * jax.random.normal(k4, (cout,), jnp.float32),
        mean=0.01 * jax.random.normal(k5, (cout,), jnp.float32),
        var=1.0 + 0.05 * jnp.abs(jax.random.normal(k6, (cout,), jnp.float32)),
    )


def init_params(key):
    keys = jax.random.split(key, 16)
    ki = iter(keys)
    vgg = []
    for item in VGG_CFG:
        if item[0] == "conv":
            vgg.append(_conv_params(next(ki), 3, 3, item[1], item[2]))
    return dict(
        vgg=vgg,
        layer1=_conv_params(next(ki), 1, 1, 512, 512),
        layer2=_conv_params(next(ki), 3, 3, 512, 256),
        layer3=_conv_params(next(ki), 3, 3, 256, 128),
    )


def encoder_forward(images, params):
    """images: (B, V, 3, H, W) float32 -> (B, V, 128, h, w) float32."""
    B, V, C, H, W = images.shape
    # Views are independent per-sample work: fold them into the batch so the
    # layer stack (and every pallas_call) runs once instead of per view.
    x = images.reshape(B * V, C, H, W)
    x = jnp.transpose(x, (0, 2, 3, 1)).astype(jnp.bfloat16)   # NCHW -> NHWC
    conv_i = 0
    for item in VGG_CFG:
        if item[0] == "conv":
            p = params["vgg"][conv_i]
            if item[1] == 3:
                # First conv (Cin=3): patch matrix is ~0.7 MB -> keep the
                # explicit path (implicit kernel would waste lanes at C=3).
                x = conv2d_bn_act_im2col(x, p, pad=1, act="relu")
            else:
                x = conv3x3_same_bn_act(x, p, act="relu")      # implicit im2col
            conv_i += 1
        else:
            x = maxpool2d(x, item[1])
    x = conv2d_bn_act_im2col(x, params["layer1"], pad=0, act="elu")   # 1x1 conv
    x = conv2d_bn_act_im2col(x, params["layer2"], pad=0, act="elu")   # 3x3 VALID
    x = maxpool2d(x, 4)
    x = conv2d_bn_act_im2col(x, params["layer3"], pad=0, act="elu")   # 3x3 VALID
    _, h, w, Co = x.shape
    out = x.astype(jnp.float32).reshape(B, V, h, w, Co)
    return jnp.transpose(out, (0, 1, 4, 2, 3))                 # (B, V, Co, h, w)


# --------------------------------------------------------------------------
# Reference (pure JAX) for the implicit-im2col conv kernel parity check.
# --------------------------------------------------------------------------

def _conv_bn_relu_ref(x, p, eps=1e-5):
    xf = x.astype(jnp.float32)
    y = jax.lax.conv_general_dilated(
        xf, p["w"], window_strides=(1, 1), padding="SAME",
        dimension_numbers=("NHWC", "HWIO", "NHWC"))
    y = y + p["b"]
    inv = 1.0 / jnp.sqrt(p["var"] + eps)
    y = (y - p["mean"]) * inv * p["gamma"] + p["beta"]
    return jnp.maximum(y, 0.0)


if __name__ == "__main__":
    key = jax.random.PRNGKey(0)
    pkey, xkey, tkey1, tkey2 = jax.random.split(key, 4)
    params = init_params(pkey)

    # ---- Parity check of the implicit-im2col conv kernel (exercises halos:
    # ---- target_m=256 forces 8-row chunks, 4 chunks per image).
    xt = jax.random.normal(tkey1, (2, 32, 32, 64), jnp.float32
                           ).astype(jnp.bfloat16)
    pt = _conv_params(tkey2, 3, 3, 64, 64)
    got = conv3x3_same_bn_act(xt, pt, act="relu", target_m=256
                              ).astype(jnp.float32)
    ref = _conv_bn_relu_ref(xt, pt)
    err = float(jnp.max(jnp.abs(got - ref)))
    tol = 0.05 * (1.0 + float(jnp.max(jnp.abs(ref))))
    assert err < tol, (err, tol)

    # ---- Full encoder forward.
    # Smallest spatial size for which layer2's MaxPool(4) + layer3's 3x3 conv
    # remain valid: H = W = 112 (VGG /8 -> 14, conv -> 12, pool4 -> 3, conv -> 1).
    B, V, H, W = 1, 2, 112, 112
    images = jax.random.normal(xkey, (B, V, 3, H, W), jnp.float32)

    fwd = jax.jit(encoder_forward)
    out = jax.block_until_ready(fwd(images, params))

    assert out.shape == (B, V, 128, 1, 1), out.shape
    assert bool(jnp.all(jnp.isfinite(out)))
    print("KERNEL_OK")
</pallas_src>

<mosaic_0001>
module attributes {stable_mosaic.version = 11 : i64} {
  func.func @_conv3x3_same_kernel(%arg0: i32, %arg1: i32, %arg2: memref<1x1x32x64xbf16, #tpu.memory_space<vmem>>, %arg3: memref<1x8x32x64xbf16, #tpu.memory_space<vmem>>, %arg4: memref<1x1x32x64xbf16, #tpu.memory_space<vmem>>, %arg5: memref<9x64x64xbf16, #tpu.memory_space<vmem>>, %arg6: memref<1x64xf32, #tpu.memory_space<vmem>>, %arg7: memref<1x64xf32, #tpu.memory_space<vmem>>, %arg8: memref<1x8x32x64xbf16, #tpu.memory_space<vmem>>, %arg9: memref<12x34x64xbf16, #tpu.memory_space<vmem>>) attributes {dimension_semantics = [#tpu.dimension_semantics<parallel>, #tpu.dimension_semantics<parallel>], iteration_bounds = array<i64: 2, 4>, scalar_prefetch = 0 : i64, scratch_operands = 1 : i64, tpu.core_type = #tpu.core_type<tc>, window_params = [{transform_indices = @transform_0, window_bounds = array<i64: 1, 1, 32, 64>}, {transform_indices = @transform_1, window_bounds = array<i64: 1, 8, 32, 64>}, {transform_indices = @transform_2, window_bounds = array<i64: 1, 1, 32, 64>}, {pipeline_mode = #tpu.pipeline_mode<synchronous>, transform_indices = @transform_3, window_bounds = array<i64: 9, 64, 64>}, {pipeline_mode = #tpu.pipeline_mode<synchronous>, transform_indices = @transform_4, window_bounds = array<i64: 1, 64>}, {pipeline_mode = #tpu.pipeline_mode<synchronous>, transform_indices = @transform_5, window_bounds = array<i64: 1, 64>}, {transform_indices = @transform_6, window_bounds = array<i64: 1, 8, 32, 64>}]} {
    %cst = arith.constant 0.000000e+00 : bf16
    %0 = vector.broadcast %cst : bf16 to vector<12x34x64xbf16>
    %c0 = arith.constant 0 : index
    %c0_0 = arith.constant 0 : index
    %c0_1 = arith.constant 0 : index
    %1 = vector.load %arg9[%c0, %c0_0, %c0_1] : memref<12x34x64xbf16, #tpu.memory_space<vmem>>, vector<12x34x64xbf16>
    tpu.vector_store %arg9[%c0, %c0_0, %c0_1], %0 {strides = array<i32>} : memref<12x34x64xbf16, #tpu.memory_space<vmem>>, vector<12x34x64xbf16>,
    %c0_2 = arith.constant 0 : index
    %c0_3 = arith.constant 0 : index
    %c0_4 = arith.constant 0 : index
    %c0_5 = arith.constant 0 : index
    %2 = vector.load %arg3[%c0_2, %c0_3, %c0_4, %c0_5] : memref<1x8x32x64xbf16, #tpu.memory_space<vmem>>, vector<1x8x32x64xbf16>
    %3 = vector.shape_cast %2 : vector<1x8x32x64xbf16> to vector<8x32x64xbf16>
    %c2 = arith.constant 2 : index
    %c0_6 = arith.constant 0 : index
    %c0_7 = arith.constant 0 : index
    %4 = vector.load %arg9[%c2, %c0_6, %c0_7] : memref<12x34x64xbf16, #tpu.memory_space<vmem>>, vector<8x32x64xbf16>
    tpu.vector_store %arg9[%c2, %c0_6, %c0_7], %3 {strides = array<i32>} : memref<12x34x64xbf16, #tpu.memory_space<vmem>>, vector<8x32x64xbf16>,
    %c0_i32 = arith.constant 0 : i32
    %5 = arith.cmpi sgt, %arg1, %c0_i32 : i32
    %6 = arith.extui %5 : i1 to i32
    %c0_i32_8 = arith.constant 0 : i32
    %7 = arith.cmpi ne, %6, %c0_i32_8 : i32
    scf.if %7 {
      %c0_52 = arith.constant 0 : index
      %c0_53 = arith.constant 0 : index
      %c0_54 = arith.constant 0 : index
      %c0_55 = arith.constant 0 : index
      %73 = vector.load %arg2[%c0_52, %c0_53, %c0_54, %c0_55] : memref<1x1x32x64xbf16, #tpu.memory_space<vmem>>, vector<1x1x32x64xbf16>
      %74 = vector.shape_cast %73 : vector<1x1x32x64xbf16> to vector<1x32x64xbf16>
      %c1_56 = arith.constant 1 : index
      %c0_57 = arith.constant 0 : index
      %c0_58 = arith.constant 0 : index
      %75 = vector.load %arg9[%c1_56, %c0_57, %c0_58] : memref<12x34x64xbf16, #tpu.memory_space<vmem>>, vector<1x32x64xbf16>
      tpu.vector_store %arg9[%c1_56, %c0_57, %c0_58], %74 {strides = array<i32>} : memref<12x34x64xbf16, #tpu.memory_space<vmem>>, vector<1x32x64xbf16>,
    } else {
    }
    %c3_i32 = arith.constant 3 : i32
    %8 = arith.cmpi slt, %arg1, %c3_i32 : i32
    %9 = arith.extui %8 : i1 to i32
    %c0_i32_9 = arith.constant 0 : i32
    %10 = arith.cmpi ne, %9, %c0_i32_9 : i32
    scf.if %10 {
      %c0_52 = arith.constant 0 : index
      %c0_53 = arith.constant 0 : index
      %c0_54 = arith.constant 0 : index
      %c0_55 = arith.constant 0 : index
      %73 = vector.load %arg4[%c0_52, %c0_53, %c0_54, %c0_55] : memref<1x1x32x64xbf16, #tpu.memory_space<vmem>>, vector<1x1x32x64xbf16>
      %74 = vector.shape_cast %73 : vector<1x1x32x64xbf16> to vector<1x32x64xbf16>
      %c10 = arith.constant 10 : index
      %c0_56 = arith.constant 0 : index
      %c0_57 = arith.constant 0 : index
      %75 = vector.load %arg9[%c10, %c0_56, %c0_57] : memref<12x34x64xbf16, #tpu.memory_space<vmem>>, vector<1x32x64xbf16>
      tpu.vector_store %arg9[%c10, %c0_56, %c0_57], %74 {strides = array<i32>} : memref<12x34x64xbf16, #tpu.memory_space<vmem>>, vector<1x32x64xbf16>,
    } else {
    }
    %c0_10 = arith.constant 0 : index
    %c0_11 = arith.constant 0 : index
    %c0_12 = arith.constant 0 : index
    %11 = vector.load %arg9[%c0_10, %c0_11, %c0_12] : memref<12x34x64xbf16, #tpu.memory_space<vmem>>, vector<12x34x64xbf16>
    %12 = vector.shape_cast %11 : vector<12x34x64xbf16> to vector<408x64xbf16>
    %cst_13 = arith.constant 0.000000e+00 : f32
    %13 = vector.broadcast %cst_13 : f32 to vector<272x64xf32>
    %14 = vector.extract_strided_slice %12 {offsets = [33, 0], sizes = [272, 64], strides = [1, 1]} : vector<408x64xbf16> to vector<272x64xbf16>
    %c0_14 = arith.constant 0 : index
    %c0_15 = arith.constant 0 : index
    %c0_16 = arith.constant 0 : index
    %15 = vector.load %arg5[%c0_14, %c0_15, %c0_16] : memref<9x64x64xbf16, #tpu.memory_space<vmem>>, vector<1x64x64xbf16>
    %16 = vector.shape_cast %15 : vector<1x64x64xbf16> to vector<64x64xbf16>
    %cst_17 = arith.constant dense<0.000000e+00> : vector<272x64xf32>
    %17 = tpu.matmul %14, %16, %cst_17 {dimension_numbers = #tpu.dot_dimension_numbers<[1], [0], [0], [1], [0, 0, 1, 1], [], []>} : vector<272x64xbf16>, vector<64x64xbf16>, vector<272x64xf32> -> vector<272x64xf32>
    %18 = arith.addf %13, %17 : vector<272x64xf32>
    %19 = vector.extract_strided_slice %12 {offsets = [34, 0], sizes = [272, 64], strides = [1, 1]} : vector<408x64xbf16> to vector<272x64xbf16>
    %c1 = arith.constant 1 : index
    %c0_18 = arith.constant 0 : index
    %c0_19 = arith.constant 0 : index
    %20 = vector.load %arg5[%c1, %c0_18, %c0_19] : memref<9x64x64xbf16, #tpu.memory_space<vmem>>, vector<1x64x64xbf16>
    %21 = vector.shape_cast %20 : vector<1x64x64xbf16> to vector<64x64xbf16>
    %cst_20 = arith.constant dense<0.000000e+00> : vector<272x64xf32>
    %22 = tpu.matmul %19, %21, %cst_20 {dimension_numbers = #tpu.dot_dimension_numbers<[1], [0], [0], [1], [0, 0, 1, 1], [], []>} : vector<272x64xbf16>, vector<64x64xbf16>, vector<272x64xf32> -> vector<272x64xf32>
    %23 = arith.addf %18, %22 : vector<272x64xf32>
    %24 = vector.extract_strided_slice %12 {offsets = [35, 0], sizes = [272, 64], strides = [1, 1]} : vector<408x64xbf16> to vector<272x64xbf16>
    %c2_21 = arith.constant 2 : index
    %c0_22 = arith.constant 0 : index
    %c0_23 = arith.constant 0 : index
    %25 = vector.load %arg5[%c2_21, %c0_22, %c0_23] : memref<9x64x64xbf16, #tpu.memory_space<vmem>>, vector<1x64x64xbf16>
    %26 = vector.shape_cast %25 : vector<1x64x64xbf16> to vector<64x64xbf16>
    %cst_24 = arith.constant dense<0.000000e+00> : vector<272x64xf32>
    %27 = tpu.matmul %24, %26, %cst_24 {dimension_numbers = #tpu.dot_dimension_numbers<[1], [0], [0], [1], [0, 0, 1, 1], [], []>} : vector<272x64xbf16>, vector<64x64xbf16>, vector<272x64xf32> -> vector<272x64xf32>
    %28 = arith.addf %23, %27 : vector<272x64xf32>
    %29 = vector.extract_strided_slice %12 {offsets = [67, 0], sizes = [272, 64], strides = [1, 1]} : vector<408x64xbf16> to vector<272x64xbf16>
    %c3 = arith.constant 3 : index
    %c0_25 = arith.constant 0 : index
    %c0_26 = arith.constant 0 : index
    %30 = vector.load %arg5[%c3, %c0_25, %c0_26] : memref<9x64x64xbf16, #tpu.memory_space<vmem>>, vector<1x64x64xbf16>
    %31 = vector.shape_cast %30 : vector<1x64x64xbf16> to vector<64x64xbf16>
    %cst_27 = arith.constant dense<0.000000e+00> : vector<272x64xf32>
    %32 = tpu.matmul %29, %31, %cst_27 {dimension_numbers = #tpu.dot_dimension_numbers<[1], [0], [0], [1], [0, 0, 1, 1], [], []>} : vector<272x64xbf16>, vector<64x64xbf16>, vector<272x64xf32> -> vector<272x64xf32>
    %33 = arith.addf %28, %32 : vector<272x64xf32>
    %34 = vector.extract_strided_slice %12 {offsets = [68, 0], sizes = [272, 64], strides = [1, 1]} : vector<408x64xbf16> to vector<272x64xbf16>
    %c4 = arith.constant 4 : index
    %c0_28 = arith.constant 0 : index
    %c0_29 = arith.constant 0 : index
    %35 = vector.load %arg5[%c4, %c0_28, %c0_29] : memref<9x64x64xbf16, #tpu.memory_space<vmem>>, vector<1x64x64xbf16>
    %36 = vector.shape_cast %35 : vector<1x64x64xbf16> to vector<64x64xbf16>
    %cst_30 = arith.constant dense<0.000000e+00> : vector<272x64xf32>
    %37 = tpu.matmul %34, %36, %cst_30 {dimension_numbers = #tpu.dot_dimension_numbers<[1], [0], [0], [1], [0, 0, 1, 1], [], []>} : vector<272x64xbf16>, vector<64x64xbf16>, vector<272x64xf32> -> vector<272x64xf32>
    %38 = arith.addf %33, %37 : vector<272x64xf32>
    %39 = vector.extract_strided_slice %12 {offsets = [69, 0], sizes = [272, 64], strides = [1, 1]} : vector<408x64xbf16> to vector<272x64xbf16>
    %c5 = arith.constant 5 : index
    %c0_31 = arith.constant 0 : index
    %c0_32 = arith.constant 0 : index
    %40 = vector.load %arg5[%c5, %c0_31, %c0_32] : memref<9x64x64xbf16, #tpu.memory_space<vmem>>, vector<1x64x64xbf16>
    %41 = vector.shape_cast %40 : vector<1x64x64xbf16> to vector<64x64xbf16>
    %cst_33 = arith.constant dense<0.000000e+00> : vector<272x64xf32>
    %42 = tpu.matmul %39, %41, %cst_33 {dimension_numbers = #tpu.dot_dimension_numbers<[1], [0], [0], [1], [0, 0, 1, 1], [], []>} : vector<272x64xbf16>, vector<64x64xbf16>, vector<272x64xf32> -> vector<272x64xf32>
    %43 = arith.addf %38, %42 : vector<272x64xf32>
    %44 = vector.extract_strided_slice %12 {offsets = [101, 0], sizes = [272, 64], strides = [1, 1]} : vector<408x64xbf16> to vector<272x64xbf16>
    %c6 = arith.constant 6 : index
    %c0_34 = arith.constant 0 : index
    %c0_35 = arith.constant 0 : index
    %45 = vector.load %arg5[%c6, %c0_34, %c0_35] : memref<9x64x64xbf16, #tpu.memory_space<vmem>>, vector<1x64x64xbf16>
    %46 = vector.shape_cast %45 : vector<1x64x64xbf16> to vector<64x64xbf16>
    %cst_36 = arith.constant dense<0.000000e+00> : vector<272x64xf32>
    %47 = tpu.matmul %44, %46, %cst_36 {dimension_numbers = #tpu.dot_dimension_numbers<[1], [0], [0], [1], [0, 0, 1, 1], [], []>} : vector<272x64xbf16>, vector<64x64xbf16>, vector<272x64xf32> -> vector<272x64xf32>
    %48 = arith.addf %43, %47 : vector<272x64xf32>
    %49 = vector.extract_strided_slice %12 {offsets = [102, 0], sizes = [272, 64], strides = [1, 1]} : vector<408x64xbf16> to vector<272x64xbf16>
    %c7 = arith.constant 7 : index
    %c0_37 = arith.constant 0 : index
    %c0_38 = arith.constant 0 : index
    %50 = vector.load %arg5[%c7, %c0_37, %c0_38] : memref<9x64x64xbf16, #tpu.memory_space<vmem>>, vector<1x64x64xbf16>
    %51 = vector.shape_cast %50 : vector<1x64x64xbf16> to vector<64x64xbf16>
    %cst_39 = arith.constant dense<0.000000e+00> : vector<272x64xf32>
    %52 = tpu.matmul %49, %51, %cst_39 {dimension_numbers = #tpu.dot_dimension_numbers<[1], [0], [0], [1], [0, 0, 1, 1], [], []>} : vector<272x64xbf16>, vector<64x64xbf16>, vector<272x64xf32> -> vector<272x64xf32>
    %53 = arith.addf %48, %52 : vector<272x64xf32>
    %54 = vector.extract_strided_slice %12 {offsets = [103, 0], sizes = [272, 64], strides = [1, 1]} : vector<408x64xbf16> to vector<272x64xbf16>
    %c8 = arith.constant 8 : index
    %c0_40 = arith.constant 0 : index
    %c0_41 = arith.constant 0 : index
    %55 = vector.load %arg5[%c8, %c0_40, %c0_41] : memref<9x64x64xbf16, #tpu.memory_space<vmem>>, vector<1x64x64xbf16>
    %56 = vector.shape_cast %55 : vector<1x64x64xbf16> to vector<64x64xbf16>
    %cst_42 = arith.constant dense<0.000000e+00> : vector<272x64xf32>
    %57 = tpu.matmul %54, %56, %cst_42 {dimension_numbers = #tpu.dot_dimension_numbers<[1], [0], [0], [1], [0, 0, 1, 1], [], []>} : vector<272x64xbf16>, vector<64x64xbf16>, vector<272x64xf32> -> vector<272x64xf32>
    %58 = arith.addf %53, %57 : vector<272x64xf32>
    %c0_43 = arith.constant 0 : index
    %c0_44 = arith.constant 0 : index
    %59 = vector.load %arg6[%c0_43, %c0_44] : memref<1x64xf32, #tpu.memory_space<vmem>>, vector<1x64xf32>
    %60 = vector.broadcast %59 : vector<1x64xf32> to vector<272x64xf32>
    %61 = arith.mulf %58, %60 : vector<272x64xf32>
    %c0_45 = arith.constant 0 : index
    %c0_46 = arith.constant 0 : index
    %62 = vector.load %arg7[%c0_45, %c0_46] : memref<1x64xf32, #tpu.memory_space<vmem>>, vector<1x64xf32>
    %63 = vector.broadcast %62 : vector<1x64xf32> to vector<272x64xf32>
    %64 = arith.addf %61, %63 : vector<272x64xf32>
    %cst_47 = arith.constant 0.000000e+00 : f32
    %65 = vector.broadcast %cst_47 : f32 to vector<272x64xf32>
    %66 = arith.maximumf %64, %65 : vector<272x64xf32>
    %67 = vector.shape_cast %66 : vector<272x64xf32> to vector<8x34x64xf32>
    %68 = vector.extract_strided_slice %67 {offsets = [0, 0, 0], sizes = [8, 32, 64], strides = [1, 1, 1]} : vector<8x34x64xf32> to vector<8x32x64xf32>
    %69 = arith.truncf %68 : vector<8x32x64xf32> to vector<8x32x64xbf16>
    %c0_48 = arith.constant 0 : index
    %c0_49 = arith.constant 0 : index
    %c0_50 = arith.constant 0 : index
    %c0_51 = arith.constant 0 : index
    %70 = vector.load %arg8[%c0_48, %c0_49, %c0_50, %c0_51] : memref<1x8x32x64xbf16, #tpu.memory_space<vmem>>, vector<1x8x32x64xbf16>
    %71 = vector.shape_cast %70 : vector<1x8x32x64xbf16> to vector<8x32x64xbf16>
    %72 = vector.shape_cast %69 : vector<8x32x64xbf16> to vector<1x8x32x64xbf16>
    tpu.vector_store %arg8[%c0_48, %c0_49, %c0_50, %c0_51], %72 {strides = array<i32>} : memref<1x8x32x64xbf16, #tpu.memory_space<vmem>>, vector<1x8x32x64xbf16>,
    return
  }
  func.func @transform_0(%arg0: i32, %arg1: i32) -> (i32, i32, i32, i32) {
    %c8_i32 = arith.constant 8 : i32
    %0 = arith.muli %arg1, %c8_i32 : i32
    %c1_i32 = arith.constant 1 : i32
    %1 = arith.subi %0, %c1_i32 : i32
    %c0_i32 = arith.constant 0 : i32
    %2 = arith.maxsi %1, %c0_i32 : i32
    %c0_i32_0 = arith.constant 0 : i32
    %c0_i32_1 = arith.constant 0 : i32
    %c0_i32_2 = arith.constant 0 : i32
    return %arg0, %2, %c0_i32_0, %c0_i32_1 : i32, i32, i32, i32
  }
  func.func @transform_1(%arg0: i32, %arg1: i32) -> (i32, i32, i32, i32) {
    %c0_i32 = arith.constant 0 : i32
    %c0_i32_0 = arith.constant 0 : i32
    %c0_i32_1 = arith.constant 0 : i32
    return %arg0, %arg1, %c0_i32, %c0_i32_0 : i32, i32, i32, i32
  }
  func.func @transform_2(%arg0: i32, %arg1: i32) -> (i32, i32, i32, i32) {
    %c8_i32 = arith.constant 8 : i32
    %0 = arith.muli %arg1, %c8_i32 : i32
    %c8_i32_0 = arith.constant 8 : i32
    %1 = arith.addi %0, %c8_i32_0 : i32
    %c31_i32 = arith.constant 31 : i32
    %2 = arith.minsi %1, %c31_i32 : i32
    %c0_i32 = arith.constant 0 : i32
    %c0_i32_1 = arith.constant 0 : i32
    %c0_i32_2 = arith.constant 0 : i32
    return %arg0, %2, %c0_i32, %c0_i32_1 : i32, i32, i32, i32
  }
  func.func @transform_3(%arg0: i32, %arg1: i32) -> (i32, i32, i32) {
    %c0_i32 = arith.constant 0 : i32
    %c0_i32_0 = arith.constant 0 : i32
    %c0_i32_1 = arith.constant 0 : i32
    %c0_i32_2 = arith.constant 0 : i32
    return %c0_i32, %c0_i32_0, %c0_i32_1 : i32, i32, i32
  }
  func.func @transform_4(%arg0: i32, %arg1: i32) -> (i32, i32) {
    %c0_i32 = arith.constant 0 : i32
    %c0_i32_0 = arith.constant 0 : i32
    %c0_i32_1 = arith.constant 0 : i32
    return %c0_i32, %c0_i32_0 : i32, i32
  }
  func.func @transform_5(%arg0: i32, %arg1: i32) -> (i32, i32) {
    %c0_i32 = arith.constant 0 : i32
    %c0_i32_0 = arith.constant 0 : i32
    %c0_i32_1 = arith.constant 0 : i32
    return %c0_i32, %c0_i32_0 : i32, i32
  }
  func.func @transform_6(%arg0: i32, %arg1: i32) -> (i32, i32, i32, i32) {
    %c0_i32 = arith.constant 0 : i32
    %c0_i32_0 = arith.constant 0 : i32
    %c0_i32_1 = arith.constant 0 : i32
    return %arg0, %arg1, %c0_i32, %c0_i32_0 : i32, i32, i32, i32
  }
}

</mosaic_0001>

<bundles_post_ra>
// kernel: tpu_custom_call.1
= control target key start
LH: loop header
LB: loop body
LE: loop exit
PB: predicated region body
PF: predicated region fallthrough
CT: control target
= control target key end

     0   :  { %s14860_s0 = inlined_call_operand.hbm [shape: bf16[2,32,32,64], index: 0, kind: input, shape index: {}]   ;;  %s14861_s1 = inlined_call_operand.hbm [shape: bf16[2,32,32,64], index: 1, kind: input, shape index: {}]   ;;  %s14862_s2 = inlined_call_operand.hbm [shape: bf16[2,32,32,64], index: 2, kind: input, shape index: {}]   ;;  %s14863_s3 = inlined_call_operand.hbm [shape: bf16[9,64,64], index: 3, kind: input, shape index: {}]   ;;  %s14864_s4 = inlined_call_operand.vmem [shape: f32[1,64], index: 4, kind: input, shape index: {}]   ;;  %s14865_s5 = inlined_call_operand.vmem [shape: f32[1,64], index: 5, kind: input, shape index: {}]   ;;  %s14866_s6 = inlined_call_operand.hbm [shape: bf16[2,32,32,64], index: 6, kind: output, shape index: {}]  }
   0x1   :  { %15048 = sst [smem:[#allocation139_spill]] %s14861_s1 }
   0x2   :  { %15049 = sst [smem:[#allocation140_spill]] %s14862_s2 }
   0x3   :  { %15050 = sst [smem:[#allocation141_spill]] %s14863_s3 }
   0x4   :  { %15051 = sst [smem:[#allocation142_spill]] %s14864_s4 }
   0x5   :  { %15052 = sst [smem:[#allocation143_spill]] %s14865_s5 }
   0x6   :  { %15053 = sst [smem:[#allocation144_spill]] %s14866_s6 }
   0x7   :  { %11 = vsyncpa [#allocation4], 0 }
   0x8   :  { %13 = vsyncpa [#allocation4 + $0x1], 0 }
   0x9   :  { %14 = vsyncpa [#allocation7], 0 }
   0xa   :  { %16 = vsyncpa [#allocation7 + $0x1], 0 }
   0xb   :  { %17 = vsyncpa [#allocation10], 0 }
   0xc   :  { %18 = vsyncpa [#allocation5], 0 }
   0xd   :  { %20 = vsyncpa [#allocation5 + $0x1], 0  ;;  %s11393_s21 = smov 0   ;;  %s11395_s22 = smov 0  }
   0xe   :  { %s11397_s23 = smov 0   ;;  %s11399_s24 = smov 0  }
   0xf   :  { %s11401_s25 = smov 0   ;;  %s11403_s26 = smov 0  }
  0x10   :  { %s11405_s27 = smov 0   ;;  %s11407_s28 = smov 0  }
  0x11   :  { %s11409_s29 = smov 0   ;;  %s11411_s30 = smov 0  }
  0x12   :  { %s11413_s7 = smov 0   ;;  %s11415_s8 = smov 0  }
  0x13   :  { %s11417_s9 = smov 0   ;;  %s11419_s10 = smov 0  }
  0x14 LB: > { %15054 = sst [smem:[#allocation17_spill]] %s11302_s24  ;;  %s9087_s11 = sadd.s32 4294967294, %s11342_s10   ;;  %s11342_s10 = sphi %s11419_s10, %s26_s10   ;;  %s11338_s9 = sphi %s11417_s9, %s15373_s9   ;;  %s11334_s8 = sphi %s11415_s8, %s15382_s8   ;;  %s11330_s7 = sphi %s11413_s7, %s15371_s7   ;;  %s11326_s30 = sphi %s11411_s30, %s15370_s30   ;;  %s11322_s29 = sphi %s11409_s29, %s15381_s29   ;;  %s11318_s28 = sphi %s11407_s28, %s15380_s28   ;;  %s11314_s27 = sphi %s11405_s27, %s15368_s27   ;;  %s11310_s26 = sphi %s11403_s26, %s15379_s26   ;;  %s11306_s25 = sphi %s11401_s25, %s15378_s25   ;;  %s11302_s24 = sphi %s11399_s24, %s15367_s24   ;;  %s11298_s23 = sphi %s11397_s23, %s15377_s23   ;;  %s11294_s22 = sphi %s11395_s22, %s15376_s22   ;;  %s11290_s21 = sphi %s11393_s21, %s15375_s21  }
  0x15   : > { %15055 = sst [smem:[#allocation18_spill]] %s11306_s25  ;;  %s35_s12 = sadd.s32 1, %s11334_s8 }
  0x16   : > { %15056 = sst [smem:[#allocation19_spill]] %s11318_s28  ;;  %p36_p0 = scmp.ge.s32.totalorder %s35_s12, 4 }
  0x17   : > { %15057 = sst [smem:[#allocation20_spill]] %s11326_s30  ;;  %s38_s13 = sadd.s32 1, %s11338_s9 }
  0x18   : > { %15058 = sst [smem:[#allocation21_spill]] %s11330_s7  ;;  %p14872_p1 = scmp.eq.s32.totalorder %s11342_s10, 0 }
  0x19   : > { %15059 = sst [smem:[#allocation22_spill]] %s11334_s8  ;;  %s15384_s12 = smov (%p36_p0, %s35_s12), 0 }
  0x1a   : > { %15060 = sst [smem:[#allocation23_spill]] %s11338_s9  ;;  %s15386_s13 = smov (!%p36_p0, %s38_s13), %s11338_s9 }
  0x1b   : > { %15061 = sst [smem:[#allocation24_spill]] %s15384_s12  ;;  %p14873_p2 = scmp.ne.s32.totalorder %s11310_s26, %s11306_s25 }
  0x1c   : > { %p14874_p3 = scmp.ne.s32.totalorder %s11306_s25, %s11302_s24  ;;  %p227_p4 = scmp.eq.s32.totalorder %s9087_s11, 7 }
  0x1d   : > { %p11484_p5 = por %p14873_p2, %p14872_p1  ;;  %p14871_p7 = scmp.lt.s32.totalorder %s11342_s10, 8 }
  0x1e   : > { %p11491_p6 = por %p227_p4, %p14874_p3  ;;  %s11497_s18 = sshll.u32 %s11338_s9, 7 }
  0x1f   : > { %s293_s19 = sand.u32 1, %s11342_s10   ;;  %s295_s20 = sand.u32 1, %s11310_s26  }
  0x20   : > { %s15063_s17 = scalar_select %p11491_p6, 1, 0 }
  0x21   : > { %s9103_s14 = sshll.u32 %s295_s20, 7  ;;  %s9443_s11 = sshll.u32 %s11334_s8, 5 }
  0x22   : > { %15064 = sst [smem:[#allocation25_spill]] %s15063_s17  ;;  %s304_s15 = sadd.s32 %s9443_s11, %s11497_s18 }
  0x23   : > { %s9107_s6 = sshll.u32 %s304_s15, 6  ;;  %s297_s7 = scalar_lea.vmem [#allocation6], %s9103_s14 }
  0x24   : > { %s307_s5 = sshll.u32 %s297_s7, 4  ;;  %s15065_s1 = sld [smem:[#allocation139_spill]]  ;;  %s11508_s5 = int_to_ptr.vmem [resolvable:$true] %s307_s5 }
  0x25   : > { %p11514_p8 = pnand %p14871_p7, %p11484_p5  ;;  %s11518_s7 = scalar_lea.sflag [#allocation7], %s293_s19 }
  0x27   : > { %p11068_p10 = pneg %p11514_p8 }
  0x2a   : > { %s11506_s2 = scalar_lea.hbm %s15065_s1, %s9107_s6  ;;  %s11071_s30 = scalar_lea.hbm %s15065_s1, 16384 }
  0x2b   : > { %s11066_s14 = scalar_lea.hbm %s11506_s2, 2048  ;;  %p11072_p13 = scmp.lt.u32.totalorder %s11506_s2, %s15065_s1 }
  0x2c   : > { %p11067_p9 = scmp.ne.s32.totalorder %s11506_s2, %s11066_s14  ;;  %p11073_p0 = scmp.lt.u32.totalorder %s11071_s30, %s11066_s14 }
  0x2d   : > { %p11075_p5 = scmp.lt.u32.totalorder %s11066_s14, %s11506_s2 }
  0x2e   : > { %p11069_p11 = pnand %p11068_p10, %p11067_p9  ;;  %p11074_p4 = por %p11073_p0, %p11072_p13 }
  0x30   : > { %p11070_p12 = pneg %p11069_p11  ;;  %p11076_p7 = por %p11075_p5, %p11074_p4 }
  0x32   : > { %p11077_p1 = pnand %p11076_p7, %p11070_p12 }
  0x34   : > { %11080 = shalt.err (!%p11077_p1)
}
  0x35   : > { %s11081_s19 = scalar_lea.vmem %s11508_s5, 2048  ;;  %s11344_s11 = smov [#allocation6]  }
  0x36   : > { %p11082_p9 = scmp.ne.s32.totalorder %s11508_s5, %s11081_s19  ;;  %s11086_s4 = sshll.u32 %s11344_s11, 4  ;;  %s11087_s4 = int_to_ptr.vmem [resolvable:$false] %s11086_s4 }
  0x37   : > { %s11088_s6 = scalar_lea.vmem %s11087_s4, 4096  ;;  %p11089_p3 = scmp.lt.s32.totalorder %s11508_s5, %s11087_s4 }
  0x38   : > { %p11084_p11 = pnand %p11082_p9, %p11068_p10  ;;  %p11090_p13 = scmp.lt.s32.totalorder %s11088_s6, %s11081_s19 }
  0x3a   : > { %p11085_p2 = pneg %p11084_p11  ;;  %p11091_p0 = por %p11090_p13, %p11089_p3 }
  0x3c   : > { %p11092_p4 = pnand %p11091_p0, %p11085_p2 }
  0x3e   : > { %11095 = shalt.err (!%p11092_p4)
}
  0x3f   : > { %s14875_s14 = smov 64   ;;  %s14877_s30 = smov 4  }
  0x40   : > { %10890 = dma.hbm_to_vmem [thread:$0]  (!%p11514_p8), %s11506_s2, 2048, %s11508_s5, %s11518_s7, %s14875_s14, %s14875_s14, %s14877_s30  }
  0x41   : > { %s11550_s15 = sadd.s32 4294967295, %s11342_s10   ;;  %p9094_p1 = scmp.ge.s32.totalorder %s11342_s10, 1 }
  0x42   : > { %p14881_p2 = scmp.eq.s32.totalorder %s11550_s15, 0  ;;  %p221_p3 = scmp.eq.s32.totalorder %s11550_s15, 7 }
  0x43   : > { %p234_p7 = scmp.lt.s32.totalorder %s11342_s10, 9  ;;  %p15067_p10 = scmp.ne.s32.totalorder %s11306_s25, %s11302_s24 }
  0x44   : > { %p15070_p5 = scmp.ne.s32.totalorder %s11310_s26, %s11306_s25  ;;  %s11347_s5 = smov [#allocation9]  }
  0x45   : > { %p11561_p12 = por %p15067_p10, %p14881_p2  ;;  %p11572_p8 = pnand %p9094_p1, %p234_p7 }
  0x46   : > { %p11568_p9 = por %p221_p3, %p15070_p5  ;;  %s246_s19 = sshll.u32 %s11347_s5, 4  ;;  %s247_s19 = int_to_ptr.vmem [resolvable:$true] %s246_s19 }
  0x47   : > { %s15068_s16 = scalar_select %p11561_p12, 1, 0 }
  0x48   : > { %s15071_s20 = scalar_select %p11568_p9, 1, 0 }
  0x49   : > { %15069 = sst [smem:[#allocation26_spill]] %s15068_s16  ;;  %p10880_p11 = pneg %p11572_p8 }
  0x4a   : > { %15072 = sst [smem:[#allocation27_spill]] %s15071_s20 }
  0x4b   : > { %s15073_s2 = scalar_select %p11572_p8, 1, 0 }
  0x4c   : > { %p11580_p13 = pnand %p10880_p11, %p14881_p2  ;;  %s15075_s3 = sld [smem:[#allocation141_spill]] }
  0x4e   : > { %p11098_p1 = pneg %p11580_p13 }
  0x52   : > { %s11096_s14 = scalar_lea.hbm %s15075_s3, 4608 }
  0x53   : > { %p11097_p4 = scmp.ne.s32.totalorder %s15075_s3, %s11096_s14  ;;  %p11103_p10 = scmp.lt.u32.totalorder %s11096_s14, %s15075_s3 }
  0x55   : > { %p11099_p3 = pnand %p11098_p1, %p11097_p4 }
  0x57   : > { %p11100_p7 = pneg %p11099_p3 }
  0x59   : > { %p11105_p5 = pnand %p11103_p10, %p11100_p7 }
  0x5b   : > { %11108 = shalt.err (!%p11105_p5)
}
  0x5c   : > { %s11109_s24 = scalar_lea.vmem %s247_s19, 4608  ;;  %p11117_p6 = scmp.lt.s32.totalorder %s247_s19, %s247_s19 }
  0x5d   : > { %p11110_p11 = scmp.ne.s32.totalorder %s247_s19, %s11109_s24  ;;  %p11118_p9 = scmp.lt.s32.totalorder %s11109_s24, %s11109_s24 }
  0x5f   : > { %p11112_p2 = pnand %p11110_p11, %p11098_p1  ;;  %p11119_p12 = por %p11118_p9, %p11117_p6 }
  0x61   : > { %p11113_p0 = pneg %p11112_p2 }
  0x63   : > { %p11120_p8 = pnand %p11119_p12, %p11113_p0 }
  0x65   : > { %11123 = shalt.err (!%p11120_p8)
}
  0x66   : > { %s15076_s1 = smov 4   ;;  %s15077_s30 = smov 64  }
  0x67   : > { %10883 = dma.hbm_to_vmem [thread:$0]  (!%p11580_p13), %s15075_s3, 4608, %s247_s19, [#allocation10], %s15077_s30, %s15077_s30, %s15076_s1  }
  0x68   : > { %p15078_p6 = scmp.ge.s32.totalorder %s15386_s13, 2  ;;  %s9088_s24 = sshll.u32 %s11334_s8, 3 }
  0x69   : > { %s9090_s17 = sshll.u32 %s15384_s12, 3  ;;  %s9089_s14 = sadd.s32 4294967295, %s9088_s24 }
  0x6a   : > { %s15388_s13 = smov (%p15078_p6, %s15386_s13), 0  ;;  %s9091_s11 = sadd.s32 4294967295, %s9090_s17 }
  0x6b   : > { %15079 = sst [smem:[#allocation28_spill]] %s15388_s13  ;;  %p44_p2 = scmp.gt.s32.totalorder %s9089_s14, 0 }
  0x6c   : > { %p48_p12 = scmp.gt.s32.totalorder %s9091_s11, 0  ;;  %s11613_s5 = ssub.s32 %s11338_s9, %s15388_s13 }
  0x6d   : > { %s55_s19 = sadd.s32 1, %s11322_s29  ;;  %s15390_s14 = smov (!%p44_p2, %s9089_s14), 0 }
  0x6e   : > { %s15392_s11 = smov (!%p48_p12, %s9091_s11), 0  ;;  %p62_p9 = scmp.ne.s32.totalorder %s11322_s29, %s11318_s28 }
  0x6f   : > { %p68_p8 = scmp.ne.s32.totalorder %s11318_s28, %s11314_s27  ;;  %s51_s4 = ssub.s32 %s15390_s14, %s15392_s11 }
  0x70   : > { %s15080_s6 = ssub.s32 %s11334_s8, %s15384_s12  ;;  %s52_s20 = sor.u32 %s51_s4, %s11613_s5 }
  0x71   : > { %s80_s3 = sor.u32 %s15080_s6, %s11613_s5  ;;  %p15081_p13 = scmp.eq.s32.totalorder %s11342_s10, 0 }
  0x72   : > { %p53_p4 = scmp.eq.s32.totalorder %s52_s20, 0  ;;  %p15083_p1 = scmp.eq.s32.totalorder %s11550_s15, 0 }
  0x73   : > { %p11627_p0 = por %p15081_p13, %p62_p9  ;;  %p81_p7 = scmp.eq.s32.totalorder %s80_s3, 0 }
  0x74   : > { %p11633_p3 = por %p15083_p1, %p68_p8  ;;  %s11637_s27 = sadd.s32 8, %s9088_s24 }
  0x75   : > { %s11640_s11 = scalar_select %p53_p4, %s11322_s29, %s55_s19  }
  0x76   : > { %s15084_s13 = scalar_select %p11633_p3, 1, 0 }
  0x77   : > { %15086 = sst [smem:[#allocation30_spill]] %s11640_s11  ;;  %s15087_s4 = sadd.s32 1, %s11310_s26 }
  0x78   : > { %15085 = sst [smem:[#allocation29_spill]] %s15084_s13  ;;  %s11648_s12 = sadd.s32 8, %s9090_s17 }
  0x79   : > { %s11645_s6 = scalar_select %p81_p7, %s11310_s26, %s15087_s4  }
  0x7a   : > { %s266_s20 = sand.u32 1, %s11322_s29   ;;  %s9100_s8 = sshll.u32 %s15390_s14, 2 }
  0x7b   : > { %s9097_s9 = sshll.u32 %s266_s20, 4  ;;  %s280_s25 = sadd.s32 %s11497_s18, %s9100_s8 }
  0x7c   : > { %s270_s3 = scalar_lea.vmem [#allocation3], %s9097_s9  ;;  %s9102_s28 = sshll.u32 %s280_s25, 6 }
  0x7d   : > { %s283_s13 = sshll.u32 %s270_s3, 4  ;;  %s11658_s11 = scalar_lea.hbm %s14860_s0, %s9102_s28  ;;  %s11653_s13 = int_to_ptr.vmem [resolvable:$true] %s283_s13 }
  0x7e   : > { %p15088_p11 = scmp.lt.s32.totalorder %s11342_s10, 8  ;;  %s11668_s25 = scalar_lea.sflag [#allocation4], %s266_s20 }
  0x7f   : > { %s11124_s8 = scalar_lea.hbm %s11658_s11, 256  ;;  %s11129_s16 = scalar_lea.hbm %s14860_s0, 16384 }
  0x80   : > { %p11664_p6 = pnand %p15088_p11, %p11627_p0  ;;  %p11125_p2 = scmp.ne.s32.totalorder %s11658_s11, %s11124_s8 }
  0x81   : > { %p11130_p13 = scmp.lt.u32.totalorder %s11658_s11, %s14860_s0  ;;  %p11131_p0 = scmp.lt.u32.totalorder %s11129_s16, %s11124_s8 }
  0x82   : > { %p11126_p12 = pneg %p11664_p6  ;;  %p11133_p1 = scmp.lt.u32.totalorder %s11124_s8, %s11658_s11 }
  0x83   : > { %p11132_p4 = por %p11131_p0, %p11130_p13 }
  0x84   : > { %p11127_p9 = pnand %p11126_p12, %p11125_p2 }
  0x85   : > { %p11134_p7 = por %p11133_p1, %p11132_p4 }
  0x86   : > { %p11128_p8 = pneg %p11127_p9 }
  0x88   : > { %p11135_p11 = pnand %p11134_p7, %p11128_p8 }
  0x8a   : > { %11138 = shalt.err (!%p11135_p11)
}
  0x8b   : > { %s11139_s20 = scalar_lea.vmem %s11653_s13, 256  ;;  %s11348_s3 = smov [#allocation3]  }
  0x8c   : > { %p11140_p2 = scmp.ne.s32.totalorder %s11653_s13, %s11139_s20  ;;  %s11144_s24 = sshll.u32 %s11348_s3, 4  ;;  %s11145_s24 = int_to_ptr.vmem [resolvable:$false] %s11144_s24 }
  0x8d   : > { %s11146_s19 = scalar_lea.vmem %s11145_s24, 512  ;;  %p11147_p10 = scmp.lt.s32.totalorder %s11653_s13, %s11145_s24 }
  0x8e   : > { %p11142_p9 = pnand %p11140_p2, %p11126_p12  ;;  %p11148_p13 = scmp.lt.s32.totalorder %s11146_s19, %s11139_s20 }
  0x90   : > { %p11143_p5 = pneg %p11142_p9  ;;  %p11149_p0 = por %p11148_p13, %p11147_p10 }
  0x92   : > { %p11150_p4 = pnand %p11149_p0, %p11143_p5 }
  0x94   : > { %11153 = shalt.err (!%p11150_p4)
}
  0x95   : > { %10887 = dma.hbm_to_vmem [thread:$0]  (!%p11664_p6), %s11658_s11, 256, %s11653_s13, %s11668_s25, %s15077_s30, %s15077_s30, %s15076_s1  }
  0x96   : > { %s119_s17 = sadd.s32 1, %s11298_s23  ;;  %p15090_p10 = scmp.lt.s32.totalorder %s11637_s27, 31 }
  0x97   : > { %p15091_p5 = scmp.lt.s32.totalorder %s11648_s12, 31  ;;  %p126_p12 = scmp.ne.s32.totalorder %s11298_s23, %s11294_s22 }
  0x98   : > { %s15394_s27 = smov (!%p15090_p10, %s11637_s27), 31  ;;  %p132_p8 = scmp.ne.s32.totalorder %s11294_s22, %s11290_s21 }
  0x99   : > { %s15396_s12 = smov (!%p15091_p5, %s11648_s12), 31  ;;  %s319_s28 = sand.u32 1, %s11298_s23  }
  0x9a   : > { %s115_s8 = ssub.s32 %s15394_s27, %s15396_s12  ;;  %p15092_p1 = scmp.eq.s32.totalorder %s11342_s10, 0 }
  0x9b   : > { %s116_s9 = sor.u32 %s115_s8, %s11613_s5  ;;  %p15093_p2 = scmp.eq.s32.totalorder %s11550_s15, 0 }
  0x9c   : > { %p128_p7 = por %p126_p12, %p15092_p1  ;;  %p117_p11 = scmp.eq.s32.totalorder %s116_s9, 0 }
  0x9d   : > { %p11716_p9 = por %p132_p8, %p15093_p2  ;;  %s9108_s13 = sshll.u32 %s319_s28, 4 }
  0x9e   : > { %s9110_s11 = sshll.u32 %s15394_s27, 2  ;;  %s321_s20 = scalar_lea.vmem [#allocation8], %s9108_s13 }
  0x9f   : > { %s15094_s16 = scalar_select %p11716_p9, 1, 0 }
  0xa0   : > { %s11721_s25 = scalar_select %p117_p11, %s11298_s23, %s119_s17  }
  0xa1   : > { %s331_s14 = sadd.s32 %s9110_s11, %s11497_s18  ;;  %s334_s21 = sshll.u32 %s321_s20, 4  ;;  %s11729_s21 = int_to_ptr.vmem [resolvable:$true] %s334_s21 }
  0xa2   : > { %s9112_s4 = sshll.u32 %s331_s14, 6  ;;  %s15095_s24 = sld [smem:[#allocation140_spill]] }
  0xa3   : > { %p15097_p6 = scmp.lt.s32.totalorder %s11342_s10, 8 }
  0xa5   : > { %p11733_p13 = pnand %p15097_p6, %p128_p7 }
  0xa7   : > { %p11156_p4 = pneg %p11733_p13 }
  0xa8   : > { %s15096_s19 = smov %s15095_s24  ;;  %s11727_s5 = scalar_lea.hbm %s15095_s24, %s9112_s4 }
  0xa9   : > { %s11154_s18 = scalar_lea.hbm %s11727_s5, 256  ;;  %s11159_s28 = scalar_lea.hbm %s15096_s19, 16384 }
  0xaa   : > { %p11155_p0 = scmp.ne.s32.totalorder %s11727_s5, %s11154_s18  ;;  %p11160_p12 = scmp.lt.u32.totalorder %s11727_s5, %s15096_s19 }
  0xab   : > { %p11161_p8 = scmp.lt.u32.totalorder %s11159_s28, %s11154_s18  ;;  %p11163_p7 = scmp.lt.u32.totalorder %s11154_s18, %s11727_s5 }
  0xac   : > { %p11157_p10 = pnand %p11156_p4, %p11155_p0 }
  0xad   : > { %p11162_p1 = por %p11161_p8, %p11160_p12 }
  0xae   : > { %p11158_p5 = pneg %p11157_p10 }
  0xaf   : > { %p11164_p11 = por %p11163_p7, %p11162_p1 }
  0xb1   : > { %p11165_p2 = pnand %p11164_p11, %p11158_p5 }
  0xb3   : > { %11168 = shalt.err (!%p11165_p2)
}
  0xb4   : > { %s11169_s11 = scalar_lea.vmem %s11729_s21, 256  ;;  %s11349_s14 = smov [#allocation8]  }
  0xb5   : > { %p11170_p6 = scmp.ne.s32.totalorder %s11729_s21, %s11169_s11  ;;  %s11174_s4 = sshll.u32 %s11349_s14, 4  ;;  %s11175_s4 = int_to_ptr.vmem [resolvable:$false] %s11174_s4 }
  0xb6   : > { %s11176_s20 = scalar_lea.vmem %s11175_s4, 512  ;;  %p11177_p9 = scmp.lt.s32.totalorder %s11729_s21, %s11175_s4 }
  0xb7   : > { %p11172_p0 = pnand %p11170_p6, %p11156_p4  ;;  %p11178_p12 = scmp.lt.s32.totalorder %s11176_s20, %s11169_s11 }
  0xb9   : > { %p11173_p10 = pneg %p11172_p0  ;;  %p11179_p8 = por %p11178_p12, %p11177_p9 }
  0xbb   : > { %p11180_p1 = pnand %p11179_p8, %p11173_p10 }
  0xbd   : > { %11183 = shalt.err (!%p11180_p1)
}
  0xbe   : > { %10893 = dma.hbm_to_vmem [thread:$0]  (!%p11733_p13), %s11727_s5, 256, %s11729_s21, %s11518_s7, %s15077_s30, %s15077_s30, %s15076_s1  }
  0xbf   : > { %p15099_p4 = scmp.ne.s32.totalorder %s15073_s2, 0 }
  0xc1   : > { %346 = sbr.rel (%p15099_p4) target bundleno = 1192 (0x4a8), region = 44 }
  0xc8   : > { %s15100_s3 = sld [smem:[#allocation19_spill]] }
  0xce   : > { %s348_s24 = sand.u32 1, %s15100_s3  }
  0xcf   : > { %s9114_s18 = sshll.u32 %s348_s24, 4  ;;  %s349_s17 = scalar_lea.sflag [#allocation4], %s348_s24 }
  0xd0   : > { %s11769_s8 = scalar_lea.vmem [#allocation3], %s9114_s18 }
  0xd1   : > { %11269 = dma.done.wait (%p11633_p3), %s349_s17, 256  }
  0xd2   : > { %11271 = vsyncadd (%p11633_p3), %s349_s17, 4294967040  ;;  %s15102_s27 = sld [smem:[#allocation18_spill]]  ;;  %s15103_s28 = sld [smem:[#allocation26_spill]] }
  0xd3   : > { %s357_s7 = sand.u32 1, %s11550_s15  }
  0xd4   : > { %s358_s30 = scalar_lea.sflag [#allocation7], %s357_s7 }
  0xd8   : > { %s359_s1 = sand.u32 1, %s15102_s27   ;;  %p15104_p9 = scmp.ne.s32.totalorder %s15103_s28, 0 }
  0xd9   : > { %s11779_s2 = sshll.u32 %s359_s1, 7 }
  0xda   : > { %s11782_s21 = scalar_lea.vmem [#allocation6], %s11779_s2 }
  0xdb   : > { %11273 = dma.done.wait (%p15104_p9), %s358_s30, 2048  }
  0xdc   : > { %11275 = vsyncadd (%p15104_p9), %s358_s30, 4294965248  ;;  %s368_s5 = sand.u32 1, %s11294_s22   ;;  %p15105_p3 = scmp.ne.s32.totalorder %s15094_s16, 0 }
  0xdd   : > { %s9116_s9 = sshll.u32 %s368_s5, 4 }
  0xde   : > { %s11789_s13 = scalar_lea.vmem [#allocation8], %s9116_s9 }
  0xdf   : > { %11277 = dma.done.wait (%p15105_p3), %s358_s30, 256  }
  0xe0   : > { %11279 = vsyncadd (%p15105_p3), %s358_s30, 4294967040  ;;  %p15106_p13 = scmp.eq.s32.totalorder %s11550_s15, 0 }
  0xe2   : > { %11281 = dma.done.wait (%p15106_p13), [#allocation10], 4608   ;;  %p15107_p5 = pmov %p15106_p13 }
  0xe3   : > { %vm424_vm0 = vcmask 519168   ;;  %vm429_vm1 = vcmask 516096   ;;  %v11350_v0 = vmov 0   ;;  %v486_v1 = vld [vmem:[%s11782_s21] sm:$0xf]  ;;  %s11916_s15 = scalar_lea.vmem [#allocation11], %s11779_s2 }
  0xe4   : > { %11283 = vsyncadd (%p15107_p5), [#allocation10], 4294962688  ;;  %436 = vst.msk [vmem:[#allocation2 + $0x28] sm:$0xf] %vm424_vm0, %v11350_v0  ;;  %v487_v2 = vld [vmem:[%s11782_s21 + $0x4] sm:$0xf] }
  0xe5   : > { %431 = vst.msk [vmem:[#allocation2 + $0x14] sm:$0xf] %vm424_vm0, %v11350_v0  ;;  %432 = vst.msk [vmem:[#allocation2 + $0x18] sm:$0xf] %vm424_vm0, %v11350_v0  ;;  %v488_v3 = vld [vmem:[%s11782_s21 + $0x8] sm:$0xf] }
  0xe6   : > { %433 = vst.msk [vmem:[#allocation2 + $0x1c] sm:$0xf] %vm424_vm0, %v11350_v0  ;;  %434 = vst.msk [vmem:[#allocation2 + $0x20] sm:$0xf] %vm424_vm0, %v11350_v0  ;;  %v489_v4 = vld [vmem:[%s11782_s21 + $0xc] sm:$0xf] }
  0xe7   : > { %437 = vst.msk [vmem:[#allocation2 + $0x2c] sm:$0xf] %vm424_vm0, %v11350_v0  ;;  %438 = vst.msk [vmem:[#allocation2 + $0x30] sm:$0xf] %vm424_vm0, %v11350_v0  ;;  %v490_v5 = vld [vmem:[%s11782_s21 + $0x10] sm:$0xf] }
  0xe8   : > { %439 = vst.msk [vmem:[#allocation2 + $0x34] sm:$0xf] %vm424_vm0, %v11350_v0  ;;  %441 = vst.msk [vmem:[#allocation2 + $0x3c] sm:$0xf] %vm424_vm0, %v11350_v0  ;;  %v491_v6 = vld [vmem:[%s11782_s21 + $0x14] sm:$0xf] }
  0xe9   : > { %442 = vst.msk [vmem:[#allocation2 + $0x40] sm:$0xf] %vm424_vm0, %v11350_v0  ;;  %443 = vst.msk [vmem:[#allocation2 + $0x44] sm:$0xf] %vm424_vm0, %v11350_v0  ;;  %v492_v7 = vld [vmem:[%s11782_s21 + $0x18] sm:$0xf] }
  0xea   : > { %444 = vst.msk [vmem:[#allocation2 + $0x48] sm:$0xf] %vm424_vm0, %v11350_v0  ;;  %446 = vst.msk [vmem:[#allocation2 + $0x50] sm:$0xf] %vm424_vm0, %v11350_v0  ;;  %v493_v8 = vld [vmem:[%s11782_s21 + $0x1c] sm:$0xf] }
  0xeb   : > { %447 = vst.msk [vmem:[#allocation2 + $0x54] sm:$0xf] %vm424_vm0, %v11350_v0  ;;  %448 = vst.msk [vmem:[#allocation2 + $0x58] sm:$0xf] %vm424_vm0, %v11350_v0  ;;  %v494_v9 = vld [vmem:[%s11782_s21 + $0x20] sm:$0xf] }
  0xec   : > { %449 = vst.msk [vmem:[#allocation2 + $0x5c] sm:$0xf] %vm424_vm0, %v11350_v0  ;;  %451 = vst.msk [vmem:[#allocation2 + $0x64] sm:$0xf] %vm424_vm0, %v11350_v0  ;;  %v495_v10 = vld [vmem:[%s11782_s21 + $0x24] sm:$0xf] }
  0xed   : > { %452 = vst.msk [vmem:[#allocation2 + $0x68] sm:$0xf] %vm424_vm0, %v11350_v0  ;;  %453 = vst.msk [vmem:[#allocation2 + $0x6c] sm:$0xf] %vm424_vm0, %v11350_v0  ;;  %v496_v11 = vld [vmem:[%s11782_s21 + $0x28] sm:$0xf] }
  0xee   : > { %454 = vst.msk [vmem:[#allocation2 + $0x70] sm:$0xf] %vm424_vm0, %v11350_v0  ;;  %456 = vst.msk [vmem:[#allocation2 + $0x78] sm:$0xf] %vm424_vm0, %v11350_v0  ;;  %v497_v12 = vld [vmem:[%s11782_s21 + $0x2c] sm:$0xf] }
  0xef   : > { %457 = vst.msk [vmem:[#allocation2 + $0x7c] sm:$0xf] %vm424_vm0, %v11350_v0  ;;  %458 = vst.msk [vmem:[#allocation2 + $0x80] sm:$0xf] %vm424_vm0, %v11350_v0  ;;  %v498_v13 = vld [vmem:[%s11782_s21 + $0x30] sm:$0xf] }
  0xf0   : > { %459 = vst.msk [vmem:[#allocation2 + $0x84] sm:$0xf] %vm424_vm0, %v11350_v0  ;;  %461 = vst.msk [vmem:[#allocation2 + $0x8c] sm:$0xf] %vm424_vm0, %v11350_v0  ;;  %v499_v14 = vld [vmem:[%s11782_s21 + $0x34] sm:$0xf] }
  0xf1   : > { %462 = vst.msk [vmem:[#allocation2 + $0x90] sm:$0xf] %vm424_vm0, %v11350_v0  ;;  %463 = vst.msk [vmem:[#allocation2 + $0x94] sm:$0xf] %vm424_vm0, %v11350_v0  ;;  %v500_v15 = vld [vmem:[%s11782_s21 + $0x38] sm:$0xf] }
  0xf2   : > { %464 = vst.msk [vmem:[#allocation2 + $0x98] sm:$0xf] %vm424_vm0, %v11350_v0  ;;  %466 = vst.msk [vmem:[#allocation2 + $0xa0] sm:$0xf] %vm424_vm0, %v11350_v0  ;;  %v501_v16 = vld [vmem:[%s11782_s21 + $0x3c] sm:$0xf] }
  0xf3   : > { %467 = vst.msk [vmem:[#allocation2 + $0xa4] sm:$0xf] %vm424_vm0, %v11350_v0  ;;  %468 = vst.msk [vmem:[#allocation2 + $0xa8] sm:$0xf] %vm424_vm0, %v11350_v0  ;;  %v502_v17 = vld [vmem:[%s11782_s21 + $0x40] sm:$0xf] }
  0xf4   : > { %469 = vst.msk [vmem:[#allocation2 + $0xac] sm:$0xf] %vm424_vm0, %v11350_v0  ;;  %471 = vst.msk [vmem:[#allocation2 + $0xb4] sm:$0xf] %vm424_vm0, %v11350_v0  ;;  %v503_v18 = vld [vmem:[%s11782_s21 + $0x44] sm:$0xf] }
  0xf5   : > { %472 = vst.msk [vmem:[#allocation2 + $0xb8] sm:$0xf] %vm424_vm0, %v11350_v0  ;;  %473 = vst.msk [vmem:[#allocation2 + $0xbc] sm:$0xf] %vm424_vm0, %v11350_v0  ;;  %v504_v19 = vld [vmem:[%s11782_s21 + $0x48] sm:$0xf] }
  0xf6   : > { %474 = vst.msk [vmem:[#allocation2 + $0xc0] sm:$0xf] %vm424_vm0, %v11350_v0  ;;  %476 = vst.msk [vmem:[#allocation2 + $0xc8] sm:$0xf] %vm424_vm0, %v11350_v0  ;;  %v505_v20 = vld [vmem:[%s11782_s21 + $0x4c] sm:$0xf] }
  0xf7   : > { %477 = vst.msk [vmem:[#allocation2 + $0xcc] sm:$0xf] %vm424_vm0, %v11350_v0  ;;  %478 = vst.msk [vmem:[#allocation2 + $0xd0] sm:$0xf] %vm424_vm0, %v11350_v0  ;;  %v506_v21 = vld [vmem:[%s11782_s21 + $0x50] sm:$0xf] }
  0xf8   : > { %479 = vst.msk [vmem:[#allocation2 + $0xd4] sm:$0xf] %vm424_vm0, %v11350_v0  ;;  %481 = vst.msk [vmem:[#allocation2 + $0xdc] sm:$0xf] %vm424_vm0, %v11350_v0  ;;  %v507_v22 = vld [vmem:[%s11782_s21 + $0x54] sm:$0xf] }
  0xf9   : > { %430 = vst.msk [vmem:[#allocation2 + $0x10] sm:$0x1] %vm429_vm1, %v11350_v0  ;;  %435 = vst.msk [vmem:[#allocation2 + $0x24] sm:$0x1] %vm429_vm1, %v11350_v0  ;;  %v508_v23 = vld [vmem:[%s11782_s21 + $0x58] sm:$0xf] }
  0xfa   : > { %440 = vst.msk [vmem:[#allocation2 + $0x38] sm:$0x1] %vm429_vm1, %v11350_v0  ;;  %445 = vst.msk [vmem:[#allocation2 + $0x4c] sm:$0x1] %vm429_vm1, %v11350_v0  ;;  %v509_v24 = vld [vmem:[%s11782_s21 + $0x5c] sm:$0xf] }
  0xfb   : > { %450 = vst.msk [vmem:[#allocation2 + $0x60] sm:$0x1] %vm429_vm1, %v11350_v0  ;;  %455 = vst.msk [vmem:[#allocation2 + $0x74] sm:$0x1] %vm429_vm1, %v11350_v0  ;;  %v510_v25 = vld [vmem:[%s11782_s21 + $0x60] sm:$0xf] }
  0xfc   : > { %460 = vst.msk [vmem:[#allocation2 + $0x88] sm:$0x1] %vm429_vm1, %v11350_v0  ;;  %465 = vst.msk [vmem:[#allocation2 + $0x9c] sm:$0x1] %vm429_vm1, %v11350_v0  ;;  %v511_v26 = vld [vmem:[%s11782_s21 + $0x64] sm:$0xf] }
  0xfd   : > { %470 = vst.msk [vmem:[#allocation2 + $0xb0] sm:$0x1] %vm429_vm1, %v11350_v0  ;;  %475 = vst.msk [vmem:[#allocation2 + $0xc4] sm:$0x1] %vm429_vm1, %v11350_v0  ;;  %v512_v27 = vld [vmem:[%s11782_s21 + $0x68] sm:$0xf] }
  0xfe   : > { %480 = vst.msk [vmem:[#allocation2 + $0xd8] sm:$0x1] %vm429_vm1, %v11350_v0  ;;  %v513_v28 = vld [vmem:[%s11782_s21 + $0x6c] sm:$0xf]  ;;  %v514_v29 = vld [vmem:[%s11782_s21 + $0x70] sm:$0xf] }
  0xff   : > { %519 = vst.msk [vmem:[#allocation2 + $0x28] sm:$0xf] %vm424_vm0, %v486_v1  ;;  %520 = vst.msk [vmem:[#allocation2 + $0x2c] sm:$0xf] %vm424_vm0, %v487_v2  ;;  %v515_v30 = vld [vmem:[%s11782_s21 + $0x74] sm:$0xf] }
 0x100   : > { %521 = vst.msk [vmem:[#allocation2 + $0x30] sm:$0xf] %vm424_vm0, %v488_v3  ;;  %522 = vst.msk [vmem:[#allocation2 + $0x34] sm:$0xf] %vm424_vm0, %v489_v4  ;;  %v516_v31 = vld [vmem:[%s11782_s21 + $0x78] sm:$0xf] }
 0x101   : > { %523 = vst.msk [vmem:[#allocation2 + $0x3c] sm:$0xf] %vm424_vm0, %v490_v5  ;;  %524 = vst.msk [vmem:[#allocation2 + $0x40] sm:$0xf] %vm424_vm0, %v491_v6  ;;  %v517_v32 = vld [vmem:[%s11782_s21 + $0x7c] sm:$0xf] }
 0x102   : > { %525 = vst.msk [vmem:[#allocation2 + $0x44] sm:$0xf] %vm424_vm0, %v492_v7  ;;  %526 = vst.msk [vmem:[#allocation2 + $0x48] sm:$0xf] %vm424_vm0, %v493_v8  ;;  %s15108_s16 = sld [smem:[#allocation20_spill]] }
 0x103   : > { %527 = vst.msk [vmem:[#allocation2 + $0x50] sm:$0xf] %vm424_vm0, %v494_v9  ;;  %528 = vst.msk [vmem:[#allocation2 + $0x54] sm:$0xf] %vm424_vm0, %v495_v10 }
 0x104   : > { %529 = vst.msk [vmem:[#allocation2 + $0x58] sm:$0xf] %vm424_vm0, %v496_v11  ;;  %530 = vst.msk [vmem:[#allocation2 + $0x5c] sm:$0xf] %vm424_vm0, %v497_v12 }
 0x105   : > { %531 = vst.msk [vmem:[#allocation2 + $0x64] sm:$0xf] %vm424_vm0, %v498_v13  ;;  %532 = vst.msk [vmem:[#allocation2 + $0x68] sm:$0xf] %vm424_vm0, %v499_v14 }
 0x106   : > { %533 = vst.msk [vmem:[#allocation2 + $0x6c] sm:$0xf] %vm424_vm0, %v500_v15  ;;  %534 = vst.msk [vmem:[#allocation2 + $0x70] sm:$0xf] %vm424_vm0, %v501_v16 }
 0x107   : > { %535 = vst.msk [vmem:[#allocation2 + $0x78] sm:$0xf] %vm424_vm0, %v502_v17  ;;  %536 = vst.msk [vmem:[#allocation2 + $0x7c] sm:$0xf] %vm424_vm0, %v503_v18 }
 0x108   : > { %537 = vst.msk [vmem:[#allocation2 + $0x80] sm:$0xf] %vm424_vm0, %v504_v19  ;;  %538 = vst.msk [vmem:[#allocation2 + $0x84] sm:$0xf] %vm424_vm0, %v505_v20  ;;  %p9119_p7 = scmp.le.s32.totalorder %s15108_s16, 0 }
 0x109   : > { %539 = vst.msk [vmem:[#allocation2 + $0x8c] sm:$0xf] %vm424_vm0, %v506_v21  ;;  %540 = vst.msk [vmem:[#allocation2 + $0x90] sm:$0xf] %vm424_vm0, %v507_v22  ;;  %v555_v33 = vld [vmem:[%s11769_s8] sm:$0xf] (!%p9119_p7) }
 0x10a   : > { %541 = vst.msk [vmem:[#allocation2 + $0x94] sm:$0xf] %vm424_vm0, %v508_v23  ;;  %542 = vst.msk [vmem:[#allocation2 + $0x98] sm:$0xf] %vm424_vm0, %v509_v24  ;;  %554 = sbr.rel (%p9119_p7) target bundleno = 273 (0x111), region = 64 }
 0x10b   : > { %543 = vst.msk [vmem:[#allocation2 + $0xa0] sm:$0xf] %vm424_vm0, %v510_v25  ;;  %544 = vst.msk [vmem:[#allocation2 + $0xa4] sm:$0xf] %vm424_vm0, %v511_v26  ;;  %v556_v34 = vld [vmem:[%s11769_s8 + $0x4] sm:$0xf] (!%p9119_p7) }
 0x10c   : > { %545 = vst.msk [vmem:[#allocation2 + $0xa8] sm:$0xf] %vm424_vm0, %v512_v27  ;;  %546 = vst.msk [vmem:[#allocation2 + $0xac] sm:$0xf] %vm424_vm0, %v513_v28  ;;  %v557_v35 = vld [vmem:[%s11769_s8 + $0x8] sm:$0xf] (!%p9119_p7) }
 0x10d   : > { %547 = vst.msk [vmem:[#allocation2 + $0xb4] sm:$0xf] %vm424_vm0, %v514_v29  ;;  %548 = vst.msk [vmem:[#allocation2 + $0xb8] sm:$0xf] %vm424_vm0, %v515_v30  ;;  %v558_v36 = vld [vmem:[%s11769_s8 + $0xc] sm:$0xf] (!%p9119_p7) }
 0x10e   : > { %549 = vst.msk [vmem:[#allocation2 + $0xbc] sm:$0xf] %vm424_vm0, %v516_v31  ;;  %550 = vst.msk [vmem:[#allocation2 + $0xc0] sm:$0xf] %vm424_vm0, %v517_v32 }
 0x10f   : > { %560 = vst.msk [vmem:[#allocation2 + $0x14] sm:$0xf] (!%p9119_p7), %vm424_vm0, %v555_v33  ;;  %561 = vst.msk [vmem:[#allocation2 + $0x18] sm:$0xf] (!%p9119_p7), %vm424_vm0, %v556_v34 }
 0x110   : > { %562 = vst.msk [vmem:[#allocation2 + $0x1c] sm:$0xf] (!%p9119_p7), %vm424_vm0, %v557_v35  ;;  %563 = vst.msk [vmem:[#allocation2 + $0x20] sm:$0xf] (!%p9119_p7), %vm424_vm0, %v558_v36 }
 0x111 PF: > { %s15109_s11 = sld [smem:[#allocation20_spill]] }
 0x117   : > { %p9120_p11 = scmp.ge.s32.totalorder %s15109_s11, 3 }
 0x118   : > { %v568_v37 = vld [vmem:[%s11789_s13] sm:$0xf] (!%p9120_p11)  ;;  %v569_v38 = vld [vmem:[%s11789_s13 + $0x4] sm:$0xf] (!%p9120_p11)  ;;  %v570_v39 = vld [vmem:[%s11789_s13 + $0x8] sm:$0xf] (!%p9120_p11) }
 0x119   : > { %567 = sbr.rel (%p9120_p11) target bundleno = 288 (0x120), region = 68  ;;  %573 = vst.msk [vmem:[#allocation2 + $0xc8] sm:$0xf] (!%p9120_p11), %vm424_vm0, %v568_v37  ;;  %574 = vst.msk [vmem:[#allocation2 + $0xcc] sm:$0xf] (!%p9120_p11), %vm424_vm0, %v569_v38 }
 0x11a   : > { %575 = vst.msk [vmem:[#allocation2 + $0xd0] sm:$0xf] (!%p9120_p11), %vm424_vm0, %v570_v39  ;;  %v571_v40 = vld [vmem:[%s11789_s13 + $0xc] sm:$0xf] (!%p9120_p11) }
 0x11b   : > { %576 = vst.msk [vmem:[#allocation2 + $0xd4] sm:$0xf] (!%p9120_p11), %vm424_vm0, %v571_v40 }
 0x120 PF: > { %v11024_v41 = vld [vmem:[#allocation9 + $0x80] sm:$0xff]   ;;  %v14904_v42 = vmov 0.0   ;;  %v11026_v44 = vld [vmem:[#allocation9 + $0x88] sm:$0xff]   ;;  %vm11352_vm2 = vmmov 0   ;;  %v691_v46 = vlaneseq  ;;  %v11028_v47 = vld [vmem:[#allocation9 + $0x90] sm:$0xff]   ;;  %vm2683_vm3 = vcmask 523264  }
 0x121   : > { %9970 = vmatprep.subr.bf16.mxu0 %v14904_v42  ;;  %9666 = vmatprep.subr.bf16.mxu1 %v14904_v42  ;;  %v11025_v43 = vld [vmem:[#allocation9 + $0x20] sm:$0xff]   ;;  %v11027_v45 = vld [vmem:[#allocation9 + $0x28] sm:$0xff]   ;;  %v11029_v48 = vld [vmem:[#allocation9 + $0x30] sm:$0xff]   ;;  %v11353_v53 = vmov 1966171168   ;;  %s15353_s20 = sld [smem:[#allocation142_spill]] }
 0x122   : > { %9971 = vmatpush3.bf16.msra.mxu0 %v11024_v41  ;;  %9674 = vmatprep.mubr.msk.bf16.mxu1 %vm11352_vm2, %v14904_v42  ;;  %v11945_v49 = vshrl.u32 %v691_v46, 7  ;;  %v11030_v50 = vld [vmem:[#allocation9 + $0x98] sm:$0xff]   ;;  %v9122_v51 = vld.sshfl [vmem:[#allocation2 + $0x14] sm:$0x33 pattern:$0x75316420]  ;;  %v689_v54 = vunpack.c.l.s4 %v11353_v53 }
 0x123   : > { %9667 = vmatpush3.bf16.msra.mxu1 %v11025_v43  ;;  %9972 = vmatprep.subr.bf16.mxu0 %v14904_v42  ;;  %v9123_v52 = vld.sshfl [vmem:[#allocation2 + $0x18] sm:$0x33 pattern:$0x75316420]  ;;  %v11031_v56 = vld [vmem:[#allocation9 + $0x38] sm:$0xff]   ;;  %v702_v58 = vcombine.high %v9122_v51, %v9122_v51  ;;  %s15354_s24 = sld [smem:[#allocation143_spill]] }
 0x124   : > { %9668 = vmatprep.subr.bf16.mxu1 %v14904_v42  ;;  %9978 = vmatprep.mubr.msk.bf16.mxu0 %vm11352_vm2, %v14904_v42  ;;  %15110 = vst [vmem:[#allocation31_spill] sm:$0xff] %v11945_v49  ;;  %v9127_v55 = vld.sshfl [vmem:[#allocation2 + $0x28] sm:$0x33 pattern:$0x75316420]  ;;  %v690_v57 = vunpack.c.0.s8 %v689_v54  ;;  %v726_v60 = vcombine.high %v9123_v52, %v9123_v52  ;;  %s15357_s7 = sld [smem:[#allocation20_spill]] }
 0x125   : > { %v9128_v59 = vld.sshfl [vmem:[#allocation2 + $0x2c] sm:$0x33 pattern:$0x75316420]  ;;  %v812_v61 = vcombine.high %v9127_v55, %v9127_v55  ;;  %vm3751_vm4 = vsmask.f32 7424 }
 0x126   : > { %9973 = vmatpush3.bf16.msra.mxu0 %v11026_v44  ;;  %v9124_v62 = vld.sshfl [vmem:[#allocation2 + $0x1c] sm:$0x33 pattern:$0x75316420]  ;;  %v11951_v63 = vsub.s32 %v690_v57, %v11945_v49  ;;  %v836_v0 = vcombine.high %v9128_v59, %v9128_v59  ;;  %s15358_s2 = sld [smem:[#allocation21_spill]]  ;;  %s15360_s13 = sld [smem:[#allocation27_spill]] }
 0x127   : > { %9669 = vmatpush3.bf16.msra.mxu1 %v11027_v45  ;;  %9974 = vmatprep.subr.bf16.mxu0 %v14904_v42  ;;  %v9125_v1 = vld.sshfl [vmem:[#allocation2 + $0x20] sm:$0x33 pattern:$0x75316420]  ;;  %v750_v2 = vcombine.high %v9124_v62, %v9124_v62  ;;  %s8937_s11 = sshll.u32 %s11916_s15, 4  ;;  %s15361_s3 = sld [smem:[#allocation144_spill]]  ;;  %s14778_s11 = int_to_ptr.vmem [resolvable:$true] %s8937_s11 }
 0x128   : > { %9670 = vmatprep.subr.bf16.mxu1 %v14904_v42  ;;  %v774_v3 = vcombine.high %v9125_v1, %v9125_v1  ;;  %v11955_v4 = vrot.slane %v9122_v51, %v11951_v63  ;;  %v11958_v5 = vrot.slane %v702_v58, %v11951_v63  ;;  %v11961_v6 = vrot.slane %v9123_v52, %v11951_v63  ;;  %v9129_v35 = vld.sshfl [vmem:[#allocation2 + $0x30] sm:$0x33 pattern:$0x75316420]  ;;  %s11184_s17 = scalar_lea.vmem %s14778_s11, 2048  ;;  %s11355_s8 = smov [#allocation11]  }
 0x129   : > { %v11964_v7 = vrot.slane %v726_v60, %v11951_v63  ;;  %v11967_v8 = vrot.slane %v9127_v55, %v11951_v63  ;;  %v11970_v9 = vrot.slane %v812_v61, %v11951_v63  ;;  %v11973_v10 = vrot.slane %v9128_v59, %v11951_v63  ;;  %v9130_v45 = vld.sshfl [vmem:[#allocation2 + $0x34] sm:$0x33 pattern:$0x75316420]  ;;  %s15355_s18 = smov %s15354_s24  ;;  %p11185_p2 = scmp.ne.s32.totalorder %s14778_s11, %s11184_s17 }
 0x12a   : > { %9975 = vmatpush3.bf16.msra.mxu0 %v11028_v47  ;;  %v1826_v11 = vcombine.low %v11955_v4, %v11958_v5  ;;  %v9173_v12 = vcombine.high %v11955_v4, %v11958_v5  ;;  %v11981_v13 = vrot.slane %v836_v0, %v11951_v63  ;;  %v11984_v14 = vrot.slane %v9124_v62, %v11951_v63  ;;  %v11032_v52 = vld [vmem:[#allocation9 + $0xa0] sm:$0xff]   ;;  %v9126_v0 = vld.sshfl [vmem:[#allocation2 + $0x24] sm:$0x1 pattern:$0x75316420]  ;;  %s9476_s30 = sshll.u32 %s15357_s7, 5 }
 0x12b   : > { %9671 = vmatpush3.bf16.msra.mxu1 %v11029_v48  ;;  %9976 = vmatprep.subr.bf16.mxu0 %v14904_v42  ;;  %v1828_v15 = vcombine.low %v11961_v6, %v11964_v7  ;;  %v9174_v16 = vcombine.high %v11961_v6, %v11964_v7  ;;  %v3003_v17 = vcombine.low %v11967_v8, %v11970_v9  ;;  %v11033_v58 = vld [vmem:[#allocation9] sm:$0xff]   ;;  %s11188_s27 = sshll.u32 %s11355_s8, 4  ;;  %s11189_s27 = int_to_ptr.vmem [resolvable:$false] %s11188_s27 }
 0x12c   : > { %9672 = vmatprep.subr.bf16.mxu1 %v14904_v42  ;;  %v9210_v18 = vcombine.high %v11967_v8, %v11970_v9  ;;  %v1836_v19 = vrot.slane %v1826_v11, %v11951_v63  ;;  %v1843_v20 = vrot.slane %v9173_v12, %v11951_v63  ;;  %v3005_v21 = vcombine.low %v11973_v10, %v11981_v13  ;;  %s9439_s21 = sshll.u32 %s15358_s2, 7  ;;  %p15362_p6 = scmp.ne.s32.totalorder %s15360_s13, 0 }
 0x12d   : > { %v9211_v22 = vcombine.high %v11973_v10, %v11981_v13  ;;  %v1850_v23 = vrot.slane %v1828_v15, %v11951_v63  ;;  %v1857_v24 = vrot.slane %v9174_v16, %v11951_v63  ;;  %v12003_v25 = vrot.slane %v3003_v17, %v11951_v63  ;;  %v11034_v15 = vld [vmem:[#allocation9 + $0xa8] sm:$0xff]   ;;  %s8934_s9 = sadd.s32 %s9476_s30, %s9439_s21  ;;  %s11190_s28 = scalar_lea.vmem %s11189_s27, 4096 }
 0x12e   : > { %9977 = vmatpush3.bf16.msra.mxu0 %v11030_v50  ;;  %v12006_v26 = vrot.slane %v9210_v18, %v11951_v63  ;;  %v1858_v27 = vcombine.low %v1836_v19, %v1843_v20  ;;  %v12009_v28 = vrot.slane %v3005_v21, %v11951_v63  ;;  %v12015_v30 = vrot.slane %v750_v2, %v11951_v63  ;;  %s9440_s16 = sshll.u32 %s8934_s9, 6  ;;  %p11186_p0 = pnand %p11185_p2, %p15362_p6 }
 0x12f   : > { %9673 = vmatpush3.bf16.msra.mxu1 %v11031_v56  ;;  %10046 = vmatprep.subr.bf16.mxu0 %v14904_v42  ;;  %v12012_v29 = vrot.slane %v9211_v22, %v11951_v63  ;;  %v1859_v31 = vcombine.low %v1850_v23, %v1857_v24  ;;  %v12020_v33 = vrot.slane %v9125_v1, %v11951_v63  ;;  %v9131_v23 = vld.sshfl [vmem:[#allocation2 + $0x38] sm:$0x1 pattern:$0x75316420]  ;;  %s14776_s12 = scalar_lea.hbm %s15361_s3, %s9440_s16  ;;  %p11191_p12 = scmp.lt.s32.totalorder %s14778_s11, %s11189_s27 }
 0x130   : > { %9742 = vmatprep.subr.bf16.mxu1 %v14904_v42  ;;  %v4947_v32 = vcombine.low %v12003_v25, %v12006_v26  ;;  %v12023_v34 = vrot.slane %v774_v3, %v11951_v63  ;;  %v1866_v36 = vrot.slane %v1858_v27, %v11951_v63  ;;  %v1875_v38 = vcombine.low %v11984_v14, %v12015_v30  ;;  %p11187_p10 = pneg %p11186_p0  ;;  %p11192_p8 = scmp.lt.s32.totalorder %s11190_s28, %s11184_s17 }
 0x131   : > { %v4948_v37 = vcombine.low %v12009_v28, %v12012_v29  ;;  %v9175_v39 = vcombine.high %v11984_v14, %v12015_v30  ;;  %v1873_v40 = vrot.slane %v1859_v31, %v11951_v63  ;;  %v860_v50 = vcombine.high %v9129_v35, %v9129_v35 }
 0x132   : > { %v4955_v41 = vrot.slane %v4947_v32, %v11951_v63  ;;  %v1877_v43 = vcombine.low %v12020_v33, %v12023_v34  ;;  %v9176_v44 = vcombine.high %v12020_v33, %v12023_v34  ;;  %v1885_v47 = vrot.slane %v1875_v38, %v11951_v63  ;;  %p11193_p1 = por %p11192_p8, %p11191_p12 }
 0x133   : > { %v4962_v46 = vrot.slane %v4948_v37, %v11951_v63  ;;  %v1892_v48 = vrot.slane %v9175_v39, %v11951_v63  ;;  %v12041_v51 = vcombine.low %v1866_v36, %v1873_v40  ;;  %v12046_v55 = vrot.slane %v9129_v35, %v11951_v63  ;;  %v9132_v35 = vld.sshfl [vmem:[#allocation2 + $0x3c] sm:$0x33 pattern:$0x75316420]  ;;  %v11035_v40 = vld [vmem:[#allocation9 + $0xb0] sm:$0xff]  }
 0x134   : > { %v1899_v53 = vrot.slane %v1877_v43, %v11951_v63  ;;  %v1906_v54 = vrot.slane %v9176_v44, %v11951_v63  ;;  %v12051_v59 = vrot.slane %v860_v50, %v11951_v63  ;;  %v884_v60 = vcombine.high %v9130_v45, %v9130_v45  ;;  %v9133_v39 = vld.sshfl [vmem:[#allocation2 + $0x40] sm:$0x33 pattern:$0x75316420]  ;;  %p11194_p4 = pnand %p11193_p1, %p11187_p10 }
 0x135   : > { %15111 = vst [vmem:[#allocation32_spill] sm:$0xff] %v12041_v51  ;;  %v12048_v56 = vcombine.low %v4955_v41, %v4962_v46  ;;  %v1907_v57 = vcombine.low %v1885_v47, %v1892_v48  ;;  %9675 = vmatmul.mubr.msk.bf16.vlgmr.msra.gmra.mrb[0].mxu1 %vm2683_vm3, %v12041_v51  ;;  %v12056_v62 = vrot.slane %v9130_v45, %v11951_v63  ;;  %v11036_v45 = vld [vmem:[#allocation9 + $0x8] sm:$0xff]  }
 0x136   : > { %v1908_v61 = vcombine.low %v1899_v53, %v1906_v54  ;;  %9678 = vmatprep.mubr.msk.bf16.mxu1 %vm11352_vm2, %v14904_v42  ;;  %v12064_v2 = vrot.slane %v884_v60, %v11951_v63  ;;  %v3052_v11 = vcombine.low %v12046_v55, %v12051_v59  ;;  %v9212_v12 = vcombine.high %v12046_v55, %v12051_v59 }
 0x137   : > { %9979 = vmatmul.mubr.msk.bf16.vlgmr.msra.gmra.mrb[0].mxu0 %vm2683_vm3, %v12048_v56  ;;  %v1915_v1 = vrot.slane %v1907_v57, %v11951_v63  ;;  %9743 = vmatpush3.bf16.msra.mxu1 %v11033_v58  ;;  %v12078_v18 = vrot.slane %v9126_v0, %v11951_v63  ;;  %v827_v22 = vcombine.high %v11967_v8, %v11967_v8 }
 0x138   : > { %10047 = vmatpush3.bf16.msra.mxu0 %v11032_v52  ;;  %9982 = vmatprep.mubr.msk.bf16.mxu0 %vm11352_vm2, %v14904_v42  ;;  %v1922_v3 = vrot.slane %v1908_v61, %v11951_v63  ;;  %v3054_v16 = vcombine.low %v12056_v62, %v12064_v2  ;;  %v9213_v17 = vcombine.high %v12056_v62, %v12064_v2 }
 0x139   : > { %10048 = vmatprep.subr.bf16.mxu0 %v14904_v42  ;;  %v12084_v20 = vrot.slane %v3052_v11, %v11951_v63  ;;  %v12087_v21 = vrot.slane %v9212_v12, %v11951_v63  ;;  %9744 = vmatprep.subr.bf16.mxu1 %v14904_v42  ;;  %v828_v31 = vcombine.high %v11970_v9, %v11970_v9  ;;  %v11039_v11 = vld [vmem:[#allocation9 + $0x10] sm:$0xff]  }
 0x13a   : > { %v12081_v19 = vcombine.low %v1915_v1, %v1922_v3  ;;  %v12093_v24 = vrot.slane %v3054_v16, %v11951_v63  ;;  %v12096_v27 = vrot.slane %v9213_v17, %v11951_v63  ;;  %v851_v32 = vcombine.high %v11973_v10, %v11973_v10  ;;  %v11037_v3 = vld [vmem:[#allocation9 + $0xb8] sm:$0xff]  }
 0x13b   : > { %v4964_v36 = vcombine.low %v12084_v20, %v12087_v21  ;;  %v1924_v37 = vcombine.low %v12078_v18, %v11967_v8  ;;  %v1925_v38 = vcombine.low %v11970_v9, %v827_v22  ;;  %v1926_v43 = vcombine.low %v828_v31, %v11973_v10  ;;  %9745 = vmatpush3.bf16.msra.mxu1 %v11036_v45 }
 0x13c   : > { %15112 = vst [vmem:[#allocation33_spill] sm:$0xff] %v12081_v19  ;;  %10049 = vmatpush3.bf16.msra.mxu0 %v11034_v15  ;;  %v4965_v41 = vcombine.low %v12093_v24, %v12096_v27  ;;  %v1927_v44 = vcombine.low %v11981_v13, %v851_v32  ;;  %v12118_v47 = vrot.slane %v9131_v23, %v11951_v63 }
 0x13d   : > { %10050 = vmatprep.subr.bf16.mxu0 %v14904_v42  ;;  %9679 = vmatmul.mubr.msk.bf16.gmra.mrb[4].mxu1 %vm2683_vm3, %v12081_v19  ;;  %v4972_v8 = vrot.slane %v4964_v36, %v11951_v63  ;;  %v1934_v9 = vrot.slane %v1924_v37, %v11951_v63  ;;  %v1941_v46 = vrot.slane %v1925_v38, %v11951_v63  ;;  %v5611_v38 = vshll.u32 %v12048_v56, 16 }
 0x13e   : > { %v4979_v48 = vrot.slane %v4965_v41, %v11951_v63  ;;  %9682 = vmatprep.mubr.msk.bf16.mxu1 %vm11352_vm2, %v14904_v42  ;;  %v1948_v10 = vrot.slane %v1926_v43, %v11951_v63  ;;  %v1955_v50 = vrot.slane %v1927_v44, %v11951_v63  ;;  %v922_v52 = vcombine.high %v9132_v35, %v9132_v35  ;;  %v9134_v43 = vld.sshfl [vmem:[#allocation2 + $0x44] sm:$0x33 pattern:$0x75316420] }
 0x13f   : > { %v1956_v53 = vcombine.low %v1934_v9, %v1941_v46  ;;  %v12126_v54 = vrot.slane %v9132_v35, %v11951_v63  ;;  %v946_v57 = vcombine.high %v9133_v39, %v9133_v39  ;;  %v12129_v58 = vrot.slane %v9133_v39, %v11951_v63  ;;  %9746 = vmatprep.subr.bf16.mxu1 %v14904_v42  ;;  %v11041_v46 = vld [vmem:[#allocation9 + $0x18] sm:$0xff]  }
 0x140   : > { %10051 = vmatpush3.bf16.msra.mxu0 %v11035_v40  ;;  %v12131_v60 = vcombine.low %v4972_v8, %v4979_v48  ;;  %v1957_v61 = vcombine.low %v1948_v10, %v1955_v50  ;;  %v12134_v0 = vrot.slane %v922_v52, %v11951_v63  ;;  %v852_v1 = vcombine.high %v11981_v13, %v11981_v13  ;;  %v9135_v52 = vld.sshfl [vmem:[#allocation2 + $0x48] sm:$0x33 pattern:$0x75316420] }
 0x141   : > { %v1964_v12 = vrot.slane %v1956_v53, %v11951_v63  ;;  %v937_v15 = vcombine.high %v12126_v54, %v12126_v54  ;;  %v12142_v16 = vrot.slane %v946_v57, %v11951_v63  ;;  %v961_v17 = vcombine.high %v12129_v58, %v12129_v58  ;;  %10052 = vmatprep.subr.bf16.mxu0 %v14904_v42 }
 0x142   : > { %9983 = vmatmul.mubr.msk.bf16.gmra.mrb[4].mxu0 %vm2683_vm3, %v12131_v60  ;;  %v1971_v13 = vrot.slane %v1957_v61, %v11951_v63  ;;  %v938_v23 = vcombine.high %v12134_v0, %v12134_v0  ;;  %v3101_v31 = vcombine.low %v12118_v47, %v12126_v54  ;;  %v875_v36 = vcombine.high %v12046_v55, %v12046_v55 }
 0x143   : > { %9986 = vmatprep.mubr.msk.bf16.mxu0 %vm11352_vm2, %v14904_v42  ;;  %v3102_v32 = vcombine.low %v12134_v0, %v937_v15  ;;  %v3149_v35 = vcombine.low %v12142_v16, %v961_v17  ;;  %v876_v37 = vcombine.high %v12051_v59, %v12051_v59  ;;  %9747 = vmatpush3.bf16.msra.mxu1 %v11039_v11 }
 0x144   : > { %v12165_v39 = vcombine.low %v1964_v12, %v1971_v13  ;;  %v3103_v40 = vcombine.low %v938_v23, %v12129_v58  ;;  %v12169_v41 = vrot.slane %v3101_v31, %v11951_v63  ;;  %10053 = vmatpush3.bf16.msra.mxu0 %v11037_v3  ;;  %v899_v8 = vcombine.high %v12056_v62, %v12056_v62 }
 0x145   : > { %v12172_v44 = vrot.slane %v3102_v32, %v11951_v63  ;;  %v12175_v45 = vrot.slane %v3149_v35, %v11951_v63  ;;  %v1973_v9 = vcombine.low %v852_v1, %v12046_v55  ;;  %10122 = vmatprep.subr.bf16.mxu0 %v14904_v42  ;;  %v1974_v10 = vcombine.low %v12051_v59, %v875_v36 }
 0x146   : > { %15113 = vst [vmem:[#allocation34_spill] sm:$0xff] %v12165_v39  ;;  %9683 = vmatmul.mubr.msk.bf16.gmra.mrb[8].mxu1 %vm2683_vm3, %v12165_v39  ;;  %v12184_v48 = vrot.slane %v3103_v40, %v11951_v63  ;;  %v1975_v50 = vcombine.low %v876_v37, %v12056_v62  ;;  %v962_v53 = vcombine.high %v12142_v16, %v12142_v16 }
 0x147   : > { %15114 = vst [vmem:[#allocation35_spill] sm:$0xff] %v12172_v44  ;;  %15115 = vst [vmem:[#allocation36_spill] sm:$0xff] %v12175_v45  ;;  %v4981_v55 = vcombine.low %v12169_v41, %v12172_v44  ;;  %9686 = vmatprep.mubr.msk.bf16.mxu1 %vm11352_vm2, %v14904_v42  ;;  %v1976_v57 = vcombine.low %v12064_v2, %v899_v8  ;;  %v1983_v61 = vrot.slane %v1973_v9, %v11951_v63  ;;  %v9161_v44 = vld.sshfl [vmem:[#allocation2 + $0xb0] sm:$0x1 pattern:$0x75316420] }
 0x148   : > { %15116 = vst [vmem:[#allocation37_spill] sm:$0xff] %v12184_v48  ;;  %v970_v1 = vcombine.high %v9134_v43, %v9134_v43  ;;  %v4982_v59 = vcombine.low %v12184_v48, %v12175_v45  ;;  %v1990_v62 = vrot.slane %v1974_v10, %v11951_v63  ;;  %v1997_v3 = vrot.slane %v1975_v50, %v11951_v63  ;;  %v9136_v50 = vld.sshfl [vmem:[#allocation2 + $0x4c] sm:$0x1 pattern:$0x75316420] }
 0x149   : > { %v12201_v11 = vrot.slane %v9134_v43, %v11951_v63  ;;  %9748 = vmatprep.subr.bf16.mxu1 %v14904_v42  ;;  %v4989_v12 = vrot.slane %v4981_v55, %v11951_v63  ;;  %v2004_v15 = vrot.slane %v1976_v57, %v11951_v63  ;;  %v994_v13 = vcombine.high %v9135_v52, %v9135_v52  ;;  %v9158_v45 = vld.sshfl [vmem:[#allocation2 + $0xa4] sm:$0x33 pattern:$0x75316420] }
 0x14a   : > { %v12207_v17 = vrot.slane %v970_v1, %v11951_v63  ;;  %9749 = vmatpush3.bf16.msra.mxu1 %v11041_v46  ;;  %v4996_v23 = vrot.slane %v4982_v59, %v11951_v63  ;;  %v2005_v31 = vcombine.low %v1983_v61, %v1990_v62  ;;  %v12213_v35 = vrot.slane %v9135_v52, %v11951_v63  ;;  %v9137_v61 = vld.sshfl [vmem:[#allocation2 + $0x50] sm:$0x33 pattern:$0x75316420] }
 0x14b   : > { %v985_v32 = vcombine.high %v12201_v11, %v12201_v11  ;;  %9818 = vmatprep.subr.bf16.mxu1 %v14904_v42  ;;  %v2006_v36 = vcombine.low %v1997_v3, %v2004_v15  ;;  %v12219_v40 = vrot.slane %v994_v13, %v11951_v63  ;;  %v3150_v43 = vcombine.low %v962_v53, %v12201_v11 }
 0x14c   : > { %v986_v37 = vcombine.high %v12207_v17, %v12207_v17  ;;  %v12222_v8 = vcombine.low %v4989_v12, %v4996_v23  ;;  %v2013_v9 = vrot.slane %v2005_v31, %v11951_v63  ;;  %v1009_v46 = vcombine.high %v12213_v35, %v12213_v35  ;;  %v9138_v12 = vld.sshfl [vmem:[#allocation2 + $0x54] sm:$0x33 pattern:$0x75316420] }
 0x14d   : > { %v3151_v10 = vcombine.low %v12207_v17, %v985_v32  ;;  %v2020_v52 = vrot.slane %v2006_v36, %v11951_v63  ;;  %v12231_v57 = vrot.slane %v3150_v43, %v11951_v63  ;;  %v900_v53 = vcombine.high %v12064_v2, %v12064_v2 }
 0x14e   : > { %v3152_v55 = vcombine.low %v986_v37, %v12213_v35  ;;  %9987 = vmatmul.mubr.msk.bf16.gmra.mrb[8].mxu0 %vm2683_vm3, %v12222_v8  ;;  %v3198_v59 = vcombine.low %v12219_v40, %v1009_v46  ;;  %v2023_v62 = vcombine.low %v12126_v54, %v12134_v0  ;;  %v9177_v3 = vcombine.high %v12126_v54, %v12134_v0 }
 0x14f   : > { %15117 = vst [vmem:[#allocation38_spill] sm:$0xff] %v12231_v57  ;;  %v12238_v1 = vrot.slane %v3151_v10, %v11951_v63  ;;  %9990 = vmatprep.mubr.msk.bf16.mxu0 %vm11352_vm2, %v14904_v42  ;;  %v12247_v2 = vcombine.low %v2013_v9, %v2020_v52  ;;  %v2022_v13 = vcombine.low %v900_v53, %v12118_v47 }
 0x150   : > { %v12250_v15 = vrot.slane %v3152_v55, %v11951_v63  ;;  %v2025_v23 = vcombine.low %v12129_v58, %v12142_v16  ;;  %v12256_v31 = vrot.slane %v3198_v59, %v11951_v63  ;;  %v12261_v0 = vrot.slane %v2023_v62, %v11951_v63 }
 0x151   : > { %15118 = vst [vmem:[#allocation39_spill] sm:$0xff] %v12238_v1  ;;  %15119 = vst [vmem:[#allocation40_spill] sm:$0xff] %v12247_v2  ;;  %v4998_v54 = vcombine.low %v12231_v57, %v12238_v1  ;;  %v12264_v32 = vrot.slane %v9177_v3, %v11951_v63  ;;  %9687 = vmatmul.mubr.msk.bf16.gmra.mrb[12].mxu1 %vm2683_vm3, %v12247_v2  ;;  %v2032_v47 = vrot.slane %v2022_v13, %v11951_v63  ;;  %v11044_v1 = vld [vmem:[#allocation9 + $0xd8] sm:$0xff]  }
 0x152   : > { %15120 = vst [vmem:[#allocation41_spill] sm:$0xff] %v12250_v15  ;;  %15121 = vst [vmem:[#allocation42_spill] sm:$0xff] %v12256_v31  ;;  %v12270_v36 = vrot.slane %v2025_v23, %v11951_v63  ;;  %v1010_v37 = vcombine.high %v12219_v40, %v12219_v40  ;;  %v12275_v43 = vrot.slane %v9136_v50, %v11951_v63  ;;  %9690 = vmatprep.mubr.msk.bf16.mxu1 %vm11352_vm2, %v14904_v42 }
 0x153   : > { %15122 = vst [vmem:[#allocation43_spill] sm:$0xff] %v12261_v0  ;;  %15123 = vst [vmem:[#allocation44_spill] sm:$0xff] %v12264_v32  ;;  %v4999_v9 = vcombine.low %v12250_v15, %v12256_v31  ;;  %v5006_v46 = vrot.slane %v4998_v54, %v11951_v63  ;;  %v1032_v52 = vcombine.high %v9137_v61, %v9137_v61  ;;  %v12292_v62 = vrot.slane %v5611_v38, 1 }
 0x154   : > { %15124 = vst [vmem:[#allocation45_spill] sm:$0xff] %v12270_v36  ;;  %v2054_v55 = vcombine.low %v2032_v47, %v12261_v0  ;;  %v2055_v53 = vcombine.low %v12264_v32, %v12270_v36  ;;  %v12288_v50 = vrot.slane %v9137_v61, %v11951_v63  ;;  %v1056_v59 = vcombine.high %v9138_v12, %v9138_v12 }
 0x155   : > { %v5013_v3 = vrot.slane %v4999_v9, %v11951_v63  ;;  %v12296_v13 = vrot.slane %v1032_v52, %v11951_v63  ;;  %v12299_v23 = vrot.slane %v9138_v12, %v11951_v63  ;;  %v3199_v10 = vcombine.low %v1010_v37, %v12275_v43 }
 0x156   : > { %v2062_v54 = vrot.slane %v2054_v55, %v11951_v63  ;;  %v2069_v47 = vrot.slane %v2055_v53, %v11951_v63  ;;  %v12304_v61 = vrot.slane %v1056_v59, %v11951_v63  ;;  %v9178_v12 = vcombine.high %v12129_v58, %v12142_v16 }
 0x157   : > { %v12307_v22 = vcombine.low %v5006_v46, %v5013_v3  ;;  %v3200_v38 = vcombine.low %v12288_v50, %v12296_v13  ;;  %v9214_v9 = vcombine.high %v12288_v50, %v12296_v13  ;;  %v12318_v55 = vrot.slane %v3199_v10, %v11951_v63  ;;  %v9139_v46 = vld.sshfl [vmem:[#allocation2 + $0x58] sm:$0x33 pattern:$0x75316420] }
 0x158   : > { %v12315_v52 = vcombine.low %v2062_v54, %v2069_v47  ;;  %v3247_v53 = vcombine.low %v12299_v23, %v12304_v61  ;;  %v2072_v37 = vcombine.low %v12201_v11, %v12207_v17  ;;  %v9179_v16 = vcombine.high %v12201_v11, %v12207_v17  ;;  %v9140_v11 = vld.sshfl [vmem:[#allocation2 + $0x5c] sm:$0x33 pattern:$0x75316420] }
 0x159   : > { %15126 = vst [vmem:[#allocation47_spill] sm:$0xff] %v12318_v55  ;;  %9991 = vmatmul.mubr.msk.bf16.gmra.mrb[12].mxu0 %vm2683_vm3, %v12307_v22  ;;  %v12327_v59 = vrot.slane %v3200_v38, %v11951_v63  ;;  %v12330_v58 = vrot.slane %v9214_v9, %v11951_v63  ;;  %v2074_v10 = vcombine.low %v12213_v35, %v12219_v40  ;;  %v5615_v3 = vshll.u32 %v12131_v60, 16 }
 0x15a   : > { %15125 = vst [vmem:[#allocation46_spill] sm:$0xff] %v12315_v52  ;;  %9994 = vmatprep.mubr.msk.bf16.mxu0 %vm11352_vm2, %v14904_v42  ;;  %9691 = vmatmul.mubr.msk.bf16.gmra.mrb[16].mxu1 %vm2683_vm3, %v12315_v52  ;;  %v12342_v54 = vrot.slane %v3247_v53, %v11951_v63  ;;  %v12345_v47 = vrot.slane %v9178_v12, %v11951_v63  ;;  %v15138_v36 = vmov 0.0  }
 0x15b   : > { %15127 = vst [vmem:[#allocation48_spill] sm:$0xff] %v12327_v59  ;;  %15128 = vst [vmem:[#allocation49_spill] sm:$0xff] %v12330_v58  ;;  %v12348_v38 = vrot.slane %v2072_v37, %v11951_v63  ;;  %v5015_v17 = vcombine.low %v12318_v55, %v12327_v59  ;;  %9694 = vmatprep.mubr.msk.bf16.mxu1 %vm11352_vm2, %v14904_v42  ;;  %v12355_v9 = vrot.slane %v9179_v16, %v11951_v63 }
 0x15c   : > { %15129 = vst [vmem:[#allocation50_spill] sm:$0xff] %v12342_v54  ;;  %15130 = vst [vmem:[#allocation51_spill] sm:$0xff] %v12345_v47  ;;  %v12358_v49 = vrot.slane %v2074_v10, %v11951_v63  ;;  %v1080_v53 = vcombine.high %v9139_v46, %v9139_v46  ;;  %v5016_v12 = vcombine.low %v12330_v58, %v12342_v54  ;;  %v12375_v19 = vrot.slane %v5615_v3, 1 }
 0x15d   : > { %15131 = vst [vmem:[#allocation52_spill] sm:$0xff] %v12348_v38  ;;  %15132 = vst [vmem:[#allocation53_spill] sm:$0xff] %v12355_v9  ;;  %v2103_v37 = vcombine.low %v12345_v47, %v12348_v38  ;;  %v12367_v2 = vrot.slane %v9139_v46, %v11951_v63  ;;  %v5023_v42 = vrot.slane %v5015_v17, %v11951_v63 }
 0x15e   : > { %15133 = vst [vmem:[#allocation54_spill] sm:$0xff] %v12358_v49  ;;  %v2104_v16 = vcombine.low %v12355_v9, %v12358_v49  ;;  %v12373_v10 = vrot.slane %v1080_v53, %v11951_v63  ;;  %v1104_v39 = vcombine.high %v9140_v11, %v9140_v11  ;;  %v5030_v51 = vrot.slane %v5016_v12, %v11951_v63 }
 0x15f   : > { %v2111_v38 = vrot.slane %v2103_v37, %v11951_v63  ;;  %v12380_v52 = vrot.slane %v9140_v11, %v11951_v63  ;;  %v9215_v49 = vcombine.high %v12299_v23, %v12304_v61  ;;  %v1047_v11 = vcombine.high %v12288_v50, %v12288_v50 }
 0x160   : > { %v2118_v46 = vrot.slane %v2104_v16, %v11951_v63  ;;  %v12384_v17 = vrot.slane %v1104_v39, %v11951_v63  ;;  %v3249_v53 = vcombine.low %v12367_v2, %v12373_v10  ;;  %v12390_v3 = vcombine.low %v5023_v42, %v5030_v51  ;;  %v9141_v51 = vld.sshfl [vmem:[#allocation2 + $0x60] sm:$0x1 pattern:$0x75316420] }
 0x161   : > { %v9216_v12 = vcombine.high %v12367_v2, %v12373_v10  ;;  %v1048_v37 = vcombine.high %v12296_v13, %v12296_v13  ;;  %v12401_v39 = vrot.slane %v9215_v49, %v11951_v63  ;;  %v2121_v49 = vcombine.low %v12275_v43, %v12288_v50 }
 0x162   : > { %v12398_v16 = vcombine.low %v2111_v38, %v2118_v46  ;;  %v12404_v9 = vrot.slane %v3249_v53, %v11951_v63  ;;  %v3296_v42 = vcombine.low %v12380_v52, %v12384_v17  ;;  %9995 = vmatmul.mubr.msk.bf16.gmra.mrb[16].mxu0 %vm2683_vm3, %v12390_v3  ;;  %v9180_v38 = vcombine.high %v12213_v35, %v12219_v40  ;;  %v9142_v53 = vld.sshfl [vmem:[#allocation2 + $0x64] sm:$0x33 pattern:$0x75316420] }
 0x163   : > { %15135 = vst [vmem:[#allocation56_spill] sm:$0xff] %v12401_v39  ;;  %v12411_v47 = vrot.slane %v9216_v12, %v11951_v63  ;;  %v2122_v46 = vcombine.low %v12296_v13, %v1047_v11  ;;  %9998 = vmatprep.mubr.msk.bf16.mxu0 %vm11352_vm2, %v15138_v36  ;;  %v2123_v35 = vcombine.low %v1048_v37, %v12299_v23  ;;  %v9143_v40 = vld.sshfl [vmem:[#allocation2 + $0x68] sm:$0x33 pattern:$0x75316420] }
 0x164   : > { %15134 = vst [vmem:[#allocation55_spill] sm:$0xff] %v12398_v16  ;;  %15136 = vst [vmem:[#allocation57_spill] sm:$0xff] %v12404_v9  ;;  %9695 = vmatmul.mubr.msk.bf16.gmra.mrb[20].mxu1 %vm2683_vm3, %v12398_v16  ;;  %v12423_v32 = vrot.slane %v3296_v42, %v11951_v63  ;;  %v5032_v12 = vcombine.low %v12401_v39, %v12404_v9  ;;  %v12432_v50 = vrot.slane %v9180_v38, %v11951_v63 }
 0x165   : > { %15137 = vst [vmem:[#allocation58_spill] sm:$0xff] %v12411_v47  ;;  %9698 = vmatprep.mubr.msk.bf16.mxu1 %vm11352_vm2, %v15138_v36  ;;  %v12435_v13 = vrot.slane %v2121_v49, %v11951_v63  ;;  %v12438_v11 = vrot.slane %v2122_v46, %v11951_v63  ;;  %v12441_v42 = vrot.slane %v9141_v51, %v11951_v63 }
 0x166   : > { %15139 = vst [vmem:[#allocation59_spill] sm:$0xff] %v12423_v32  ;;  %15140 = vst [vmem:[#allocation60_spill] sm:$0xff] %v12432_v50  ;;  %v5033_v37 = vcombine.low %v12411_v47, %v12423_v32  ;;  %v5040_v43 = vrot.slane %v5032_v12, %v11951_v63  ;;  %v12447_v16 = vrot.slane %v2123_v35, %v11951_v63 }
 0x167   : > { %15141 = vst [vmem:[#allocation61_spill] sm:$0xff] %v12435_v13  ;;  %15142 = vst [vmem:[#allocation62_spill] sm:$0xff] %v12438_v11  ;;  %v1142_v0 = vcombine.high %v9142_v53, %v9142_v53  ;;  %v2152_v38 = vcombine.low %v12432_v50, %v12435_v13  ;;  %v12452_v49 = vrot.slane %v9142_v53, %v11951_v63 }
 0x168   : > { %15143 = vst [vmem:[#allocation63_spill] sm:$0xff] %v12447_v16  ;;  %v12455_v46 = vrot.slane %v9143_v40, %v11951_v63  ;;  %v9217_v51 = vcombine.high %v12380_v52, %v12384_v17  ;;  %v5047_v32 = vrot.slane %v5033_v37, %v11951_v63  ;;  %v2153_v12 = vcombine.low %v12438_v11, %v12447_v16 }
 0x169   : > { %v12463_v35 = vrot.slane %v1142_v0, %v11951_v63  ;;  %v1071_v13 = vcombine.high %v12299_v23, %v12299_v23  ;;  %v2160_v53 = vrot.slane %v2152_v38, %v11951_v63  ;;  %v1157_v50 = vcombine.high %v12452_v49, %v12452_v49 }
 0x16a   : > { %v3298_v9 = vcombine.low %v12441_v42, %v12452_v49  ;;  %v12473_v47 = vrot.slane %v9217_v51, %v11951_v63  ;;  %v12475_v37 = vcombine.low %v5040_v43, %v5047_v32  ;;  %v2167_v16 = vrot.slane %v2153_v12, %v11951_v63 }
 0x16b   : > { %v1158_v0 = vcombine.high %v12463_v35, %v12463_v35  ;;  %v1072_v23 = vcombine.high %v12304_v61, %v12304_v61  ;;  %v3299_v38 = vcombine.low %v12463_v35, %v1157_v50  ;;  %v1095_v54 = vcombine.high %v12367_v2, %v12367_v2 }
 0x16c   : > { %15144 = vst [vmem:[#allocation64_spill] sm:$0xff] %v12473_v47  ;;  %v12484_v11 = vrot.slane %v3298_v9, %v11951_v63  ;;  %v1096_v32 = vcombine.high %v12373_v10, %v12373_v10  ;;  %9999 = vmatmul.mubr.msk.bf16.gmra.mrb[20].mxu0 %vm2683_vm3, %v12475_v37  ;;  %v12492_v43 = vcombine.low %v2160_v53, %v2167_v16  ;;  %v9144_v53 = vld.sshfl [vmem:[#allocation2 + $0x6c] sm:$0x33 pattern:$0x75316420]  ;;  %v5647_v55 = vshrl.u32 %v12475_v37, 16 }
 0x16d   : > { %v3345_v51 = vcombine.low %v1158_v0, %v12455_v46  ;;  %v2169_v12 = vcombine.low %v12304_v61, %v1071_v13  ;;  %v2170_v50 = vcombine.low %v1072_v23, %v12367_v2  ;;  %10002 = vmatprep.mubr.msk.bf16.mxu0 %vm11352_vm2, %v15138_v36  ;;  %v12500_v9 = vrot.slane %v3299_v38, %v11951_v63  ;;  %v9145_v0 = vld.sshfl [vmem:[#allocation2 + $0x70] sm:$0x33 pattern:$0x75316420] }
 0x16e   : > { %15145 = vst [vmem:[#allocation65_spill] sm:$0xff] %v12484_v11  ;;  %15146 = vst [vmem:[#allocation66_spill] sm:$0xff] %v12492_v43  ;;  %v5049_v39 = vcombine.low %v12473_v47, %v12484_v11  ;;  %v2171_v59 = vcombine.low %v12373_v10, %v1095_v54  ;;  %v2172_v16 = vcombine.low %v1096_v32, %v12380_v52  ;;  %9699 = vmatmul.mubr.msk.bf16.gmra.mrb[24].mxu1 %vm2683_vm3, %v12492_v43 }
 0x16f   : > { %15147 = vst [vmem:[#allocation67_spill] sm:$0xff] %v12500_v9  ;;  %v12509_v61 = vrot.slane %v3345_v51, %v11951_v63  ;;  %v12512_v2 = vrot.slane %v2169_v12, %v11951_v63  ;;  %v12515_v13 = vrot.slane %v2170_v50, %v11951_v63  ;;  %v1166_v23 = vcombine.high %v9143_v40, %v9143_v40 }
 0x170   : > { %v5057_v38 = vrot.slane %v5049_v39, %v11951_v63  ;;  %9702 = vmatprep.mubr.msk.bf16.mxu1 %vm11352_vm2, %v15138_v36  ;;  %v12521_v54 = vrot.slane %v2171_v59, %v11951_v63  ;;  %v12524_v10 = vrot.slane %v2172_v16, %v11951_v63  ;;  %v1181_v32 = vcombine.high %v12455_v46, %v12455_v46 }
 0x171   : > { %15148 = vst [vmem:[#allocation68_spill] sm:$0xff] %v12509_v61  ;;  %15149 = vst [vmem:[#allocation69_spill] sm:$0xff] %v12512_v2  ;;  %v5050_v51 = vcombine.low %v12500_v9, %v12509_v61  ;;  %v2201_v40 = vcombine.low %v12512_v2, %v12515_v13  ;;  %v12533_v39 = vrot.slane %v1166_v23, %v11951_v63 }
 0x172   : > { %15150 = vst [vmem:[#allocation70_spill] sm:$0xff] %v12515_v13  ;;  %15151 = vst [vmem:[#allocation71_spill] sm:$0xff] %v12521_v54  ;;  %v1190_v12 = vcombine.high %v9144_v53, %v9144_v53  ;;  %v2202_v59 = vcombine.low %v12521_v54, %v12524_v10  ;;  %v12538_v50 = vrot.slane %v9144_v53, %v11951_v63 }
 0x173   : > { %15152 = vst [vmem:[#allocation72_spill] sm:$0xff] %v12524_v10  ;;  %v12541_v16 = vrot.slane %v9145_v0, %v11951_v63  ;;  %v1119_v43 = vcombine.high %v12380_v52, %v12380_v52  ;;  %v5064_v61 = vrot.slane %v5050_v51, %v11951_v63  ;;  %v2209_v13 = vrot.slane %v2201_v40, %v11951_v63 }
 0x174   : > { %v1182_v23 = vcombine.high %v12533_v39, %v12533_v39  ;;  %v12550_v2 = vrot.slane %v1190_v12, %v11951_v63  ;;  %v2216_v10 = vrot.slane %v2202_v59, %v11951_v63  ;;  %v1205_v53 = vcombine.high %v12538_v50, %v12538_v50 }
 0x175   : > { %v3346_v54 = vcombine.low %v12533_v39, %v1181_v32  ;;  %v1120_v52 = vcombine.high %v12384_v17, %v12384_v17  ;;  %v12558_v11 = vcombine.low %v5057_v38, %v5064_v61  ;;  %v2218_v12 = vcombine.low %v12384_v17, %v1119_v43 }
 0x176   : > { %v1206_v51 = vcombine.high %v12550_v2, %v12550_v2  ;;  %v3347_v40 = vcombine.low %v1182_v23, %v12538_v50  ;;  %v12564_v9 = vcombine.low %v2209_v13, %v2216_v10  ;;  %v3348_v59 = vcombine.low %v12550_v2, %v1205_v53  ;;  %v9146_v13 = vld.sshfl [vmem:[#allocation2 + $0x74] sm:$0x1 pattern:$0x75316420] }
 0x177   : > { %v12568_v47 = vrot.slane %v3346_v54, %v11951_v63  ;;  %v2219_v32 = vcombine.low %v1120_v52, %v12441_v42  ;;  %10003 = vmatmul.mubr.msk.bf16.gmra.mrb[24].mxu0 %vm2683_vm3, %v12558_v11  ;;  %v2220_v17 = vcombine.low %v12452_v49, %v12463_v35  ;;  %v9181_v43 = vcombine.high %v12452_v49, %v12463_v35  ;;  %v9147_v23 = vld.sshfl [vmem:[#allocation2 + $0x78] sm:$0x33 pattern:$0x75316420] }
 0x178   : > { %15153 = vst [vmem:[#allocation73_spill] sm:$0xff] %v12564_v9  ;;  %v12574_v61 = vrot.slane %v3347_v40, %v11951_v63  ;;  %v3394_v38 = vcombine.low %v1206_v51, %v12541_v16  ;;  %10006 = vmatprep.mubr.msk.bf16.mxu0 %vm11352_vm2, %v15138_v36  ;;  %9703 = vmatmul.mubr.msk.bf16.gmra.mrb[28].mxu1 %vm2683_vm3, %v12564_v9  ;;  %v5622_v53 = vshll.u32 %v12222_v8, 16 }
 0x179   : > { %15154 = vst [vmem:[#allocation74_spill] sm:$0xff] %v12568_v47  ;;  %v12586_v42 = vrot.slane %v3348_v59, %v11951_v63  ;;  %v12589_v54 = vrot.slane %v2218_v12, %v11951_v63  ;;  %v12592_v10 = vrot.slane %v2219_v32, %v11951_v63  ;;  %9706 = vmatprep.mubr.msk.bf16.mxu1 %vm11352_vm2, %v15138_v36 }
 0x17a   : > { %15155 = vst [vmem:[#allocation75_spill] sm:$0xff] %v12574_v61  ;;  %v12596_v49 = vrot.slane %v3394_v38, %v11951_v63  ;;  %v5066_v35 = vcombine.low %v12568_v47, %v12574_v61  ;;  %v12603_v52 = vrot.slane %v2220_v17, %v11951_v63  ;;  %v12606_v51 = vrot.slane %v9181_v43, %v11951_v63 }
 0x17b   : > { %15156 = vst [vmem:[#allocation76_spill] sm:$0xff] %v12586_v42  ;;  %15157 = vst [vmem:[#allocation77_spill] sm:$0xff] %v12589_v54  ;;  %v2250_v40 = vcombine.low %v12589_v54, %v12592_v10  ;;  %v1214_v12 = vcombine.high %v9145_v0, %v9145_v0  ;;  %v1229_v59 = vcombine.high %v12541_v16, %v12541_v16 }
 0x17c   : > { %15158 = vst [vmem:[#allocation78_spill] sm:$0xff] %v12592_v10  ;;  %15159 = vst [vmem:[#allocation79_spill] sm:$0xff] %v12596_v49  ;;  %v1244_v32 = vrot.slane %v9146_v13, %v11951_v63  ;;  %v5067_v38 = vcombine.low %v12586_v42, %v12596_v49  ;;  %v5074_v9 = vrot.slane %v5066_v35, %v11951_v63 }
 0x17d   : > { %15160 = vst [vmem:[#allocation80_spill] sm:$0xff] %v12603_v52  ;;  %15161 = vst [vmem:[#allocation81_spill] sm:$0xff] %v12606_v51  ;;  %v2251_v17 = vcombine.low %v12603_v52, %v12606_v51  ;;  %v1252_v43 = vcombine.high %v9147_v23, %v9147_v23  ;;  %v2258_v61 = vrot.slane %v2250_v40, %v11951_v63 }
 0x17e   : > { %v1228_v10 = vrot.slane %v1214_v12, %v11951_v63  ;;  %v1259_v0 = vrot.slane %v9147_v23, %v11951_v63  ;;  %v2267_v54 = vcombine.low %v12455_v46, %v12533_v39  ;;  %v5081_v13 = vrot.slane %v5067_v38, %v11951_v63 }
 0x17f   : > { %v2265_v47 = vrot.slane %v2251_v17, %v11951_v63  ;;  %v12626_v49 = vrot.slane %v1252_v43, %v11951_v63  ;;  %v9182_v35 = vcombine.high %v12455_v46, %v12533_v39  ;;  %v2269_v40 = vcombine.low %v12538_v50, %v12550_v2 }
 0x180   : > { %v1230_v51 = vcombine.high %v1228_v10, %v1228_v10  ;;  %v3395_v52 = vcombine.low %v1228_v10, %v1229_v59  ;;  %v9183_v23 = vcombine.high %v12538_v50, %v12550_v2  ;;  %v12634_v12 = vcombine.low %v5074_v9, %v5081_v13 }
 0x181   : > { %v12636_v42 = vcombine.low %v2258_v61, %v2265_v47  ;;  %v3397_v38 = vcombine.low %v1259_v0, %v12626_v49  ;;  %v9218_v17 = vcombine.high %v1259_v0, %v12626_v49  ;;  %v12644_v46 = vrot.slane %v2267_v54, %v11951_v63 }
 0x182   : > { %v3396_v43 = vcombine.low %v1230_v51, %v1244_v32  ;;  %v12641_v58 = vrot.slane %v3395_v52, %v11951_v63  ;;  %v12647_v39 = vrot.slane %v9182_v35, %v11951_v63  ;;  %10007 = vmatmul.mubr.msk.bf16.gmra.mrb[28].mxu0 %vm2683_vm3, %v12634_v12  ;;  %v12660_v2 = vrot.slane %v2269_v40, %v11951_v63 }
 0x183   : > { %15162 = vst [vmem:[#allocation82_spill] sm:$0xff] %v12636_v42  ;;  %15164 = vst [vmem:[#allocation84_spill] sm:$0xff] %v12644_v46  ;;  %9707 = vmatmul.mubr.msk.bf16.gmra.mrb[32].mxu1 %vm2683_vm3, %v12636_v42  ;;  %v12654_v47 = vrot.slane %v3397_v38, %v11951_v63  ;;  %v12657_v9 = vrot.slane %v9218_v17, %v11951_v63  ;;  %v5624_v50 = vrot.slane %v5622_v53, 1  ;;  %10010 = vmatprep.mubr.msk.bf16.mxu0 %vm11352_vm2, %v15138_v36 }
 0x184   : > { %15163 = vst [vmem:[#allocation83_spill] sm:$0xff] %v12641_v58  ;;  %15165 = vst [vmem:[#allocation85_spill] sm:$0xff] %v12647_v39  ;;  %v12665_v61 = vrot.slane %v3396_v43, %v11951_v63  ;;  %9710 = vmatprep.mubr.msk.bf16.mxu1 %vm11352_vm2, %v15138_v36  ;;  %v12670_v54 = vrot.slane %v9183_v23, %v11951_v63  ;;  %v2299_v52 = vcombine.low %v12644_v46, %v12647_v39 }
 0x185   : > { %15166 = vst [vmem:[#allocation86_spill] sm:$0xff] %v12654_v47  ;;  %15167 = vst [vmem:[#allocation87_spill] sm:$0xff] %v12657_v9  ;;  %v5626_v51 = vshrl.u32 %v12222_v8, 16  ;;  %v5084_v53 = vcombine.low %v12654_v47, %v12657_v9  ;;  %v15171_v59 = vshrl.u32 %v12048_v56, 16  ;;  %v1267_v35 = vcombine.high %v1259_v0, %v1259_v0 }
 0x186   : > { %15168 = vst [vmem:[#allocation88_spill] sm:$0xff] %v12660_v2  ;;  %15169 = vst [vmem:[#allocation89_spill] sm:$0xff] %v12665_v61  ;;  %v2316_v40 = vcombine.low %v12541_v16, %v1228_v10  ;;  %v5083_v38 = vcombine.low %v12641_v58, %v12665_v61  ;;  %v2300_v23 = vcombine.low %v12660_v2, %v12670_v54 }
 0x187   : > { %15170 = vst [vmem:[#allocation90_spill] sm:$0xff] %v12670_v54  ;;  %v5614_v13 = vor.u32 %v12292_v62, %v15171_v59  ;;  %v2307_v17 = vrot.slane %v2299_v52, %v11951_v63  ;;  %v9184_v8 = vcombine.high %v12541_v16, %v1228_v10  ;;  %v5098_v43 = vrot.slane %v5084_v53, %v11951_v63  ;;  %v9148_v59 = vld.sshfl [vmem:[#allocation2 + $0x7c] sm:$0x33 pattern:$0x75316420] }
 0x188   : > { %v2318_v39 = vcombine.low %v1244_v32, %v1259_v0  ;;  %v2319_v62 = vcombine.low %v12626_v49, %v1267_v35  ;;  %v5091_v46 = vrot.slane %v5083_v38, %v11951_v63  ;;  %v2314_v42 = vrot.slane %v2300_v23, %v11951_v63  ;;  %v9149_v16 = vld.sshfl [vmem:[#allocation2 + $0x80] sm:$0x33 pattern:$0x75316420] }
 0x189   : > { %v5618_v56 = vsel %vm3751_vm4, %v5614_v13, %v12375_v19  ;;  %v12694_v9 = vrot.slane %v2316_v40, %v11951_v63  ;;  %v12697_v52 = vrot.slane %v9184_v8, %v11951_v63  ;;  %v15176_v32 = vshrl.u32 %v12131_v60, 16 }
 0x18a   : > { %v12700_v10 = vrot.slane %v2318_v39, %v11951_v63  ;;  %v12703_v53 = vrot.slane %v2319_v62, %v11951_v63  ;;  %v1268_v13 = vcombine.high %v12626_v49, %v12626_v49  ;;  %v12710_v35 = vcombine.low %v5091_v46, %v5098_v43 }
 0x18b   : > { %15172 = vst [vmem:[#allocation91_spill] sm:$0xff] %v12694_v9  ;;  %15173 = vst [vmem:[#allocation92_spill] sm:$0xff] %v12697_v52  ;;  %v5621_v0 = vor.u32 %v15176_v32, %v12375_v19  ;;  %v12712_v40 = vcombine.low %v2307_v17, %v2314_v42  ;;  %v2348_v38 = vcombine.low %v12694_v9, %v12697_v52  ;;  %v5629_v17 = vshll.u32 %v12307_v22, 16 }
 0x18c   : > { %15174 = vst [vmem:[#allocation93_spill] sm:$0xff] %v12700_v10  ;;  %15175 = vst [vmem:[#allocation94_spill] sm:$0xff] %v12703_v53  ;;  %v1276_v23 = vcombine.high %v9148_v59, %v9148_v59  ;;  %v2349_v39 = vcombine.low %v12700_v10, %v12703_v53  ;;  %v12722_v60 = vrot.slane %v9148_v59, %v11951_v63  ;;  %10011 = vmatmul.mubr.msk.bf16.gmra.mrb[32].mxu0 %vm2683_vm3, %v12710_v35  ;;  %v9150_v32 = vld.sshfl [vmem:[#allocation2 + $0x84] sm:$0x33 pattern:$0x75316420] }
 0x18d   : > { %15177 = vst [vmem:[#allocation95_spill] sm:$0xff] %v12712_v40  ;;  %v12719_v8 = vsel %vm3751_vm4, %v5621_v0, %v5624_v50  ;;  %v1300_v19 = vcombine.high %v9149_v16, %v9149_v16  ;;  %9711 = vmatmul.mubr.msk.bf16.gmra.mrb[36].mxu1 %vm2683_vm3, %v12712_v40  ;;  %v2356_v42 = vrot.slane %v2348_v38, %v11951_v63  ;;  %v9151_v52 = vld.sshfl [vmem:[#allocation2 + $0x88] sm:$0x1 pattern:$0x75316420]  ;;  %v5631_v54 = vrot.slane %v5629_v17, 1 }
 0x18e   : > { %v12730_v49 = vrot.slane %v1276_v23, %v11951_v63  ;;  %v12733_v46 = vrot.slane %v9149_v16, %v11951_v63  ;;  %10054 = vmatprep.mubr.msk.bf16.mxu0 %vm11352_vm2, %v15138_v36  ;;  %9714 = vmatprep.mubr.msk.bf16.mxu1 %vm11352_vm2, %v15138_v36  ;;  %v2363_v43 = vrot.slane %v2349_v39, %v11951_v63  ;;  %v5633_v16 = vshrl.u32 %v12307_v22, 16 }
 0x18f   : > { %v1291_v62 = vcombine.high %v12722_v60, %v12722_v60  ;;  %v12744_v59 = vrot.slane %v1300_v19, %v11951_v63  ;;  %v2365_v23 = vcombine.low %v1268_v13, %v12722_v60  ;;  %v5628_v53 = vor.u32 %v5626_v51, %v5624_v50  ;;  %v9152_v19 = vld.sshfl [vmem:[#allocation2 + $0x8c] sm:$0x33 pattern:$0x75316420]  ;;  %v11038_v13 = vld [vmem:[#allocation9 + $0xc0] sm:$0xff]  }
 0x190   : > { %v1292_v0 = vcombine.high %v12730_v49, %v12730_v49  ;;  %v1315_v38 = vcombine.high %v12733_v46, %v12733_v46  ;;  %v12752_v39 = vcombine.low %v2356_v42, %v2363_v43  ;;  %v1324_v61 = vcombine.high %v9150_v32, %v9150_v32 }
 0x191   : > { %v2366_v10 = vcombine.low %v12730_v49, %v1291_v62  ;;  %v1316_v9 = vcombine.high %v12744_v59, %v12744_v59  ;;  %v12760_v40 = vrot.slane %v2365_v23, %v11951_v63  ;;  %v12766_v51 = vsel %vm3751_vm4, %v5628_v53, %v5631_v54 }
 0x192   : > { %15178 = vst [vmem:[#allocation96_spill] sm:$0xff] %v12752_v39  ;;  %v2367_v22 = vcombine.low %v1292_v0, %v12733_v46  ;;  %v2368_v2 = vcombine.low %v12744_v59, %v1315_v38  ;;  %15181 = vst [vmem:[#allocation99_spill] sm:$0xff] %v12766_v51  ;;  %v12769_v42 = vrot.slane %v9150_v32, %v11951_v63 }
 0x193   : > { %15179 = vst [vmem:[#allocation97_spill] sm:$0xff] %v12760_v40  ;;  %v12763_v50 = vrot.slane %v2366_v10, %v11951_v63  ;;  %v12772_v17 = vrot.slane %v9151_v52, %v11951_v63  ;;  %v12781_v0 = vrot.slane %v1324_v61, %v11951_v63  ;;  %v1362_v10 = vcombine.high %v9152_v19, %v9152_v19 }
 0x194   : > { %v12775_v43 = vrot.slane %v2367_v22, %v11951_v63  ;;  %v12778_v62 = vrot.slane %v2368_v2, %v11951_v63  ;;  %v1339_v32 = vcombine.high %v12769_v42, %v12769_v42  ;;  %v12788_v38 = vrot.slane %v9152_v19, %v11951_v63  ;;  %10055 = vmatmul.mubr.msk.bf16.vlgmr.msra.gmra.mrb[0].mxu0 %vm2683_vm3, %v5618_v56  ;;  %v9153_v19 = vld.sshfl [vmem:[#allocation2 + $0x90] sm:$0x33 pattern:$0x75316420] }
 0x195   : > { %15180 = vst [vmem:[#allocation98_spill] sm:$0xff] %v12763_v50  ;;  %v2397_v53 = vcombine.low %v12760_v40, %v12763_v50  ;;  %v2414_v52 = vcombine.low %v1316_v9, %v12769_v42  ;;  %9715 = vmatmul.mubr.msk.bf16.gmra.mrb[40].mxu1 %vm2683_vm3, %v12752_v39  ;;  %v1340_v61 = vcombine.high %v12781_v0, %v12781_v0  ;;  %v5636_v22 = vshll.u32 %v12390_v3, 16  ;;  %v9154_v40 = vld.sshfl [vmem:[#allocation2 + $0x94] sm:$0x33 pattern:$0x75316420] }
 0x196   : > { %15182 = vst [vmem:[#allocation100_spill] sm:$0xff] %v12775_v43  ;;  %15183 = vst [vmem:[#allocation101_spill] sm:$0xff] %v12778_v62  ;;  %v2398_v2 = vcombine.low %v12775_v43, %v12778_v62  ;;  %v12799_v23 = vrot.slane %v1362_v10, %v11951_v63  ;;  %10123 = vmatpush3.bf16.msra.mxu0 %v11038_v13  ;;  %10058 = vmatprep.mubr.msk.bf16.mxu0 %vm11352_vm2, %v15138_v36  ;;  %v11040_v62 = vld [vmem:[#allocation9 + $0xc8] sm:$0xff]   ;;  %v5640_v39 = vshrl.u32 %v12390_v3, 16 }
 0x197   : > { %v2405_v9 = vrot.slane %v2397_v53, %v11951_v63  ;;  %v2415_v56 = vcombine.low %v12781_v0, %v1339_v32  ;;  %v12807_v50 = vrot.slane %v2414_v52, %v11951_v63  ;;  %9718 = vmatprep.mubr.msk.bf16.mxu1 %vm11352_vm2, %v15138_v36  ;;  %v2416_v43 = vcombine.low %v1340_v61, %v12772_v17 }
 0x198   : > { %v2412_v10 = vrot.slane %v2398_v2, %v11951_v63  ;;  %v2417_v13 = vcombine.low %v12788_v38, %v12799_v23  ;;  %v5635_v32 = vor.u32 %v5633_v16, %v5631_v54  ;;  %v5638_v52 = vrot.slane %v5636_v22, 1  ;;  %10124 = vmatprep.subr.bf16.mxu0 %v15138_v36 }
 0x199   : > { %15184 = vst [vmem:[#allocation102_spill] sm:$0xff] %v12807_v50  ;;  %v12817_v53 = vrot.slane %v2415_v56, %v11951_v63  ;;  %v1386_v47 = vcombine.high %v9153_v19, %v9153_v19  ;;  %v12823_v2 = vrot.slane %v2416_v43, %v11951_v63  ;;  %v12829_v31 = vrot.slane %v9153_v19, %v11951_v63 }
 0x19a   : > { %v12820_v58 = vcombine.low %v2405_v9, %v2412_v10  ;;  %v12826_v61 = vrot.slane %v2417_v13, %v11951_v63  ;;  %v12834_v54 = vsel %vm3751_vm4, %v5635_v32, %v5638_v52  ;;  %v1410_v22 = vcombine.high %v9154_v40, %v9154_v40  ;;  %10125 = vmatpush3.bf16.msra.mxu0 %v11040_v62  ;;  %v9155_v9 = vld.sshfl [vmem:[#allocation2 + $0x98] sm:$0x33 pattern:$0x75316420]  ;;  %v11042_v13 = vld [vmem:[#allocation9 + $0xd0] sm:$0xff]  }
 0x19b   : > { %15185 = vst [vmem:[#allocation103_spill] sm:$0xff] %v12817_v53  ;;  %15187 = vst [vmem:[#allocation105_spill] sm:$0xff] %v12823_v2  ;;  %v2446_v3 = vcombine.low %v12807_v50, %v12817_v53  ;;  %v12837_v16 = vrot.slane %v1386_v47, %v11951_v63  ;;  %v12842_v56 = vrot.slane %v9154_v40, %v11951_v63  ;;  %10126 = vmatprep.subr.bf16.mxu0 %v15138_v36  ;;  %v9156_v40 = vld.sshfl [vmem:[#allocation2 + $0x9c] sm:$0x1 pattern:$0x75316420] }
 0x19c   : > { %15186 = vst [vmem:[#allocation104_spill] sm:$0xff] %v12820_v58  ;;  %15188 = vst [vmem:[#allocation106_spill] sm:$0xff] %v12826_v61  ;;  %v2447_v43 = vcombine.low %v12823_v2, %v12826_v61  ;;  %v9185_v19 = vcombine.high %v12788_v38, %v12799_v23  ;;  %v5642_v10 = vor.u32 %v5640_v39, %v5638_v52  ;;  %10059 = vmatmul.mubr.msk.bf16.gmra.mrb[4].mxu0 %vm2683_vm3, %v12719_v8 }
 0x19d   : > { %15189 = vst [vmem:[#allocation107_spill] sm:$0xff] %v12834_v54  ;;  %v2454_v32 = vrot.slane %v2446_v3, %v11951_v63  ;;  %v12849_v47 = vrot.slane %v1410_v22, %v11951_v63  ;;  %v2464_v62 = vcombine.low %v12829_v31, %v12837_v16  ;;  %v9186_v61 = vcombine.high %v12829_v31, %v12837_v16  ;;  %v9157_v22 = vld.sshfl [vmem:[#allocation2 + $0xa0] sm:$0x33 pattern:$0x75316420] }
 0x19e   : > { %9719 = vmatmul.mubr.msk.bf16.gmra.mrb[44].mxu1 %vm2683_vm3, %v12820_v58  ;;  %v2461_v39 = vrot.slane %v2447_v43, %v11951_v63  ;;  %v12861_v52 = vrot.slane %v9185_v19, %v11951_v63  ;;  %v5643_v3 = vshll.u32 %v12475_v37, 16  ;;  %v1434_v53 = vcombine.high %v9155_v9, %v9155_v9  ;;  %10062 = vmatprep.mubr.msk.bf16.mxu0 %vm11352_vm2, %v15138_v36 }
 0x19f   : > { %9722 = vmatprep.mubr.msk.bf16.mxu1 %vm11352_vm2, %v15138_v36  ;;  %v2466_v8 = vcombine.low %v12842_v56, %v12849_v47  ;;  %v12871_v2 = vrot.slane %v2464_v62, %v11951_v63  ;;  %v12874_v43 = vrot.slane %v9186_v61, %v11951_v63  ;;  %v12877_v50 = vrot.slane %v9155_v9, %v11951_v63 }
 0x1a0   : > { %15190 = vst [vmem:[#allocation108_spill] sm:$0xff] %v12861_v52  ;;  %v5645_v19 = vrot.slane %v5643_v3, 1  ;;  %v12880_v58 = vrot.slane %v1434_v53, %v11951_v63  ;;  %10127 = vmatpush3.bf16.msra.mxu0 %v11042_v13  ;;  %v12889_v61 = vrot.slane %v9156_v40, %v11951_v63  ;;  %v12892_v3 = vrot.slane %v9157_v22, %v11951_v63 }
 0x1a1   : > { %15191 = vst [vmem:[#allocation109_spill] sm:$0xff] %v12871_v2  ;;  %15192 = vst [vmem:[#allocation110_spill] sm:$0xff] %v12874_v43  ;;  %v12884_v15 = vrot.slane %v2466_v8, %v11951_v63  ;;  %v2495_v62 = vcombine.low %v12861_v52, %v12871_v2  ;;  %10128 = vmatprep.subr.bf16.mxu0 %v15138_v36  ;;  %v12895_v53 = vcombine.low %v2454_v32, %v2461_v39 }
 0x1a2   : > { %15193 = vst [vmem:[#allocation111_spill] sm:$0xff] %v12877_v50  ;;  %15195 = vst [vmem:[#allocation113_spill] sm:$0xff] %v12889_v61  ;;  %v12898_v37 = vsel %vm3751_vm4, %v5642_v10, %v5645_v19  ;;  %v9187_v9 = vcombine.high %v12842_v56, %v12849_v47  ;;  %v2513_v13 = vcombine.low %v12877_v50, %v12880_v58 }
 0x1a3   : > { %15194 = vst [vmem:[#allocation112_spill] sm:$0xff] %v12884_v15  ;;  %15196 = vst [vmem:[#allocation114_spill] sm:$0xff] %v12892_v3  ;;  %v2496_v40 = vcombine.low %v12874_v43, %v12884_v15  ;;  %v9188_v8 = vcombine.high %v12877_v50, %v12880_v58  ;;  %v2515_v2 = vcombine.low %v12889_v61, %v12892_v3  ;;  %v5650_v50 = vshll.u32 %v12558_v11, 16 }
 0x1a4   : > { %15197 = vst [vmem:[#allocation115_spill] sm:$0xff] %v12895_v53  ;;  %15198 = vst [vmem:[#allocation116_spill] sm:$0xff] %v12898_v37  ;;  %v2503_v32 = vrot.slane %v2495_v62, %v11951_v63  ;;  %v12912_v10 = vrot.slane %v9187_v9, %v11951_v63  ;;  %v12915_v39 = vrot.slane %v2513_v13, %v11951_v63  ;;  %10129 = vmatpush3.bf16.msra.mxu0 %v11044_v1 }
 0x1a5   : > { %v5649_v52 = vor.u32 %v5647_v55, %v5645_v19  ;;  %v2510_v57 = vrot.slane %v2496_v40, %v11951_v63  ;;  %v12919_v15 = vrot.slane %v9188_v8, %v11951_v63  ;;  %v12922_v43 = vrot.slane %v2515_v2, %v11951_v63  ;;  %10198 = vmatprep.subr.bf16.mxu0 %v15138_v36  ;;  %v9159_v55 = vld.sshfl [vmem:[#allocation2 + $0xa8] sm:$0x33 pattern:$0x75316420] }
 0x1a6   : > { %15199 = vst [vmem:[#allocation117_spill] sm:$0xff] %v12912_v10  ;;  %15200 = vst [vmem:[#allocation118_spill] sm:$0xff] %v12915_v39  ;;  %10063 = vmatmul.mubr.msk.bf16.gmra.mrb[8].mxu0 %vm2683_vm3, %v12766_v51  ;;  %9723 = vmatmul.mubr.msk.bf16.gmra.mrb[48].mxu1 %vm2683_vm3, %v12895_v53  ;;  %v2544_v1 = vcombine.low %v12912_v10, %v12915_v39  ;;  %v1472_v19 = vcombine.high %v9157_v22, %v9157_v22  ;;  %v5652_v9 = vrot.slane %v5650_v50, 1 }
 0x1a7   : > { %15201 = vst [vmem:[#allocation119_spill] sm:$0xff] %v12919_v15  ;;  %15202 = vst [vmem:[#allocation120_spill] sm:$0xff] %v12922_v43  ;;  %v1487_v62 = vcombine.high %v12892_v3, %v12892_v3  ;;  %10066 = vmatprep.mubr.msk.bf16.mxu0 %vm11352_vm2, %v15138_v36  ;;  %9726 = vmatprep.mubr.msk.bf16.mxu1 %vm11352_vm2, %v15138_v36  ;;  %v2545_v2 = vcombine.low %v12919_v15, %v12922_v43  ;;  %v5654_v40 = vshrl.u32 %v12558_v11, 16 }
 0x1a8   : > { %v1496_v13 = vcombine.high %v9158_v45, %v9158_v45  ;;  %v12943_v22 = vcombine.low %v2503_v32, %v2510_v57  ;;  %v12946_v39 = vrot.slane %v1472_v19, %v11951_v63  ;;  %v12949_v10 = vrot.slane %v9158_v45, %v11951_v63  ;;  %v9160_v8 = vld.sshfl [vmem:[#allocation2 + $0xac] sm:$0x33 pattern:$0x75316420] }
 0x1a9   : > { %v2552_v53 = vrot.slane %v2544_v1, %v11951_v63  ;;  %v2559_v51 = vrot.slane %v2545_v2, %v11951_v63  ;;  %v12957_v11 = vrot.slane %v9159_v55, %v11951_v63  ;;  %v5657_v45 = vshll.u32 %v12634_v12, 16 }
 0x1aa   : > { %15203 = vst [vmem:[#allocation121_spill] sm:$0xff] %v12943_v22  ;;  %15204 = vst [vmem:[#allocation122_spill] sm:$0xff] %v12946_v39  ;;  %v12954_v50 = vrot.slane %v1496_v13, %v11951_v63  ;;  %v1488_v57 = vcombine.high %v12946_v39, %v12946_v39  ;;  %v1511_v32 = vcombine.high %v12949_v10, %v12949_v10 }
 0x1ab   : > { %v2561_v19 = vcombine.low %v12946_v39, %v1487_v62  ;;  %v12966_v1 = vsel %vm3751_vm4, %v5649_v52, %v5652_v9  ;;  %v5656_v13 = vor.u32 %v5654_v40, %v5652_v9  ;;  %v1520_v43 = vcombine.high %v9159_v55, %v9159_v55 }
 0x1ac   : > { %v1512_v2 = vcombine.high %v12954_v50, %v12954_v50  ;;  %v2562_v15 = vcombine.low %v1488_v57, %v12949_v10  ;;  %v2563_v3 = vcombine.low %v12954_v50, %v1511_v32  ;;  %v1535_v62 = vcombine.high %v12957_v11, %v12957_v11 }
 0x1ad   : > { %v12973_v61 = vrot.slane %v2561_v19, %v11951_v63  ;;  %v12979_v52 = vrot.slane %v1520_v43, %v11951_v63  ;;  %v1544_v48 = vcombine.high %v9160_v8, %v9160_v8  ;;  %v12982_v9 = vrot.slane %v9160_v8, %v11951_v63 }
 0x1ae   : > { %v2564_v39 = vcombine.low %v1512_v2, %v12957_v11  ;;  %10067 = vmatmul.mubr.msk.bf16.gmra.mrb[12].mxu0 %vm2683_vm3, %v12834_v54  ;;  %9727 = vmatmul.mubr.msk.bf16.gmra.mrb[52].mxu1 %vm2683_vm3, %v12943_v22  ;;  %v12988_v55 = vcombine.low %v2552_v53, %v2559_v51  ;;  %v12991_v40 = vrot.slane %v2562_v15, %v11951_v63  ;;  %v5659_v43 = vrot.slane %v5657_v45, 1  ;;  %v9121_v22 = vld.sshfl [vmem:[#allocation2 + $0x10] sm:$0x1 pattern:$0x75316420] }
 0x1af   : > { %15205 = vst [vmem:[#allocation123_spill] sm:$0xff] %v12973_v61  ;;  %15206 = vst [vmem:[#allocation124_spill] sm:$0xff] %v12982_v9  ;;  %v12994_v57 = vrot.slane %v2563_v3, %v11951_v63  ;;  %10070 = vmatprep.mubr.msk.bf16.mxu0 %vm11352_vm2, %v15138_v36  ;;  %9730 = vmatprep.mubr.msk.bf16.mxu1 %vm11352_vm2, %v15138_v36  ;;  %v1536_v51 = vcombine.high %v12979_v52, %v12979_v52  ;;  %v5661_v2 = vshrl.u32 %v12634_v12, 16 }
 0x1b0   : > { %15207 = vst [vmem:[#allocation125_spill] sm:$0xff] %v12988_v55  ;;  %15208 = vst [vmem:[#allocation126_spill] sm:$0xff] %v12991_v40  ;;  %v13001_v8 = vrot.slane %v2564_v39, %v11951_v63  ;;  %v13006_v53 = vrot.slane %v1544_v48, %v11951_v63  ;;  %v2593_v15 = vcombine.low %v12973_v61, %v12991_v40 }
 0x1b1   : > { %15209 = vst [vmem:[#allocation127_spill] sm:$0xff] %v12994_v57  ;;  %v1559_v3 = vcombine.high %v12982_v9, %v12982_v9  ;;  %v13013_v32 = vrot.slane %v9161_v44, %v11951_v63  ;;  %v2610_v19 = vcombine.low %v12979_v52, %v1535_v62  ;;  %v2611_v48 = vcombine.low %v1536_v51, %v12982_v9 }
 0x1b2   : > { %15210 = vst [vmem:[#allocation128_spill] sm:$0xff] %v13001_v8  ;;  %15211 = vst [vmem:[#allocation129_spill] sm:$0xff] %v13006_v53  ;;  %v2594_v39 = vcombine.low %v12994_v57, %v13001_v8  ;;  %v1560_v45 = vcombine.high %v13006_v53, %v13006_v53  ;;  %v13023_v40 = vsel %vm3751_vm4, %v5656_v13, %v5659_v43  ;;  %v5664_v62 = vshll.u32 %v12710_v35, 16 }
 0x1b3   : > { %15212 = vst [vmem:[#allocation130_spill] sm:$0xff] %v13013_v32  ;;  %v2612_v61 = vcombine.low %v13006_v53, %v1559_v3  ;;  %v13027_v44 = vrot.slane %v2610_v19, %v11951_v63  ;;  %v2601_v8 = vrot.slane %v2593_v15, %v11951_v63  ;;  %v13034_v51 = vrot.slane %v2611_v48, %v11951_v63 }
 0x1b4   : > { %v2608_v57 = vrot.slane %v2594_v39, %v11951_v63  ;;  %v2613_v54 = vcombine.low %v1560_v45, %v13013_v32  ;;  %v694_v13 = vrot.slane %v9121_v22, %v11951_v63  ;;  %v717_v3 = vcombine.high %v11955_v4, %v11955_v4 }
 0x1b5   : > { %15213 = vst [vmem:[#allocation131_spill] sm:$0xff] %v13027_v44  ;;  %15214 = vst [vmem:[#allocation132_spill] sm:$0xff] %v13034_v51  ;;  %v13037_v12 = vrot.slane %v2612_v61, %v11951_v63  ;;  %v718_v19 = vcombine.high %v11958_v5, %v11958_v5  ;;  %v2642_v39 = vcombine.low %v13027_v44, %v13034_v51  ;;  %v13069_v51 = vrot.slane %v5664_v62, 1 }
 0x1b6   : > { %v13045_v15 = vrot.slane %v2613_v54, %v11951_v63  ;;  %v5663_v45 = vor.u32 %v5661_v2, %v5659_v43  ;;  %v741_v48 = vcombine.high %v11961_v6, %v11961_v6  ;;  %10071 = vmatmul.mubr.msk.bf16.gmra.mrb[16].mxu0 %vm2683_vm3, %v12898_v37  ;;  %9731 = vmatmul.mubr.msk.bf16.gmra.mrb[56].mxu1 %vm2683_vm3, %v12988_v55 }
 0x1b7   : > { %15215 = vst [vmem:[#allocation133_spill] sm:$0xff] %v13037_v12  ;;  %v742_v61 = vcombine.high %v11964_v7, %v11964_v7  ;;  %v765_v54 = vcombine.high %v11984_v14, %v11984_v14  ;;  %v766_v22 = vcombine.high %v12015_v30, %v12015_v30  ;;  %10074 = vmatprep.mubr.msk.bf16.mxu0 %vm11352_vm2, %v15138_v36 }
 0x1b8   : > { %15216 = vst [vmem:[#allocation134_spill] sm:$0xff] %v13045_v15  ;;  %9734 = vmatprep.mubr.msk.bf16.mxu1 %vm11352_vm2, %v15138_v36  ;;  %v13065_v43 = vcombine.low %v2601_v8, %v2608_v57  ;;  %v2643_v2 = vcombine.low %v13037_v12, %v13045_v15  ;;  %v789_v44 = vcombine.high %v12020_v33, %v12020_v33 }
 0x1b9   : > { %v2904_v55 = vcombine.low %v694_v13, %v11955_v4  ;;  %v2905_v37 = vcombine.low %v11958_v5, %v717_v3  ;;  %v2906_v32 = vcombine.low %v718_v19, %v11961_v6  ;;  %v2907_v9 = vcombine.low %v11964_v7, %v741_v48 }
 0x1ba   : > { %15217 = vst [vmem:[#allocation135_spill] sm:$0xff] %v13065_v43  ;;  %v2650_v53 = vrot.slane %v2642_v39, %v11951_v63  ;;  %v2953_v57 = vcombine.low %v742_v61, %v11984_v14  ;;  %v2954_v8 = vcombine.low %v12015_v30, %v765_v54  ;;  %v2955_v62 = vcombine.low %v766_v22, %v12020_v33 }
 0x1bb   : > { %v2914_v15 = vrot.slane %v2904_v55, %v11951_v63  ;;  %v2921_v12 = vrot.slane %v2905_v37, %v11951_v63  ;;  %v2928_v4 = vrot.slane %v2906_v32, %v11951_v63  ;;  %v2935_v5 = vrot.slane %v2907_v9, %v11951_v63 }
 0x1bc   : > { %v2657_v6 = vrot.slane %v2643_v2, %v11951_v63  ;;  %v2956_v7 = vcombine.low %v12023_v34, %v789_v44  ;;  %v2963_v13 = vrot.slane %v2953_v57, %v11951_v63  ;;  %v2970_v14 = vrot.slane %v2954_v8, %v11951_v63 }
 0x1bd   : > { %v2936_v3 = vcombine.low %v2914_v15, %v2921_v12  ;;  %v2937_v30 = vcombine.low %v2928_v4, %v2935_v5  ;;  %v2977_v33 = vrot.slane %v2955_v62, %v11951_v63  ;;  %v3444_v55 = vcombine.low %v12722_v60, %v12730_v49 }
 0x1be   : > { %v2984_v37 = vrot.slane %v2956_v7, %v11951_v63  ;;  %v2985_v32 = vcombine.low %v2963_v13, %v2970_v14  ;;  %v9219_v9 = vcombine.high %v12722_v60, %v12730_v49  ;;  %v3446_v44 = vcombine.low %v12733_v46, %v12744_v59  ;;  %10075 = vmatmul.mubr.msk.bf16.gmra.mrb[20].mxu0 %vm2683_vm3, %v12966_v1 }
 0x1bf   : > { %9735 = vmatmul.mubr.msk.bf16.gmra.mrb[60].mxu1 %vm2683_vm3, %v13065_v43  ;;  %v2944_v12 = vrot.slane %v2936_v3, %v11951_v63  ;;  %v2951_v19 = vrot.slane %v2937_v30, %v11951_v63  ;;  %v13104_v15 = vrot.slane %v3444_v55, %v11951_v63  ;;  %10078 = vmatprep.mubr.msk.bf16.mxu0 %vm11352_vm2, %v15138_v36 }
 0x1c0   : > { %9738 = vmatprep.mubr.msk.bf16.mxu1 %vm11352_vm2, %v15138_v36  ;;  %v2986_v60 = vcombine.low %v2977_v33, %v2984_v37  ;;  %v2993_v49 = vrot.slane %v2985_v32, %v11951_v63  ;;  %v13112_v39 = vrot.slane %v9219_v9, %v11951_v63  ;;  %v13116_v48 = vsel %vm3751_vm4, %v5663_v45, %v13069_v51 }
 0x1c1   : > { %v2952_v61 = vcombine.low %v2944_v12, %v2951_v19  ;;  %v13119_v54 = vrot.slane %v3446_v44, %v11951_v63  ;;  %v9220_v22 = vcombine.high %v12733_v46, %v12744_v59  ;;  %v790_v8 = vcombine.high %v12023_v34, %v12023_v34 }
 0x1c2   : > { %v3000_v2 = vrot.slane %v2986_v60, %v11951_v63  ;;  %v5100_v57 = vcombine.low %v13104_v15, %v13112_v39  ;;  %v3035_v62 = vcombine.low %v12006_v26, %v12009_v28  ;;  %v13130_v45 = vcombine.low %v2650_v53, %v2657_v6 }
 0x1c3   : > { %v3753_v4 = vshrl.u32 %v2952_v61, 16  ;;  %v3755_v5 = vshll.u32 %v2952_v61, 16  ;;  %v13133_v7 = vrot.slane %v9220_v22, %v11951_v63  ;;  %v3002_v59 = vcombine.low %v790_v8, %v12078_v18  ;;  %v11043_v8 = vld [vmem:[#allocation9 + $0x40] sm:$0xff]  }
 0x1c4   : > { %15218 = vst [vmem:[#allocation136_spill] sm:$0xff] %v13130_v45  ;;  %v3001_v13 = vcombine.low %v2993_v49, %v3000_v2  ;;  %v5108_v46 = vrot.slane %v5100_v57, %v11951_v63  ;;  %v1377_v14 = vcombine.high %v12788_v38, %v12788_v38  ;;  %v3493_v26 = vcombine.low %v12769_v42, %v12781_v0 }
 0x1c5   : > { %v3757_v3 = vrot.slane %v3755_v5, 1  ;;  %v5101_v34 = vcombine.low %v13119_v54, %v13133_v7  ;;  %v9221_v28 = vcombine.high %v12769_v42, %v12781_v0  ;;  %v3012_v6 = vrot.slane %v3002_v59, %v11951_v63 }
 0x1c6   : > { %v3760_v53 = vshll.u32 %v3001_v13, 16  ;;  %v3049_v30 = vrot.slane %v3035_v62, %v11951_v63  ;;  %v15219_v18 = vcombine.low %v12772_v17, %v12788_v38  ;;  %10079 = vmatmul.mubr.msk.bf16.gmra.mrb[24].mxu0 %vm2683_vm3, %v13023_v40  ;;  %v13159_v0 = vrot.slane %v3493_v26, %v11951_v63 }
 0x1c7   : > { %9739 = vmatmul.mubr.msk.bf16.gmra.mrb[64].mxu1 %vm2683_vm3, %v13130_v45  ;;  %v3758_v55 = vor.u32 %v3757_v3, %v3753_v4  ;;  %v5115_v42 = vrot.slane %v5101_v34, %v11951_v63  ;;  %10082 = vmatprep.mubr.msk.bf16.mxu0 %vm11352_vm2, %v15138_v36  ;;  %v3034_v38 = vcombine.low %v3012_v6, %v12003_v25  ;;  %v5668_v44 = vshrl.u32 %v12710_v35, 16  ;;  %v15255_v45 = vld [vmem:[#allocation65_spill] sm:$0xff] }
 0x1c8   : > { %v13151_v33 = vrot.slane %v15219_v18, %v11951_v63  ;;  %9750 = vmatprep.mubr.msk.bf16.mxu1 %vm11352_vm2, %v15138_v36  ;;  %v3762_v17 = vrot.slane %v3760_v53, 1  ;;  %v13167_v37 = vrot.slane %v9221_v28, %v11951_v63  ;;  %v3541_v32 = vcombine.low %v12799_v23, %v1377_v14 }
 0x1c9   : > { %v13170_v9 = vcombine.low %v5108_v46, %v5115_v42  ;;  %v3083_v12 = vcombine.low %v12012_v29, %v12084_v20  ;;  %v3084_v19 = vcombine.low %v12087_v21, %v12093_v24  ;;  %v3042_v60 = vrot.slane %v3034_v38, %v11951_v63 }
 0x1ca   : > { %v3764_v49 = vshrl.u32 %v3001_v13, 16  ;;  %v13179_v25 = vrot.slane %v3541_v32, %v11951_v63  ;;  %v1378_v61 = vcombine.high %v12799_v23, %v12799_v23  ;;  %v3763_v22 = vsel %vm3751_vm4, %v3758_v55, %v3762_v17  ;;  %v11045_v55 = vld [vmem:[#allocation9 + $0x48] sm:$0xff]  }
 0x1cb   : > { %15220 = vst [vmem:[#allocation137_spill] sm:$0xff] %v13170_v9  ;;  %v5671_v2 = vshll.u32 %v13170_v9, 16  ;;  %v5117_v35 = vcombine.low %v13159_v0, %v13167_v37  ;;  %v3091_v29 = vrot.slane %v3083_v12, %v11951_v63  ;;  %v3050_v20 = vcombine.low %v3042_v60, %v3049_v30  ;;  %v15222_v12 = vld [vmem:[#allocation37_spill] sm:$0xff] }
 0x1cc   : > { %v5118_v21 = vcombine.low %v13151_v33, %v13179_v25  ;;  %v3098_v24 = vrot.slane %v3084_v19, %v11951_v63  ;;  %v1401_v57 = vcombine.high %v12829_v31, %v12829_v31  ;;  %v1402_v62 = vcombine.high %v12837_v16, %v12837_v16  ;;  %v15223_v19 = vld [vmem:[#allocation35_spill] sm:$0xff] }
 0x1cd   : > { %v5125_v23 = vrot.slane %v5117_v35, %v11951_v63  ;;  %v1425_v4 = vcombine.high %v12842_v56, %v12842_v56  ;;  %v1450_v5 = vcombine.high %v12880_v58, %v12880_v58  ;;  %v3768_v13 = vshll.u32 %v3050_v20, 16 }
 0x1ce   : > { %v5132_v46 = vrot.slane %v5118_v21, %v11951_v63  ;;  %v13201_v59 = vcombine.low %v3091_v29, %v3098_v24  ;;  %10083 = vmatmul.mubr.msk.bf16.gmra.mrb[28].mxu0 %vm2683_vm3, %v13116_v48  ;;  %v5670_v14 = vor.u32 %v5668_v44, %v13069_v51  ;;  %v3766_v3 = vor.u32 %v3764_v49, %v3762_v17 }
 0x1cf   : > { %9751 = vmatmul.mubr.msk.bf16.vlgmr.msra.gmra.mrb[0].mxu1 %vm2683_vm3, %v3763_v22  ;;  %v3542_v34 = vcombine.low %v1378_v61, %v12829_v31  ;;  %10086 = vmatprep.mubr.msk.bf16.mxu0 %vm11352_vm2, %v15138_v36  ;;  %v5673_v26 = vrot.slane %v5671_v2, 1  ;;  %v3770_v28 = vrot.slane %v3768_v13, 1  ;;  %v3543_v6 = vcombine.low %v12837_v16, %v1401_v57  ;;  %v15224_v61 = vld [vmem:[#allocation113_spill] sm:$0xff] }
 0x1d0   : > { %9754 = vmatprep.mubr.msk.bf16.mxu1 %vm11352_vm2, %v15138_v36  ;;  %v13212_v53 = vcombine.low %v5125_v23, %v5132_v46  ;;  %9819 = vmatpush3.bf16.msra.mxu1 %v11043_v8  ;;  %v3544_v30 = vcombine.low %v1402_v62, %v12842_v56  ;;  %v3590_v31 = vcombine.low %v12849_v47, %v1425_v4  ;;  %v5675_v42 = vshrl.u32 %v13170_v9, 16  ;;  %v15225_v8 = vld [vmem:[#allocation111_spill] sm:$0xff] }
 0x1d1   : > { %v13217_v51 = vrot.slane %v3542_v34, %v11951_v63  ;;  %v3132_v18 = vcombine.low %v12096_v27, %v12169_v41  ;;  %v3772_v17 = vshrl.u32 %v3050_v20, 16  ;;  %v3776_v38 = vshll.u32 %v13201_v59, 16  ;;  %9820 = vmatprep.subr.bf16.mxu1 %v15138_v36  ;;  %v11047_v20 = vld [vmem:[#allocation9 + $0x50] sm:$0xff]  }
 0x1d2   : > { %15221 = vst [vmem:[#allocation138_spill] sm:$0xff] %v13212_v53  ;;  %v5678_v16 = vshll.u32 %v13212_v53, 16  ;;  %v13227_v56 = vrot.slane %v3543_v6, %v11951_v63  ;;  %v13230_v32 = vrot.slane %v3544_v30, %v11951_v63  ;;  %v13233_v44 = vrot.slane %v3590_v31, %v11951_v63  ;;  %v15228_v6 = vld [vmem:[#allocation114_spill] sm:$0xff] }
 0x1d3   : > { %v13236_v27 = vsel %vm3751_vm4, %v5670_v14, %v5673_v26  ;;  %v3771_v41 = vsel %vm3751_vm4, %v3766_v3, %v3770_v28  ;;  %v3133_v60 = vcombine.low %v15223_v19, %v15222_v12  ;;  %v3140_v49 = vrot.slane %v3132_v18, %v11951_v63  ;;  %v15229_v31 = vld [vmem:[#allocation38_spill] sm:$0xff]  ;;  %v15230_v18 = vld [vmem:[#allocation36_spill] sm:$0xff] }
 0x1d4   : > { %v3593_v22 = vcombine.low %v1450_v5, %v15224_v61  ;;  %v5134_v2 = vcombine.low %v13217_v51, %v13227_v56  ;;  %v5135_v35 = vcombine.low %v13230_v32, %v13233_v44  ;;  %v1426_v29 = vcombine.high %v12849_v47, %v12849_v47  ;;  %9821 = vmatpush3.bf16.msra.mxu1 %v11045_v55 }
 0x1d5   : > { %v5677_v21 = vor.u32 %v5675_v42, %v5673_v26  ;;  %v3774_v24 = vor.u32 %v3772_v17, %v3770_v28  ;;  %v3147_v57 = vrot.slane %v3133_v60, %v11951_v63  ;;  %v1449_v23 = vcombine.high %v15225_v8, %v15225_v8  ;;  %9822 = vmatprep.subr.bf16.mxu1 %v15138_v36  ;;  %v15227_v28 = vld [vmem:[#allocation122_spill] sm:$0xff] }
 0x1d6   : > { %10087 = vmatmul.mubr.msk.bf16.gmra.mrb[32].mxu0 %vm2683_vm3, %v13236_v27  ;;  %v5680_v62 = vrot.slane %v5678_v16, 1  ;;  %v3778_v4 = vrot.slane %v3776_v38, 1  ;;  %v5142_v47 = vrot.slane %v5134_v2, %v11951_v63  ;;  %v5149_v5 = vrot.slane %v5135_v35, %v11951_v63  ;;  %v11049_v42 = vld [vmem:[#allocation9 + $0x58] sm:$0xff]   ;;  %v15232_v16 = vld [vmem:[#allocation39_spill] sm:$0xff] }
 0x1d7   : > { %9755 = vmatmul.mubr.msk.bf16.gmra.mrb[4].mxu1 %vm2683_vm3, %v3771_v41  ;;  %10090 = vmatprep.mubr.msk.bf16.mxu0 %vm11352_vm2, %v15138_v36  ;;  %v3148_v13 = vcombine.low %v3140_v49, %v3147_v57  ;;  %v3780_v46 = vshrl.u32 %v13201_v59, 16  ;;  %v3591_v14 = vcombine.low %v1426_v29, %v15225_v8  ;;  %v3592_v3 = vcombine.low %v12880_v58, %v1449_v23  ;;  %v15231_v58 = vld [vmem:[#allocation41_spill] sm:$0xff] }
 0x1d8   : > { %9758 = vmatprep.mubr.msk.bf16.mxu1 %vm11352_vm2, %v15138_v36  ;;  %v13265_v34 = vcombine.low %v5142_v47, %v5149_v5  ;;  %v13268_v26 = vrot.slane %v3593_v22, %v11951_v63  ;;  %v3639_v30 = vcombine.low %v15228_v6, %v15227_v28  ;;  %v3181_v55 = vcombine.low %v15230_v18, %v15229_v31  ;;  %v15235_v31 = vld [vmem:[#allocation42_spill] sm:$0xff] }
 0x1d9   : > { %9823 = vmatpush3.bf16.msra.mxu1 %v11047_v20  ;;  %v3784_v17 = vshll.u32 %v3148_v13, 16  ;;  %v13275_v59 = vrot.slane %v3591_v14, %v11951_v63  ;;  %v13278_v38 = vrot.slane %v3592_v3, %v11951_v63  ;;  %v3182_v41 = vcombine.low %v15232_v16, %v15231_v58 }
 0x1da   : > { %15226 = vst [vmem:[#allocation37_spill] sm:$0xff] %v13265_v34  ;;  %9824 = vmatprep.subr.bf16.mxu1 %v15138_v36  ;;  %v3779_v12 = vsel %vm3751_vm4, %v3774_v24, %v3778_v4  ;;  %v5682_v19 = vshrl.u32 %v13212_v53, 16  ;;  %v13286_v60 = vrot.slane %v3639_v30, %v11951_v63  ;;  %v3189_v49 = vrot.slane %v3181_v55, %v11951_v63  ;;  %v15234_v30 = vld [vmem:[#allocation47_spill] sm:$0xff]  ;;  %v15236_v55 = vld [vmem:[#allocation49_spill] sm:$0xff] }
 0x1db   : > { %v13290_v61 = vsel %vm3751_vm4, %v5677_v21, %v5680_v62  ;;  %v5685_v22 = vshll.u32 %v13265_v34, 16  ;;  %v5151_v2 = vcombine.low %v13275_v59, %v13278_v38  ;;  %v3196_v35 = vrot.slane %v3182_v41, %v11951_v63  ;;  %v9162_v41 = vld.sshfl [vmem:[#allocation2 + $0xb4] sm:$0x33 pattern:$0x75316420] }
 0x1dc   : > { %v5152_v29 = vcombine.low %v13268_v26, %v13286_v60  ;;  %v9222_v20 = vcombine.high %v15228_v6, %v15227_v28  ;;  %v3641_v24 = vcombine.low %v12949_v10, %v12954_v50  ;;  %v3782_v57 = vor.u32 %v3780_v46, %v3778_v4 }
 0x1dd   : > { %9825 = vmatpush3.bf16.msra.mxu1 %v11049_v42  ;;  %v3786_v21 = vrot.slane %v3784_v17, 1  ;;  %v5159_v8 = vrot.slane %v5151_v2, %v11951_v63  ;;  %v3788_v23 = vshrl.u32 %v3148_v13, 16  ;;  %v5684_v47 = vor.u32 %v5682_v19, %v5680_v62  ;;  %v15237_v42 = vld [vmem:[#allocation48_spill] sm:$0xff] }
 0x1de   : > { %9894 = vmatprep.subr.bf16.mxu1 %v15138_v36  ;;  %10091 = vmatmul.mubr.msk.bf16.gmra.mrb[36].mxu0 %vm2683_vm3, %v13290_v61  ;;  %v5166_v5 = vrot.slane %v5152_v29, %v11951_v63  ;;  %v5689_v14 = vshrl.u32 %v13265_v34, 16  ;;  %v3197_v3 = vcombine.low %v3189_v49, %v3196_v35  ;;  %v5687_v4 = vrot.slane %v5685_v22, 1  ;;  %v15253_v34 = vld [vmem:[#allocation59_spill] sm:$0xff] }
 0x1df   : > { %9759 = vmatmul.mubr.msk.bf16.gmra.mrb[8].mxu1 %vm2683_vm3, %v3779_v12  ;;  %10094 = vmatprep.mubr.msk.bf16.mxu0 %vm11352_vm2, %v15138_v36  ;;  %v9223_v13 = vcombine.high %v12949_v10, %v12954_v50  ;;  %v13316_v46 = vrot.slane %v9222_v20, %v11951_v63  ;;  %v13319_v62 = vrot.slane %v3641_v24, %v11951_v63 }
 0x1e0   : > { %9762 = vmatprep.mubr.msk.bf16.mxu1 %vm11352_vm2, %v15138_v36  ;;  %v13321_v28 = vcombine.low %v5159_v8, %v5166_v5  ;;  %v3688_v6 = vcombine.low %v12957_v11, %v12979_v52  ;;  %v3230_v18 = vcombine.low %v15235_v31, %v15234_v30  ;;  %v3231_v17 = vcombine.low %v15237_v42, %v15236_v55  ;;  %v15239_v5 = vld [vmem:[#allocation129_spill] sm:$0xff] }
 0x1e1   : > { %v3787_v58 = vsel %vm3751_vm4, %v3782_v57, %v3786_v21  ;;  %v3790_v10 = vor.u32 %v3788_v23, %v3786_v21  ;;  %v13331_v50 = vrot.slane %v9223_v13, %v11951_v63  ;;  %v5168_v16 = vcombine.low %v13316_v46, %v13319_v62  ;;  %v15240_v13 = vld [vmem:[#allocation124_spill] sm:$0xff] }
 0x1e2   : > { %15233 = vst [vmem:[#allocation35_spill] sm:$0xff] %v13321_v28  ;;  %v5692_v12 = vshll.u32 %v13321_v28, 16  ;;  %v3792_v19 = vshll.u32 %v3197_v3, 16  ;;  %v13337_v49 = vrot.slane %v3688_v6, %v11951_v63  ;;  %v3238_v22 = vrot.slane %v3230_v18, %v11951_v63 }
 0x1e3   : > { %v13341_v2 = vsel %vm3751_vm4, %v5684_v47, %v5687_v4  ;;  %v5691_v35 = vor.u32 %v5689_v14, %v5687_v4  ;;  %v3245_v29 = vrot.slane %v3231_v17, %v11951_v63  ;;  %v3796_v20 = vshrl.u32 %v3197_v3, 16  ;;  %v15241_v4 = vld [vmem:[#allocation56_spill] sm:$0xff]  ;;  %v15242_v3 = vld [vmem:[#allocation50_spill] sm:$0xff] }
 0x1e4   : > { %v5169_v24 = vcombine.low %v13331_v50, %v13337_v49  ;;  %v5176_v57 = vrot.slane %v5168_v16, %v11951_v63  ;;  %v13348_v21 = vrot.slane %v9162_v41, %v11951_v63  ;;  %v9224_v8 = vcombine.high %v12957_v11, %v12979_v52  ;;  %v15244_v16 = vld [vmem:[#allocation130_spill] sm:$0xff] }
 0x1e5   : > { %v3246_v23 = vcombine.low %v3238_v22, %v3245_v29  ;;  %v3690_v47 = vcombine.low %v15240_v13, %v15239_v5  ;;  %v9225_v14 = vcombine.high %v15240_v13, %v15239_v5  ;;  %v3279_v6 = vcombine.low %v15242_v3, %v15241_v4  ;;  %v15246_v22 = vld [vmem:[#allocation57_spill] sm:$0xff] }
 0x1e6   : > { %15238 = vst [vmem:[#allocation113_spill] sm:$0xff] %v13348_v21  ;;  %10095 = vmatmul.mubr.msk.bf16.gmra.mrb[40].mxu0 %vm2683_vm3, %v13341_v2  ;;  %v5694_v30 = vrot.slane %v5692_v12, 1  ;;  %v3794_v31 = vrot.slane %v3792_v19, 1  ;;  %v5183_v18 = vrot.slane %v5169_v24, %v11951_v63  ;;  %v5696_v11 = vshrl.u32 %v13321_v28, 16  ;;  %v15245_v19 = vld [vmem:[#allocation58_spill] sm:$0xff] }
 0x1e7   : > { %9763 = vmatmul.mubr.msk.bf16.gmra.mrb[12].mxu1 %vm2683_vm3, %v3787_v58  ;;  %10098 = vmatprep.mubr.msk.bf16.mxu0 %vm11352_vm2, %v15138_v36  ;;  %v3800_v52 = vshll.u32 %v3246_v23, 16  ;;  %v13368_v55 = vrot.slane %v9224_v8, %v11951_v63  ;;  %v13371_v42 = vrot.slane %v3690_v47, %v11951_v63  ;;  %v13374_v17 = vrot.slane %v9225_v14, %v11951_v63 }
 0x1e8   : > { %9766 = vmatprep.mubr.msk.bf16.mxu1 %vm11352_vm2, %v15138_v36  ;;  %v13376_v58 = vcombine.low %v5176_v57, %v5183_v18  ;;  %v5185_v12 = vcombine.low %v15244_v16, %v13348_v21  ;;  %v3280_v29 = vcombine.low %v15246_v22, %v15245_v19  ;;  %v3287_v24 = vrot.slane %v3279_v6, %v11951_v63  ;;  %v9163_v18 = vld.sshfl [vmem:[#allocation2 + $0xb8] sm:$0x33 pattern:$0x75316420] }
 0x1e9   : > { %v3798_v5 = vor.u32 %v3796_v20, %v3794_v31  ;;  %v3802_v13 = vrot.slane %v3800_v52, 1  ;;  %v5193_v8 = vcombine.low %v13368_v55, %v13371_v42  ;;  %v1582_v47 = vcombine.high %v9162_v41, %v9162_v41  ;;  %v9164_v20 = vld.sshfl [vmem:[#allocation2 + $0xbc] sm:$0x33 pattern:$0x75316420] }
 0x1ea   : > { %15243 = vst [vmem:[#allocation111_spill] sm:$0xff] %v13376_v58  ;;  %v3795_v4 = vsel %vm3751_vm4, %v3790_v10, %v3794_v31  ;;  %v5699_v14 = vshll.u32 %v13376_v58, 16  ;;  %v5192_v57 = vrot.slane %v5185_v12, %v11951_v63  ;;  %v3294_v3 = vrot.slane %v3280_v29, %v11951_v63 }
 0x1eb   : > { %v13390_v28 = vsel %vm3751_vm4, %v5691_v35, %v5694_v30  ;;  %v5698_v19 = vor.u32 %v5696_v11, %v5694_v30  ;;  %v3804_v6 = vshrl.u32 %v3246_v23, 16  ;;  %v13393_v52 = vrot.slane %v1582_v47, %v11951_v63 }
 0x1ec   : > { %v5194_v41 = vcombine.low %v13374_v17, %v5192_v57  ;;  %v5201_v10 = vrot.slane %v5193_v8, %v11951_v63  ;;  %v13397_v31 = vcombine.low %v3287_v24, %v3294_v3  ;;  %v1597_v12 = vcombine.high %v13348_v21, %v13348_v21  ;;  %v15254_v21 = vld [vmem:[#allocation67_spill] sm:$0xff] }
 0x1ed   : > { %15247 = vst [vmem:[#allocation122_spill] sm:$0xff] %v13393_v52  ;;  %v3803_v22 = vsel %vm3751_vm4, %v3798_v5, %v3802_v13  ;;  %v1598_v35 = vcombine.high %v13393_v52, %v13393_v52  ;;  %v1606_v30 = vcombine.high %v9163_v18, %v9163_v18  ;;  %v13405_v23 = vrot.slane %v9163_v18, %v11951_v63 }
 0x1ee   : > { %10099 = vmatmul.mubr.msk.bf16.gmra.mrb[44].mxu0 %vm2683_vm3, %v13390_v28  ;;  %v5701_v11 = vrot.slane %v5699_v14, 1  ;;  %v5208_v29 = vrot.slane %v5194_v41, %v11951_v63  ;;  %v3808_v24 = vshll.u32 %v13397_v31, 16  ;;  %v13413_v8 = vrot.slane %v9164_v20, %v11951_v63  ;;  %v15252_v41 = vld [vmem:[#allocation64_spill] sm:$0xff] }
 0x1ef   : > { %15248 = vst [vmem:[#allocation114_spill] sm:$0xff] %v13405_v23  ;;  %9767 = vmatmul.mubr.msk.bf16.gmra.mrb[16].mxu1 %vm2683_vm3, %v3795_v4  ;;  %10102 = vmatprep.mubr.msk.bf16.mxu0 %vm11352_vm2, %v15138_v36  ;;  %v5703_v5 = vshrl.u32 %v13376_v58, 16  ;;  %v13421_v47 = vrot.slane %v1606_v30, %v11951_v63  ;;  %v1621_v4 = vcombine.high %v13405_v23, %v13405_v23 }
 0x1f0   : > { %15249 = vst [vmem:[#allocation38_spill] sm:$0xff] %v13413_v8  ;;  %9770 = vmatprep.mubr.msk.bf16.mxu1 %vm11352_vm2, %v15138_v36  ;;  %v5210_v14 = vcombine.low %v13393_v52, %v1597_v12  ;;  %v13426_v57 = vcombine.low %v5201_v10, %v5208_v29  ;;  %v3806_v3 = vor.u32 %v3804_v6, %v3802_v13  ;;  %v3810_v6 = vrot.slane %v3808_v24, 1 }
 0x1f1   : > { %15250 = vst [vmem:[#allocation36_spill] sm:$0xff] %v13421_v47  ;;  %v5211_v18 = vcombine.low %v1598_v35, %v13405_v23  ;;  %v3328_v53 = vcombine.low %v15253_v34, %v15252_v41  ;;  %v1622_v9 = vcombine.high %v13421_v47, %v13421_v47  ;;  %v5212_v58 = vcombine.low %v13421_v47, %v1621_v4  ;;  %v9165_v35 = vld.sshfl [vmem:[#allocation2 + $0xc0] sm:$0x33 pattern:$0x75316420] }
 0x1f2   : > { %15251 = vst [vmem:[#allocation41_spill] sm:$0xff] %v13426_v57  ;;  %v5220_v30 = vrot.slane %v5210_v14, %v11951_v63  ;;  %v3329_v43 = vcombine.low %v15255_v45, %v15254_v21  ;;  %v13438_v12 = vsel %vm3751_vm4, %v5698_v19, %v5701_v11  ;;  %v5706_v13 = vshll.u32 %v13426_v57, 16  ;;  %v9166_v47 = vld.sshfl [vmem:[#allocation2 + $0xc4] sm:$0x1 pattern:$0x75316420] }
 0x1f3   : > { %15256 = vst [vmem:[#allocation39_spill] sm:$0xff] %v13438_v12  ;;  %v5227_v10 = vrot.slane %v5211_v18, %v11951_v63  ;;  %v5213_v34 = vcombine.low %v1622_v9, %v13413_v8  ;;  %v5234_v29 = vrot.slane %v5212_v58, %v11951_v63  ;;  %v3336_v4 = vrot.slane %v3328_v53, %v11951_v63 }
 0x1f4   : > { %v3343_v14 = vrot.slane %v3329_v43, %v11951_v63  ;;  %v5705_v41 = vor.u32 %v5703_v5, %v5701_v11  ;;  %v1630_v45 = vcombine.high %v9164_v20, %v9164_v20  ;;  %v3812_v24 = vshrl.u32 %v13397_v31, 16 }
 0x1f5   : > { %v5242_v23 = vcombine.low %v5220_v30, %v5227_v10  ;;  %v5241_v21 = vrot.slane %v5213_v34, %v11951_v63  ;;  %v1654_v18 = vcombine.high %v9165_v35, %v9165_v35  ;;  %v5708_v9 = vrot.slane %v5706_v13, 1  ;;  %v15258_v30 = vld [vmem:[#allocation68_spill] sm:$0xff]  ;;  %v15260_v34 = vld [vmem:[#allocation75_spill] sm:$0xff] }
 0x1f6   : > { %v13447_v19 = vcombine.low %v3336_v4, %v3343_v14  ;;  %10103 = vmatmul.mubr.msk.bf16.gmra.mrb[48].mxu0 %vm2683_vm3, %v13438_v12  ;;  %v3811_v53 = vsel %vm3751_vm4, %v3806_v3, %v3810_v6  ;;  %v1645_v58 = vcombine.high %v13413_v8, %v13413_v8  ;;  %v13463_v11 = vrot.slane %v1630_v45, %v11951_v63  ;;  %v15257_v3 = vld [vmem:[#allocation74_spill] sm:$0xff]  ;;  %v15259_v10 = vld [vmem:[#allocation76_spill] sm:$0xff] }
 0x1f7   : > { %9771 = vmatmul.mubr.msk.bf16.gmra.mrb[20].mxu1 %vm2683_vm3, %v3803_v22  ;;  %v5250_v43 = vrot.slane %v5242_v23, %v11951_v63  ;;  %10106 = vmatprep.mubr.msk.bf16.mxu0 %vm11352_vm2, %v15138_v36  ;;  %v5243_v20 = vcombine.low %v5234_v29, %v5241_v21  ;;  %v13466_v22 = vrot.slane %v9165_v35, %v11951_v63  ;;  %v5710_v14 = vshrl.u32 %v13426_v57, 16 }
 0x1f8   : > { %9774 = vmatprep.mubr.msk.bf16.mxu1 %vm11352_vm2, %v15138_v36  ;;  %v3816_v31 = vshll.u32 %v13447_v19, 16  ;;  %v13469_v23 = vrot.slane %v1654_v18, %v11951_v63  ;;  %v13472_v5 = vrot.slane %v9166_v47, %v11951_v63  ;;  %v3377_v13 = vcombine.low %v15258_v30, %v15257_v3 }
 0x1f9   : > { %v3378_v29 = vcombine.low %v15260_v34, %v15259_v10  ;;  %v5257_v4 = vrot.slane %v5243_v20, %v11951_v63  ;;  %v1646_v35 = vcombine.high %v13463_v11, %v13463_v11  ;;  %v1669_v45 = vcombine.high %v13466_v22, %v13466_v22 }
 0x1fa   : > { %v1670_v47 = vcombine.high %v13469_v23, %v13469_v23  ;;  %v5259_v21 = vcombine.low %v13463_v11, %v1645_v58  ;;  %v3385_v18 = vrot.slane %v3377_v13, %v11951_v63  ;;  %v13490_v30 = vsel %vm3751_vm4, %v5705_v41, %v5708_v9  ;;  %v13498_v58 = vld.sshfl [vmem:[#allocation2 + $0xc8] sm:$0x33 pattern:$0x75316420] }
 0x1fb   : > { %v3392_v3 = vrot.slane %v3378_v29, %v11951_v63  ;;  %v13492_v20 = vcombine.low %v5250_v43, %v5257_v4  ;;  %v5260_v10 = vcombine.low %v1646_v35, %v13466_v22  ;;  %v5261_v34 = vcombine.low %v13469_v23, %v1669_v45 }
 0x1fc   : > { %v3814_v57 = vor.u32 %v3812_v24, %v3810_v6  ;;  %v3818_v8 = vrot.slane %v3816_v31, 1  ;;  %v5262_v52 = vcombine.low %v1670_v47, %v13472_v5  ;;  %v5269_v12 = vrot.slane %v5259_v21, %v11951_v63  ;;  %v15261_v47 = vld [vmem:[#allocation83_spill] sm:$0xff] }
 0x1fd   : > { %v5713_v13 = vshll.u32 %v13492_v20, 16  ;;  %v5276_v29 = vrot.slane %v5260_v10, %v11951_v63  ;;  %v5283_v41 = vrot.slane %v5261_v34, %v11951_v63  ;;  %v3393_v43 = vcombine.low %v3385_v18, %v3392_v3  ;;  %v15262_v21 = vld [vmem:[#allocation79_spill] sm:$0xff] }
 0x1fe   : > { %10107 = vmatmul.mubr.msk.bf16.gmra.mrb[52].mxu0 %vm2683_vm3, %v13490_v30  ;;  %v5712_v6 = vor.u32 %v5710_v14, %v5708_v9  ;;  %v5290_v24 = vrot.slane %v5262_v52, %v11951_v63  ;;  %v3820_v31 = vshrl.u32 %v13447_v19, 16  ;;  %v13514_v45 = vrot.slane %v13498_v58, %v11951_v63  ;;  %v15263_v14 = vld [vmem:[#allocation86_spill] sm:$0xff]  ;;  %v15264_v52 = vld [vmem:[#allocation89_spill] sm:$0xff] }
 0x1ff   : > { %9775 = vmatmul.mubr.msk.bf16.gmra.mrb[24].mxu1 %vm2683_vm3, %v3811_v53  ;;  %10110 = vmatprep.mubr.msk.bf16.mxu0 %vm11352_vm2, %v15138_v36  ;;  %v5715_v4 = vrot.slane %v5713_v13, 1  ;;  %v5291_v35 = vcombine.low %v5269_v12, %v5276_v29  ;;  %v3426_v53 = vcombine.low %v15262_v21, %v15261_v47  ;;  %v3427_v18 = vcombine.low %v15264_v52, %v15263_v14 }
 0x200   : > { %9778 = vmatprep.mubr.msk.bf16.mxu1 %vm11352_vm2, %v15138_v36  ;;  %v5292_v9 = vcombine.low %v5283_v41, %v5290_v24  ;;  %v3819_v19 = vsel %vm3751_vm4, %v3814_v57, %v3818_v8  ;;  %v5717_v10 = vshrl.u32 %v13492_v20, 16  ;;  %v3824_v34 = vshll.u32 %v3393_v43, 16  ;;  %v15265_v57 = vld [vmem:[#allocation87_spill] sm:$0xff] }
 0x201   : > { %v5299_v3 = vrot.slane %v5291_v35, %v11951_v63  ;;  %v5601_v13 = vrot.slane %v13514_v45, %v11951_v63  ;;  %v3434_v29 = vrot.slane %v3426_v53, %v11951_v63  ;;  %v3441_v47 = vrot.slane %v3427_v18, %v11951_v63 }
 0x202   : > { %v5306_v12 = vrot.slane %v5292_v9, %v11951_v63  ;;  %v13529_v41 = vsel %vm3751_vm4, %v5712_v6, %v5715_v4  ;;  %v3822_v24 = vor.u32 %v3820_v31, %v3818_v8  ;;  %v3475_v21 = vcombine.low %v15265_v57, %v13104_v15 }
 0x203   : > { %v3476_v35 = vcombine.low %v13112_v39, %v13119_v54  ;;  %v13537_v9 = vcombine.low %v3434_v29, %v3441_v47  ;;  %v3524_v52 = vcombine.low %v13133_v7, %v13159_v0  ;;  %v3525_v53 = vcombine.low %v13167_v37, %v13151_v33 }
 0x204   : > { %v13535_v14 = vcombine.low %v5299_v3, %v5306_v12  ;;  %v3826_v18 = vrot.slane %v3824_v34, 1  ;;  %v3483_v6 = vrot.slane %v3475_v21, %v11951_v63  ;;  %v3573_v15 = vcombine.low %v13179_v25, %v13217_v51 }
 0x205   : > { %v3490_v8 = vrot.slane %v3476_v35, %v11951_v63  ;;  %v5719_v39 = vor.u32 %v5717_v10, %v5715_v4  ;;  %v5608_v7 = vrot.slane %v5601_v13, %v11951_v63  ;;  %v3828_v0 = vshrl.u32 %v3393_v43, 16 }
 0x206   : > { %15266 = vst [vmem:[#allocation47_spill] sm:$0xff] %v13535_v14  ;;  %10111 = vmatmul.mubr.msk.bf16.gmra.mrb[56].mxu0 %vm2683_vm3, %v13529_v41  ;;  %v5720_v54 = vshll.u32 %v13535_v14, 16  ;;  %v5724_v33 = vshrl.u32 %v13535_v14, 16  ;;  %v3532_v25 = vrot.slane %v3524_v52, %v11951_v63  ;;  %v3539_v51 = vrot.slane %v3525_v53, %v11951_v63 }
 0x207   : > { %9779 = vmatmul.mubr.msk.bf16.gmra.mrb[28].mxu1 %vm2683_vm3, %v3819_v19  ;;  %10114 = vmatprep.mubr.msk.bf16.mxu0 %vm11352_vm2, %v15138_v36  ;;  %v3491_v37 = vcombine.low %v3483_v6, %v3490_v8  ;;  %v3832_v4 = vshll.u32 %v13537_v9, 16  ;;  %v3574_v19 = vcombine.low %v13227_v56, %v13230_v32  ;;  %v3581_v43 = vrot.slane %v3573_v15, %v11951_v63 }
 0x208   : > { %9782 = vmatprep.mubr.msk.bf16.mxu1 %vm11352_vm2, %v15138_v36  ;;  %v5722_v31 = vrot.slane %v5720_v54, 1  ;;  %v3540_v10 = vcombine.low %v3532_v25, %v3539_v51  ;;  %v3622_v12 = vcombine.low %v13233_v44, %v13275_v59  ;;  %v3827_v29 = vsel %vm3751_vm4, %v3822_v24, %v3826_v18 }
 0x209   : > { %v3840_v3 = vshll.u32 %v3491_v37, 16  ;;  %v3844_v34 = vshrl.u32 %v3491_v37, 16  ;;  %v5728_v47 = vshll.u32 %v5608_v7, 16  ;;  %v3830_v57 = vor.u32 %v3828_v0, %v3826_v18 }
 0x20a   : > { %v13566_v13 = vsel %vm3751_vm4, %v5719_v39, %v5722_v31  ;;  %v3848_v35 = vshll.u32 %v3540_v10, 16  ;;  %v3588_v52 = vrot.slane %v3574_v19, %v11951_v63  ;;  %v3852_v56 = vshrl.u32 %v3540_v10, 16 }
 0x20b   : > { %v3842_v21 = vrot.slane %v3840_v3, 1  ;;  %v3834_v32 = vrot.slane %v3832_v4, 1  ;;  %v3623_v53 = vcombine.low %v13278_v38, %v13268_v26  ;;  %v3630_v6 = vrot.slane %v3622_v12, %v11951_v63 }
 0x20c   : > { %v3671_v44 = vcombine.low %v13286_v60, %v13316_v46  ;;  %v13575_v59 = vor.u32 %v5724_v33, %v5722_v31  ;;  %v3850_v24 = vrot.slane %v3848_v35, 1  ;;  %v3589_v15 = vcombine.low %v3581_v43, %v3588_v52 }
 0x20d   : > { %v3846_v8 = vor.u32 %v3844_v34, %v3842_v21  ;;  %v5730_v18 = vrot.slane %v5728_v47, 1  ;;  %v3637_v39 = vrot.slane %v3623_v53, %v11951_v63  ;;  %v3672_v26 = vcombine.low %v13319_v62, %v13331_v50 }
 0x20e   : > { %10115 = vmatmul.mubr.msk.bf16.gmra.mrb[60].mxu0 %vm2683_vm3, %v13566_v13  ;;  %v3679_v38 = vrot.slane %v3671_v44, %v11951_v63  ;;  %v3854_v46 = vor.u32 %v3852_v56, %v3850_v24  ;;  %v3856_v54 = vshll.u32 %v3589_v15, 16  ;;  %v3860_v7 = vshrl.u32 %v3589_v15, 16  ;;  %v15268_v15 = vld [vmem:[#allocation107_spill] sm:$0xff] }
 0x20f   : > { %9783 = vmatmul.mubr.msk.bf16.gmra.mrb[32].mxu1 %vm2683_vm3, %v3827_v29  ;;  %10118 = vmatprep.mubr.msk.bf16.mxu0 %vm11352_vm2, %v15138_v36  ;;  %v3851_v60 = vsel %vm3751_vm4, %v3846_v8, %v3850_v24  ;;  %v3638_v0 = vcombine.low %v3630_v6, %v3637_v39  ;;  %v3686_v33 = vrot.slane %v3672_v26, %v11951_v63  ;;  %v3836_v25 = vshrl.u32 %v13537_v9, 16  ;;  %v11046_v6 = vld [vmem:[#allocation9 + $0xe0] sm:$0xff]   ;;  %v15270_v39 = vld [vmem:[#allocation44_spill] sm:$0xff] }
 0x210   : > { %9786 = vmatprep.mubr.msk.bf16.mxu1 %vm11352_vm2, %v15138_v36  ;;  %v3720_v37 = vcombine.low %v13337_v49, %v13368_v55  ;;  %v3721_v62 = vcombine.low %v13371_v42, %v13374_v17  ;;  %v3835_v50 = vsel %vm3751_vm4, %v3830_v57, %v3834_v32  ;;  %v3858_v51 = vrot.slane %v3856_v54, 1  ;;  %v15267_v24 = vld [vmem:[#allocation99_spill] sm:$0xff] }
 0x211   : > { %v3864_v31 = vshll.u32 %v3638_v0, 16  ;;  %v3687_v4 = vcombine.low %v3679_v38, %v3686_v33  ;;  %v3868_v19 = vshrl.u32 %v3638_v0, 16  ;;  %v5731_v3 = vsel %vm3751_vm4, %v13575_v59, %v5730_v18  ;;  %v15269_v18 = vld [vmem:[#allocation43_spill] sm:$0xff]  ;;  %v11052_v33 = vld [vmem:[#allocation9 + $0xf8] sm:$0xff]  }
 0x212   : > { %v3728_v43 = vrot.slane %v3720_v37, %v11951_v63  ;;  %v3859_v10 = vsel %vm3751_vm4, %v3854_v46, %v3858_v51  ;;  %v3862_v34 = vor.u32 %v3860_v7, %v3858_v51  ;;  %v3735_v49 = vrot.slane %v3721_v62, %v11951_v63  ;;  %v15272_v46 = vld [vmem:[#allocation45_spill] sm:$0xff]  ;;  %v15273_v54 = vld [vmem:[#allocation51_spill] sm:$0xff]  ;;  %v15275_v37 = vld [vmem:[#allocation116_spill] sm:$0xff] }
 0x213   : > { %v3866_v55 = vrot.slane %v3864_v31, 1  ;;  %v3872_v42 = vshll.u32 %v3687_v4, 16  ;;  %v3876_v17 = vshrl.u32 %v3687_v4, 16  ;;  %v3838_v57 = vor.u32 %v3836_v25, %v3834_v32  ;;  %v11048_v32 = vld [vmem:[#allocation9 + $0xe8] sm:$0xff]  }
 0x214   : > { %v3736_v12 = vcombine.low %v3728_v43, %v3735_v49  ;;  %v15271_v26 = vcombine.low %v15269_v18, %v15270_v39  ;;  %v15274_v7 = vcombine.low %v15272_v46, %v15273_v54  ;;  %v3743_v62 = vrot.slane %v15244_v16, %v11951_v63  ;;  %v15276_v16 = vld [vmem:[#allocation32_spill] sm:$0xff]  ;;  %v15277_v43 = vld [vmem:[#allocation33_spill] sm:$0xff] }
 0x215   : > { %v3867_v9 = vsel %vm3751_vm4, %v3862_v34, %v3866_v55  ;;  %v3870_v29 = vor.u32 %v3868_v19, %v3866_v55  ;;  %v3874_v47 = vrot.slane %v3872_v42, 1  ;;  %v3843_v44 = vsel %vm3751_vm4, %v3838_v57, %v3842_v21  ;;  %v11050_v21 = vld [vmem:[#allocation9 + $0xf0] sm:$0xff]   ;;  %v15278_v42 = vld [vmem:[#allocation34_spill] sm:$0xff] }
 0x216   : > { %10119 = vmatmul.mubr.msk.bf16.gmra.mrb[64].mxu0 %vm2683_vm3, %v5731_v3  ;;  %v3880_v35 = vshll.u32 %v3736_v12, 16  ;;  %v6405_v38 = vrot.slane %v15271_v26, %v11951_v63  ;;  %v6412_v0 = vrot.slane %v15274_v7, %v11951_v63  ;;  %v4161_v51 = vshll.u32 %v15276_v16, 16 }
 0x217   : > { %9787 = vmatmul.mubr.msk.bf16.gmra.mrb[36].mxu1 %vm2683_vm3, %v3835_v50  ;;  %10130 = vmatprep.mubr.msk.bf16.mxu0 %vm11352_vm2, %v15138_v36  ;;  %v3875_v52 = vsel %vm3751_vm4, %v3870_v29, %v3874_v47  ;;  %v3878_v56 = vor.u32 %v3876_v17, %v3874_v47  ;;  %v3884_v50 = vshrl.u32 %v3736_v12, 16  ;;  %v4159_v4 = vshrl.u32 %v15276_v16, 16  ;;  %v11051_v12 = vld [vmem:[#allocation9 + $0x60] sm:$0xff]   ;;  %v11053_v29 = vld [vmem:[#allocation9 + $0x68] sm:$0xff]  }
 0x218   : > { %9790 = vmatprep.mubr.msk.bf16.mxu1 %vm11352_vm2, %v15138_v36  ;;  %v3882_v53 = vrot.slane %v3880_v35, 1  ;;  %v4163_v19 = vrot.slane %v4161_v51, 1  ;;  %v4165_v3 = vshll.u32 %v15277_v43, 16  ;;  %v4169_v55 = vshrl.u32 %v15277_v43, 16  ;;  %v15279_v35 = vld [vmem:[#allocation40_spill] sm:$0xff]  ;;  %v15283_v43 = vld [vmem:[#allocation66_spill] sm:$0xff] }
 0x219   : > { %v4172_v17 = vshll.u32 %v15278_v42, 16  ;;  %v4176_v57 = vshrl.u32 %v15278_v42, 16 }
 0x21a   : > { %v3883_v8 = vsel %vm3751_vm4, %v3878_v56, %v3882_v53  ;;  %v4164_v34 = vor.u32 %v4163_v19, %v4159_v4 }
 0x21e   : > { %10131 = vmatmul.mubr.msk.bf16.vlgmr.msra.gmra.mrb[0].mxu0 %vm2683_vm3, %v15267_v24 }
 0x21f   : > { %9791 = vmatmul.mubr.msk.bf16.gmra.mrb[40].mxu1 %vm2683_vm3, %v3843_v44  ;;  %10199 = vmatpush3.bf16.msra.mxu0 %v11046_v6  ;;  %v11057_v6 = vld [vmem:[#allocation9 + $0x78] sm:$0xff]  }
 0x220   : > { %10134 = vmatprep.mubr.msk.bf16.mxu0 %vm11352_vm2, %v15138_v36  ;;  %9794 = vmatprep.mubr.msk.bf16.mxu1 %vm11352_vm2, %v15138_v36 }
 0x221   : > { %10200 = vmatprep.subr.bf16.mxu0 %v15138_v36 }
 0x223   : > { %10201 = vmatpush3.bf16.msra.mxu0 %v11048_v32  ;;  %v9168_v32 = vld.sshfl [vmem:[#allocation2 + $0xcc] sm:$0x33 pattern:$0x75316420] }
 0x224   : > { %10202 = vmatprep.subr.bf16.mxu0 %v15138_v36  ;;  %v1716_v39 = vcombine.high %v9168_v32, %v9168_v32  ;;  %v13729_v54 = vrot.slane %v9168_v32, %v11951_v63 }
 0x226   : > { %10135 = vmatmul.mubr.msk.bf16.gmra.mrb[4].mxu0 %vm2683_vm3, %v15268_v15  ;;  %v13732_v7 = vrot.slane %v1716_v39, %v11951_v63 }
 0x227   : > { %9795 = vmatmul.mubr.msk.bf16.gmra.mrb[44].mxu1 %vm2683_vm3, %v3851_v60  ;;  %10138 = vmatprep.mubr.msk.bf16.mxu0 %vm11352_vm2, %v15138_v36  ;;  %v13636_v60 = vcombine.low %v6405_v38, %v6412_v0  ;;  %v15281_v38 = vld [vmem:[#allocation55_spill] sm:$0xff] }
 0x228   : > { %9798 = vmatprep.mubr.msk.bf16.mxu1 %vm11352_vm2, %v15138_v36  ;;  %10203 = vmatpush3.bf16.msra.mxu0 %v11050_v21  ;;  %v1692_v21 = vcombine.high %v13498_v58, %v13498_v58  ;;  %v4193_v46 = vshll.u32 %v15281_v38, 16  ;;  %v9169_v0 = vld.sshfl [vmem:[#allocation2 + $0xd0] sm:$0x33 pattern:$0x75316420]  ;;  %v6021_v51 = vcombine.low %v13729_v54, %v13732_v7  ;;  %v4197_v19 = vshrl.u32 %v15281_v38, 16 }
 0x229   : > { %10204 = vmatprep.subr.bf16.mxu0 %v15138_v36  ;;  %v1740_v16 = vcombine.high %v9169_v0, %v9169_v0 }
 0x22a   : > { %v13723_v58 = vrot.slane %v1692_v21, %v11951_v63 }
 0x22c   : > { %10205 = vmatpush3.bf16.msra.mxu0 %v11052_v33  ;;  %v9170_v33 = vld.sshfl [vmem:[#allocation2 + $0xd4] sm:$0x33 pattern:$0x75316420] }
 0x22d   : > { %10274 = vmatprep.subr.bf16.mxu0 %v15138_v36 }
 0x22e   : > { %10139 = vmatmul.mubr.msk.bf16.gmra.mrb[8].mxu0 %vm2683_vm3, %v15275_v37 }
 0x22f   : > { %9799 = vmatmul.mubr.msk.bf16.gmra.mrb[48].mxu1 %vm2683_vm3, %v3859_v10  ;;  %10142 = vmatprep.mubr.msk.bf16.mxu0 %vm11352_vm2, %v15138_v36 }
 0x230   : > { %9802 = vmatprep.mubr.msk.bf16.mxu1 %vm11352_vm2, %v15138_v36 }
 0x236   : > { %10143 = vmatmul.mubr.msk.bf16.gmra.mrb[12].mxu0 %vm2683_vm3, %v12966_v1  ;;  %v3750_v1 = vrot.slane %v3743_v62, %v11951_v63  ;;  %v4195_v62 = vrot.slane %v4193_v46, 1 }
 0x237   : > { %9803 = vmatmul.mubr.msk.bf16.gmra.mrb[52].mxu1 %vm2683_vm3, %v3867_v9  ;;  %10146 = vmatprep.mubr.msk.bf16.mxu0 %vm11352_vm2, %v15138_v36  ;;  %v4174_v9 = vrot.slane %v4172_v17, 1  ;;  %v13766_v17 = vrot.slane %v9170_v33, %v11951_v63 }
 0x238   : > { %9806 = vmatprep.mubr.msk.bf16.mxu1 %vm11352_vm2, %v15138_v36  ;;  %v3888_v25 = vshll.u32 %v3750_v1, 16  ;;  %v15282_v1 = vld [vmem:[#allocation39_spill] sm:$0xff] }
 0x239   : > { %v4178_v56 = vor.u32 %v4176_v57, %v4174_v9 }
 0x23a   : > { %v3890_v31 = vrot.slane %v3888_v25, 1  ;;  %v9335_v25 = vcombine.high %v13514_v45, %v13723_v58 }
 0x23e   : > { %10147 = vmatmul.mubr.msk.bf16.gmra.mrb[16].mxu0 %vm2683_vm3, %v13023_v40  ;;  %v3886_v40 = vor.u32 %v3884_v50, %v3882_v53  ;;  %v6019_v50 = vcombine.low %v13514_v45, %v13723_v58 }
 0x23f   : > { %9807 = vmatmul.mubr.msk.bf16.gmra.mrb[56].mxu1 %vm2683_vm3, %v3875_v52  ;;  %10150 = vmatprep.mubr.msk.bf16.mxu0 %vm11352_vm2, %v15138_v36  ;;  %v11055_v52 = vld [vmem:[#allocation9 + $0x70] sm:$0xff]  }
 0x240   : > { %9810 = vmatprep.mubr.msk.bf16.mxu1 %vm11352_vm2, %v15138_v36  ;;  %v3891_v10 = vsel %vm3751_vm4, %v3886_v40, %v3890_v31  ;;  %v9336_v40 = vcombine.high %v13729_v54, %v13732_v7  ;;  %v1764_v31 = vcombine.high %v9170_v33, %v9170_v33  ;;  %v15285_v33 = vld [vmem:[#allocation82_spill] sm:$0xff] }
 0x242   : > { %v6050_v42 = vrot.slane %v9336_v40, %v11951_v63 }
 0x246   : > { %10151 = vmatmul.mubr.msk.bf16.gmra.mrb[20].mxu0 %vm2683_vm3, %v13116_v48  ;;  %v4167_v48 = vrot.slane %v4165_v3, 1  ;;  %v4200_v3 = vshll.u32 %v15283_v43, 16 }
 0x247   : > { %9811 = vmatmul.mubr.msk.bf16.gmra.mrb[60].mxu1 %vm2683_vm3, %v3883_v8  ;;  %10154 = vmatprep.mubr.msk.bf16.mxu0 %vm11352_vm2, %v15138_v36  ;;  %v4183_v8 = vshrl.u32 %v15279_v35, 16 }
 0x248   : > { %9814 = vmatprep.mubr.msk.bf16.mxu1 %vm11352_vm2, %v15138_v36  ;;  %v4168_v49 = vsel %vm3751_vm4, %v4164_v34, %v4167_v48  ;;  %v13758_v34 = vrot.slane %v9169_v0, %v11951_v63 }
 0x24e   : > { %10155 = vmatmul.mubr.msk.bf16.gmra.mrb[24].mxu0 %vm2683_vm3, %v13236_v27  ;;  %v4171_v27 = vor.u32 %v4169_v55, %v4167_v48  ;;  %v6036_v48 = vrot.slane %v9335_v25, %v11951_v63  ;;  %v6043_v55 = vrot.slane %v6021_v51, %v11951_v63  ;;  %v9171_v25 = vld.sshfl [vmem:[#allocation2 + $0xd8] sm:$0x1 pattern:$0x75316420] }
 0x24f   : > { %9815 = vmatmul.mubr.msk.bf16.gmra.mrb[64].mxu1 %vm2683_vm3, %v3891_v10  ;;  %10158 = vmatprep.mubr.msk.bf16.mxu0 %vm11352_vm2, %v15138_v36  ;;  %v6029_v10 = vrot.slane %v6019_v50, %v11951_v63 }
 0x250   : > { %9826 = vmatprep.mubr.msk.bf16.mxu1 %vm11352_vm2, %v15138_v36  ;;  %v4175_v47 = vsel %vm3751_vm4, %v4171_v27, %v4174_v9  ;;  %v4199_v27 = vor.u32 %v4197_v19, %v4195_v62  ;;  %v4202_v9 = vrot.slane %v4200_v3, 1  ;;  %v13822_v19 = vrot.slane %v9171_v25, %v11951_v63  ;;  %v15286_v3 = vld [vmem:[#allocation95_spill] sm:$0xff] }
 0x256   : > { %10159 = vmatmul.mubr.msk.bf16.gmra.mrb[28].mxu0 %vm2683_vm3, %v13290_v61  ;;  %v4179_v61 = vshll.u32 %v15279_v35, 16  ;;  %v6052_v35 = vcombine.low %v6043_v55, %v6050_v42 }
 0x257   : > { %9827 = vmatmul.mubr.msk.bf16.vlgmr.msra.gmra.mrb[0].mxu1 %vm2683_vm3, %v4168_v49  ;;  %10162 = vmatprep.mubr.msk.bf16.mxu0 %vm11352_vm2, %v15138_v36  ;;  %v13761_v49 = vrot.slane %v1740_v16, %v11951_v63 }
 0x258   : > { %9830 = vmatprep.mubr.msk.bf16.mxu1 %vm11352_vm2, %v15138_v36  ;;  %9895 = vmatpush3.bf16.msra.mxu1 %v11051_v12  ;;  %v4181_v53 = vrot.slane %v4179_v61, 1  ;;  %v13769_v12 = vrot.slane %v1764_v31, %v11951_v63 }
 0x259   : > { %9896 = vmatprep.subr.bf16.mxu1 %v15138_v36  ;;  %v9337_v57 = vcombine.high %v13758_v34, %v13761_v49 }
 0x25a   : > { %v13705_v44 = vsel %vm3751_vm4, %v4178_v56, %v4181_v53  ;;  %v4185_v15 = vor.u32 %v4183_v8, %v4181_v53  ;;  %v9338_v61 = vcombine.high %v13766_v17, %v13769_v12  ;;  %v13789_v56 = vsel %vm3751_vm4, %v4199_v27, %v4202_v9  ;;  %v15284_v53 = vld [vmem:[#allocation73_spill] sm:$0xff] }
 0x25b   : > { %v6085_v32 = vrot.slane %v9337_v57, %v11951_v63  ;;  %v4211_v0 = vshrl.u32 %v15284_v53, 16  ;;  %v6123_v27 = vrot.slane %v13822_v19, %v11951_v63 }
 0x25c   : > { %9897 = vmatpush3.bf16.msra.mxu1 %v11053_v29  ;;  %v6051_v29 = vcombine.low %v6029_v10, %v6036_v48  ;;  %v4221_v10 = vshll.u32 %v15286_v3, 16 }
 0x25d   : > { %9898 = vmatprep.subr.bf16.mxu1 %v15138_v36  ;;  %v6130_v57 = vrot.slane %v6123_v27, %v11951_v63  ;;  %v15294_v27 = vld [vmem:[#allocation62_spill] sm:$0xff] }
 0x25e   : > { %10163 = vmatmul.mubr.msk.bf16.gmra.mrb[32].mxu0 %vm2683_vm3, %v13341_v2  ;;  %v15280_v2 = vld [vmem:[#allocation46_spill] sm:$0xff]  ;;  %v6059_v8 = vrot.slane %v6051_v29, %v11951_v63 }
 0x25f   : > { %9831 = vmatmul.mubr.msk.bf16.gmra.mrb[4].mxu1 %vm2683_vm3, %v4175_v47  ;;  %10166 = vmatprep.mubr.msk.bf16.mxu0 %vm11352_vm2, %v15138_v36  ;;  %v4186_v24 = vshll.u32 %v15280_v2, 16  ;;  %v4190_v26 = vshrl.u32 %v15280_v2, 16  ;;  %v6068_v47 = vcombine.low %v13758_v34, %v13761_v49 }
 0x260   : > { %9834 = vmatprep.mubr.msk.bf16.mxu1 %vm11352_vm2, %v15138_v36  ;;  %9899 = vmatpush3.bf16.msra.mxu1 %v11055_v52  ;;  %v4204_v52 = vshrl.u32 %v15283_v43, 16 }
 0x261   : > { %9900 = vmatprep.subr.bf16.mxu1 %v15138_v36  ;;  %v4188_v18 = vrot.slane %v4186_v24, 1  ;;  %v6078_v2 = vrot.slane %v6068_v47, %v11951_v63  ;;  %v6066_v24 = vrot.slane %v6052_v35, %v11951_v63  ;;  %v4225_v35 = vshrl.u32 %v15286_v3, 16 }
 0x263   : > { %v4192_v37 = vor.u32 %v4190_v26, %v4188_v18  ;;  %v6067_v26 = vcombine.low %v6059_v8, %v6066_v24  ;;  %v6100_v38 = vcombine.low %v6078_v2, %v6085_v32  ;;  %v6148_v8 = vshll.u32 %v6130_v57, 16 }
 0x264   : > { %9901 = vmatpush3.bf16.msra.mxu1 %v11057_v6  ;;  %v4207_v6 = vshll.u32 %v15284_v53, 16 }
 0x265   : > { %10350 = vmatprep.subr.bf16.mxu1 %v15138_v36  ;;  %v13751_v4 = vsel %vm3751_vm4, %v4192_v37, %v4195_v62  ;;  %v4214_v37 = vshll.u32 %v15285_v33, 16  ;;  %v6132_v62 = vshll.u32 %v6067_v26, 16  ;;  %v6136_v55 = vshrl.u32 %v6067_v26, 16  ;;  %v15288_v26 = vld [vmem:[#allocation104_spill] sm:$0xff] }
 0x266   : > { %10167 = vmatmul.mubr.msk.bf16.gmra.mrb[36].mxu0 %vm2683_vm3, %v13390_v28  ;;  %v13726_v28 = vsel %vm3751_vm4, %v4185_v15, %v4188_v18  ;;  %v6099_v15 = vrot.slane %v9338_v61, %v11951_v63  ;;  %v4206_v18 = vor.u32 %v4204_v52, %v4202_v9  ;;  %v4209_v39 = vrot.slane %v4207_v6, 1 }
 0x267   : > { %9835 = vmatmul.mubr.msk.bf16.gmra.mrb[8].mxu1 %vm2683_vm3, %v13705_v44  ;;  %10170 = vmatprep.mubr.msk.bf16.mxu0 %vm11352_vm2, %v15138_v36  ;;  %v4216_v51 = vrot.slane %v4214_v37, 1  ;;  %v6134_v40 = vrot.slane %v6132_v62, 1  ;;  %v6150_v24 = vrot.slane %v6148_v8, 1  ;;  %v15290_v37 = vld [vmem:[#allocation52_spill] sm:$0xff]  ;;  %v11058_v8 = vld [vmem:[#allocation9 + $0x110] sm:$0xff]  }
 0x268   : > { %9838 = vmatprep.mubr.msk.bf16.mxu1 %vm11352_vm2, %v15138_v36  ;;  %v4213_v16 = vor.u32 %v4211_v0, %v4209_v39 }
 0x269   : > { %v6135_v48 = vsel %vm3751_vm4, %v13575_v59, %v6134_v40  ;;  %v6138_v29 = vor.u32 %v6136_v55, %v6134_v40  ;;  %v4223_v59 = vrot.slane %v4221_v10, 1  ;;  %v4239_v40 = vshrl.u32 %v15288_v26, 16 }
 0x26a   : > { %v13825_v43 = vsel %vm3751_vm4, %v4213_v16, %v4216_v51  ;;  %v11054_v16 = vld [vmem:[#allocation9 + $0x100] sm:$0xff]  }
 0x26b   : > { %v4227_v32 = vor.u32 %v4225_v35, %v4223_v59 }
 0x26e   : > { %10171 = vmatmul.mubr.msk.bf16.gmra.mrb[40].mxu0 %vm2683_vm3, %v15282_v1  ;;  %v6108_v1 = vrot.slane %v6100_v38, %v11951_v63  ;;  %v4235_v38 = vshll.u32 %v15288_v26, 16  ;;  %v15302_v26 = vld [vmem:[#allocation72_spill] sm:$0xff] }
 0x26f   : > { %9839 = vmatmul.mubr.msk.bf16.gmra.mrb[12].mxu1 %vm2683_vm3, %v13726_v28  ;;  %10174 = vmatprep.mubr.msk.bf16.mxu0 %vm11352_vm2, %v15138_v36 }
 0x270   : > { %9842 = vmatprep.mubr.msk.bf16.mxu1 %vm11352_vm2, %v15138_v36  ;;  %v4237_v0 = vrot.slane %v4235_v38, 1 }
 0x276   : > { %10175 = vmatmul.mubr.msk.bf16.gmra.mrb[44].mxu0 %vm2683_vm3, %v13490_v30  ;;  %v6070_v30 = vcombine.low %v13766_v17, %v13769_v12 }
 0x277   : > { %9843 = vmatmul.mubr.msk.bf16.gmra.mrb[16].mxu1 %vm2683_vm3, %v13751_v4  ;;  %10178 = vmatprep.mubr.msk.bf16.mxu0 %vm11352_vm2, %v15138_v36 }
 0x278   : > { %9846 = vmatprep.mubr.msk.bf16.mxu1 %vm11352_vm2, %v15138_v36  ;;  %v6092_v21 = vrot.slane %v6070_v30, %v11951_v63  ;;  %v15287_v30 = vld [vmem:[#allocation96_spill] sm:$0xff] }
 0x279   : > { %v4228_v61 = vshll.u32 %v15287_v30, 16 }
 0x27a   : > { %v6101_v46 = vcombine.low %v6092_v21, %v6099_v15 }
 0x27b   : > { %v4230_v21 = vrot.slane %v4228_v61, 1 }
 0x27c   : > { %v6115_v50 = vrot.slane %v6101_v46, %v11951_v63 }
 0x27e   : > { %10179 = vmatmul.mubr.msk.bf16.gmra.mrb[48].mxu0 %vm2683_vm3, %v13529_v41  ;;  %v13809_v41 = vsel %vm3751_vm4, %v4206_v18, %v4209_v39  ;;  %v6116_v31 = vcombine.low %v6108_v1, %v6115_v50  ;;  %v13856_v18 = vsel %vm3751_vm4, %v4227_v32, %v4230_v21  ;;  %v4232_v39 = vshrl.u32 %v15287_v30, 16  ;;  %v15291_v1 = vld [vmem:[#allocation60_spill] sm:$0xff]  ;;  %v15292_v50 = vld [vmem:[#allocation54_spill] sm:$0xff]  ;;  %v15299_v32 = vld [vmem:[#allocation71_spill] sm:$0xff] }
 0x27f   : > { %9847 = vmatmul.mubr.msk.bf16.gmra.mrb[20].mxu1 %vm2683_vm3, %v13789_v56  ;;  %10182 = vmatprep.mubr.msk.bf16.mxu0 %vm11352_vm2, %v15138_v36  ;;  %v6415_v25 = vcombine.low %v15292_v50, %v15291_v1 }
 0x280   : > { %9850 = vmatprep.mubr.msk.bf16.mxu1 %vm11352_vm2, %v15138_v36  ;;  %v6140_v42 = vshll.u32 %v6116_v31, 16  ;;  %v6144_v6 = vshrl.u32 %v6116_v31, 16  ;;  %v4234_v46 = vor.u32 %v4232_v39, %v4230_v21  ;;  %v15293_v31 = vld [vmem:[#allocation115_spill] sm:$0xff]  ;;  %v15300_v21 = vld [vmem:[#allocation70_spill] sm:$0xff]  ;;  %v15301_v39 = vld [vmem:[#allocation77_spill] sm:$0xff] }
 0x281   : > { %v6429_v10 = vrot.slane %v6415_v25, %v11951_v63  ;;  %v4246_v61 = vshrl.u32 %v15293_v31, 16  ;;  %v6449_v38 = vcombine.low %v15302_v26, %v15301_v39  ;;  %v15309_v26 = vld [vmem:[#allocation88_spill] sm:$0xff] }
 0x282   : > { %v6142_v47 = vrot.slane %v6140_v42, 1  ;;  %v11056_v42 = vld [vmem:[#allocation9 + $0x108] sm:$0xff]  }
 0x283   : > { %v6463_v1 = vrot.slane %v6449_v38, %v11951_v63  ;;  %v15310_v38 = vld [vmem:[#allocation85_spill] sm:$0xff] }
 0x284   : > { %v6143_v52 = vsel %vm3751_vm4, %v6138_v29, %v6142_v47  ;;  %v6146_v2 = vor.u32 %v6144_v6, %v6142_v47  ;;  %v15296_v47 = vld [vmem:[#allocation69_spill] sm:$0xff] }
 0x286   : > { %10183 = vmatmul.mubr.msk.bf16.gmra.mrb[52].mxu0 %vm2683_vm3, %v13566_v13  ;;  %v4218_v13 = vshrl.u32 %v15285_v33, 16  ;;  %v6151_v15 = vsel %vm3751_vm4, %v6146_v2, %v6150_v24  ;;  %v15289_v33 = vld [vmem:[#allocation53_spill] sm:$0xff] }
 0x287   : > { %9851 = vmatmul.mubr.msk.bf16.gmra.mrb[24].mxu1 %vm2683_vm3, %v13809_v41  ;;  %10186 = vmatprep.mubr.msk.bf16.mxu0 %vm11352_vm2, %v15138_v36  ;;  %v6414_v62 = vcombine.low %v15290_v37, %v15289_v33  ;;  %v11059_v33 = vld [vmem:[#allocation9 + $0x118] sm:$0xff]  }
 0x288   : > { %9854 = vmatprep.mubr.msk.bf16.mxu1 %vm11352_vm2, %v15138_v36  ;;  %v4220_v9 = vor.u32 %v4218_v13, %v4216_v51  ;;  %v13872_v51 = vsel %vm3751_vm4, %v4234_v46, %v4237_v0  ;;  %v4242_v13 = vshll.u32 %v15293_v31, 16 }
 0x289   : > { %v6422_v3 = vrot.slane %v6414_v62, %v11951_v63 }
 0x28a   : > { %v13845_v53 = vsel %vm3751_vm4, %v4220_v9, %v4223_v59  ;;  %v4244_v55 = vrot.slane %v4242_v13, 1  ;;  %v15295_v9 = vld [vmem:[#allocation61_spill] sm:$0xff]  ;;  %v15297_v59 = vld [vmem:[#allocation63_spill] sm:$0xff] }
 0x28b   : > { %v6431_v29 = vcombine.low %v15295_v9, %v15294_v27  ;;  %v6432_v57 = vcombine.low %v15297_v59, %v15296_v47  ;;  %v13891_v35 = vcombine.low %v6422_v3, %v6429_v10  ;;  %v15304_v3 = vld [vmem:[#allocation80_spill] sm:$0xff]  ;;  %v15305_v10 = vld [vmem:[#allocation78_spill] sm:$0xff] }
 0x28c   : > { %v4248_v46 = vor.u32 %v4246_v61, %v4244_v55 }
 0x28d   : > { %v6439_v2 = vrot.slane %v6431_v29, %v11951_v63  ;;  %v6446_v24 = vrot.slane %v6432_v57, %v11951_v63 }
 0x28e   : > { %10187 = vmatmul.mubr.msk.bf16.gmra.mrb[56].mxu0 %vm2683_vm3, %v6135_v48  ;;  %v4241_v48 = vor.u32 %v4239_v40, %v4237_v0 }
 0x28f   : > { %9855 = vmatmul.mubr.msk.bf16.gmra.mrb[28].mxu1 %vm2683_vm3, %v13825_v43  ;;  %10190 = vmatprep.mubr.msk.bf16.mxu0 %vm11352_vm2, %v15138_v36  ;;  %v6447_v37 = vcombine.low %v6439_v2, %v6446_v24 }
 0x290   : > { %9858 = vmatprep.mubr.msk.bf16.mxu1 %vm11352_vm2, %v15138_v36  ;;  %v13894_v30 = vsel %vm3751_vm4, %v4241_v48, %v4244_v55  ;;  %v6465_v48 = vcombine.low %v15305_v10, %v15304_v3  ;;  %v15306_v55 = vld [vmem:[#allocation84_spill] sm:$0xff] }
 0x291   : > { %v7072_v31 = vshll.u32 %v6447_v37, 16  ;;  %v7076_v59 = vshrl.u32 %v6447_v37, 16 }
 0x292   : > { %v6473_v61 = vrot.slane %v6465_v48, %v11951_v63 }
 0x293   : > { %v13932_v47 = vrot.slane %v7072_v31, 1 }
 0x296   : > { %10191 = vmatmul.mubr.msk.bf16.gmra.mrb[60].mxu0 %vm2683_vm3, %v6143_v52  ;;  %v15298_v52 = vld [vmem:[#allocation121_spill] sm:$0xff] }
 0x297   : > { %9859 = vmatmul.mubr.msk.bf16.gmra.mrb[32].mxu1 %vm2683_vm3, %v13845_v53  ;;  %10194 = vmatprep.mubr.msk.bf16.mxu0 %vm11352_vm2, %v15138_v36  ;;  %v4249_v6 = vshll.u32 %v15298_v52, 16  ;;  %v4253_v50 = vshrl.u32 %v15298_v52, 16 }
 0x298   : > { %9862 = vmatprep.mubr.msk.bf16.mxu1 %vm11352_vm2, %v15138_v36 }
 0x299   : > { %v4251_v0 = vrot.slane %v4249_v6, 1  ;;  %v7078_v6 = vor.u32 %v7076_v59, %v13932_v47 }
 0x29b   : > { %v13918_v25 = vsel %vm3751_vm4, %v4248_v46, %v4251_v0  ;;  %v4255_v9 = vor.u32 %v4253_v50, %v4251_v0  ;;  %v6482_v46 = vcombine.low %v15310_v38, %v15309_v26  ;;  %v15311_v0 = vld [vmem:[#allocation91_spill] sm:$0xff] }
 0x29e   : > { %10195 = vmatmul.mubr.msk.bf16.gmra.mrb[64].mxu0 %vm2683_vm3, %v6151_v15  ;;  %v6448_v15 = vcombine.low %v15300_v21, %v15299_v32  ;;  %v15308_v32 = vld [vmem:[#allocation135_spill] sm:$0xff] }
 0x29f   : > { %9863 = vmatmul.mubr.msk.bf16.gmra.mrb[36].mxu1 %vm2683_vm3, %v13856_v18  ;;  %10206 = vmatprep.mubr.msk.bf16.mxu0 %vm11352_vm2, %v15138_v36  ;;  %v4263_v21 = vshll.u32 %v15308_v32, 16  ;;  %v4267_v48 = vshrl.u32 %v15308_v32, 16 }
 0x2a0   : > { %9866 = vmatprep.mubr.msk.bf16.mxu1 %vm11352_vm2, %v15138_v36  ;;  %v6456_v62 = vrot.slane %v6448_v15, %v11951_v63 }
 0x2a2   : > { %v6464_v13 = vcombine.low %v6456_v62, %v6463_v1  ;;  %v4265_v1 = vrot.slane %v4263_v21, 1 }
 0x2a4   : > { %v7079_v57 = vshll.u32 %v6464_v13, 16  ;;  %v7083_v50 = vshrl.u32 %v6464_v13, 16  ;;  %v4269_v32 = vor.u32 %v4267_v48, %v4265_v1  ;;  %v15320_v48 = vld [vmem:[#allocation98_spill] sm:$0xff] }
 0x2a6   : > { %10207 = vmatmul.mubr.msk.bf16.vlgmr.msra.gmra.mrb[0].mxu0 %vm2683_vm3, %v13636_v60 }
 0x2a7   : > { %9867 = vmatmul.mubr.msk.bf16.gmra.mrb[40].mxu1 %vm2683_vm3, %v13872_v51  ;;  %10275 = vmatpush3.bf16.msra.mxu0 %v11054_v16  ;;  %v15303_v16 = vld [vmem:[#allocation125_spill] sm:$0xff] }
 0x2a8   : > { %10210 = vmatprep.mubr.msk.bf16.mxu0 %vm11352_vm2, %v15138_v36  ;;  %9870 = vmatprep.mubr.msk.bf16.mxu1 %vm11352_vm2, %v15138_v36  ;;  %v4256_v40 = vshll.u32 %v15303_v16, 16  ;;  %v4260_v24 = vshrl.u32 %v15303_v16, 16 }
 0x2a9   : > { %10276 = vmatprep.subr.bf16.mxu0 %v15138_v36 }
 0x2aa   : > { %v4258_v29 = vrot.slane %v4256_v40, 1  ;;  %v6490_v40 = vrot.slane %v6482_v46, %v11951_v63 }
 0x2ab   : > { %10277 = vmatpush3.bf16.msra.mxu0 %v11056_v42  ;;  %v15307_v42 = vld [vmem:[#allocation81_spill] sm:$0xff] }
 0x2ac   : > { %10278 = vmatprep.subr.bf16.mxu0 %v15138_v36  ;;  %v6466_v27 = vcombine.low %v15307_v42, %v15306_v55  ;;  %v13938_v2 = vsel %vm3751_vm4, %v4255_v9, %v4258_v29  ;;  %v4262_v62 = vor.u32 %v4260_v24, %v4258_v29  ;;  %v15313_v42 = vld [vmem:[#allocation136_spill] sm:$0xff]  ;;  %v15314_v9 = vld [vmem:[#allocation113_spill] sm:$0xff] }
 0x2ad   : > { %v4151_v59 = vrot.slane %v15314_v9, %v11951_v63 }
 0x2ae   : > { %10211 = vmatmul.mubr.msk.bf16.gmra.mrb[4].mxu0 %vm2683_vm3, %v13891_v35  ;;  %v6480_v52 = vrot.slane %v6466_v27, %v11951_v63  ;;  %v13960_v55 = vsel %vm3751_vm4, %v4262_v62, %v4265_v1  ;;  %v4270_v27 = vshll.u32 %v15313_v42, 16  ;;  %v4274_v1 = vshrl.u32 %v15313_v42, 16 }
 0x2af   : > { %9871 = vmatmul.mubr.msk.bf16.gmra.mrb[44].mxu1 %vm2683_vm3, %v13894_v30  ;;  %10214 = vmatprep.mubr.msk.bf16.mxu0 %vm11352_vm2, %v15138_v36  ;;  %v4158_v26 = vrot.slane %v4151_v59, %v11951_v63  ;;  %v15322_v59 = vld [vmem:[#allocation101_spill] sm:$0xff] }
 0x2b0   : > { %9874 = vmatprep.mubr.msk.bf16.mxu1 %vm11352_vm2, %v15138_v36  ;;  %10279 = vmatpush3.bf16.msra.mxu0 %v11058_v8  ;;  %v7081_v8 = vrot.slane %v7079_v57, 1  ;;  %v6481_v39 = vcombine.low %v6473_v61, %v6480_v52  ;;  %v15315_v57 = vld [vmem:[#allocation93_spill] sm:$0xff]  ;;  %v15316_v61 = vld [vmem:[#allocation92_spill] sm:$0xff]  ;;  %v4272_v21 = vrot.slane %v4270_v27, 1  ;;  %v15321_v27 = vld [vmem:[#allocation102_spill] sm:$0xff] }
 0x2b1   : > { %10280 = vmatprep.subr.bf16.mxu0 %v15138_v36  ;;  %v6499_v52 = vcombine.low %v15316_v61, %v15315_v57  ;;  %v6517_v57 = vcombine.low %v15322_v59, %v15321_v27 }
 0x2b2   : > { %v13943_v15 = vsel %vm3751_vm4, %v7078_v6, %v7081_v8  ;;  %v7086_v16 = vshll.u32 %v6481_v39, 16  ;;  %v7085_v3 = vor.u32 %v7083_v50, %v7081_v8  ;;  %v15317_v6 = vld [vmem:[#allocation97_spill] sm:$0xff]  ;;  %v15318_v8 = vld [vmem:[#allocation94_spill] sm:$0xff]  ;;  %v7090_v38 = vshrl.u32 %v6481_v39, 16 }
 0x2b3   : > { %v6500_v24 = vcombine.low %v15318_v8, %v15317_v6  ;;  %v13983_v50 = vsel %vm3751_vm4, %v4269_v32, %v4272_v21  ;;  %v6531_v8 = vrot.slane %v6517_v57, %v11951_v63 }
 0x2b4   : > { %10281 = vmatpush3.bf16.msra.mxu0 %v11059_v33  ;;  %v15312_v33 = vld [vmem:[#allocation90_spill] sm:$0xff]  ;;  %v7088_v10 = vrot.slane %v7086_v16, 1  ;;  %v4278_v16 = vshll.u32 %v4158_v26, 16 }
 0x2b6   : > { %10215 = vmatmul.mubr.msk.bf16.gmra.mrb[8].mxu0 %vm2683_vm3, %v6447_v37  ;;  %v6483_v37 = vcombine.low %v15312_v33, %v15311_v0  ;;  %v13966_v29 = vsel %vm3751_vm4, %v7085_v3, %v7088_v10  ;;  %v6507_v0 = vrot.slane %v6499_v52, %v11951_v63  ;;  %v6514_v33 = vrot.slane %v6500_v24, %v11951_v63  ;;  %v15319_v3 = vld [vmem:[#allocation100_spill] sm:$0xff] }
 0x2b7   : > { %9875 = vmatmul.mubr.msk.bf16.gmra.mrb[48].mxu1 %vm2683_vm3, %v13918_v25  ;;  %10218 = vmatprep.mubr.msk.bf16.mxu0 %vm11352_vm2, %v15138_v36  ;;  %v4280_v42 = vrot.slane %v4278_v16, 1 }
 0x2b8   : > { %9878 = vmatprep.mubr.msk.bf16.mxu1 %vm11352_vm2, %v15138_v36  ;;  %v6497_v31 = vrot.slane %v6483_v37, %v11951_v63  ;;  %v7092_v37 = vor.u32 %v7090_v38, %v7088_v10  ;;  %v14000_v10 = vor.u32 %v4274_v1, %v4272_v21  ;;  %v15326_v1 = vld [vmem:[#allocation106_spill] sm:$0xff] }
 0x2ba   : > { %v4281_v26 = vsel %vm3751_vm4, %v14000_v10, %v4280_v42  ;;  %v15327_v42 = vld [vmem:[#allocation110_spill] sm:$0xff] }
 0x2be   : > { %10219 = vmatmul.mubr.msk.bf16.gmra.mrb[12].mxu0 %vm2683_vm3, %v6464_v13  ;;  %v6498_v13 = vcombine.low %v6490_v40, %v6497_v31  ;;  %v6515_v31 = vcombine.low %v6507_v0, %v6514_v33  ;;  %v15323_v0 = vld [vmem:[#allocation105_spill] sm:$0xff]  ;;  %v15324_v33 = vld [vmem:[#allocation103_spill] sm:$0xff] }
 0x2bf   : > { %9879 = vmatmul.mubr.msk.bf16.gmra.mrb[52].mxu1 %vm2683_vm3, %v13938_v2  ;;  %10222 = vmatprep.mubr.msk.bf16.mxu0 %vm11352_vm2, %v15138_v36  ;;  %v6533_v21 = vcombine.low %v15324_v33, %v15323_v0 }
 0x2c0   : > { %9882 = vmatprep.mubr.msk.bf16.mxu1 %vm11352_vm2, %v15138_v36  ;;  %v7093_v46 = vshll.u32 %v6498_v13, 16  ;;  %v7097_v61 = vshrl.u32 %v6498_v13, 16  ;;  %v7100_v52 = vshll.u32 %v6515_v31, 16 }
 0x2c2   : > { %v7095_v62 = vrot.slane %v7093_v46, 1  ;;  %v7102_v32 = vrot.slane %v7100_v52, 1 }
 0x2c4   : > { %v13987_v40 = vsel %vm3751_vm4, %v7092_v37, %v7095_v62  ;;  %v7099_v24 = vor.u32 %v7097_v61, %v7095_v62  ;;  %v15325_v37 = vld [vmem:[#allocation108_spill] sm:$0xff]  ;;  %v7104_v62 = vshrl.u32 %v6515_v31, 16  ;;  %v15328_v61 = vld [vmem:[#allocation109_spill] sm:$0xff] }
 0x2c5   : > { %v6550_v52 = vcombine.low %v15328_v61, %v15327_v42  ;;  %v11062_v61 = vld [vmem:[#allocation9 + $0x90] sm:$0xff]  }
 0x2c6   : > { %10223 = vmatmul.mubr.msk.bf16.gmra.mrb[16].mxu0 %vm2683_vm3, %v6481_v39  ;;  %v6516_v39 = vcombine.low %v15320_v48, %v15319_v3  ;;  %v14007_v38 = vsel %vm3751_vm4, %v7099_v24, %v7102_v32  ;;  %v6541_v3 = vrot.slane %v6533_v21, %v11951_v63 }
 0x2c7   : > { %9883 = vmatmul.mubr.msk.bf16.gmra.mrb[56].mxu1 %vm2683_vm3, %v13960_v55  ;;  %10226 = vmatprep.mubr.msk.bf16.mxu0 %vm11352_vm2, %v15138_v36  ;;  %v6558_v0 = vrot.slane %v6550_v52, %v11951_v63 }
 0x2c8   : > { %9886 = vmatprep.mubr.msk.bf16.mxu1 %vm11352_vm2, %v15138_v36  ;;  %v6524_v6 = vrot.slane %v6516_v39, %v11951_v63  ;;  %v7106_v39 = vor.u32 %v7104_v62, %v7102_v32  ;;  %v15331_v62 = vld [vmem:[#allocation119_spill] sm:$0xff] }
 0x2ca   : > { %v6532_v46 = vcombine.low %v6524_v6, %v6531_v8  ;;  %v15329_v6 = vld [vmem:[#allocation117_spill] sm:$0xff]  ;;  %v15330_v8 = vld [vmem:[#allocation112_spill] sm:$0xff] }
 0x2cb   : > { %v6551_v24 = vcombine.low %v15330_v8, %v15329_v6 }
 0x2cc   : > { %v7107_v16 = vshll.u32 %v6532_v46, 16 }
 0x2cd   : > { %v6565_v33 = vrot.slane %v6551_v24, %v11951_v63 }
 0x2ce   : > { %10227 = vmatmul.mubr.msk.bf16.gmra.mrb[20].mxu0 %vm2683_vm3, %v6498_v13  ;;  %v6534_v13 = vcombine.low %v15326_v1, %v15325_v37  ;;  %v7109_v27 = vrot.slane %v7107_v16, 1  ;;  %v11061_v1 = vld [vmem:[#allocation9 + $0x88] sm:$0xff]   ;;  %v15332_v16 = vld [vmem:[#allocation118_spill] sm:$0xff] }
 0x2cf   : > { %9887 = vmatmul.mubr.msk.bf16.gmra.mrb[60].mxu1 %vm2683_vm3, %v13983_v50  ;;  %10230 = vmatprep.mubr.msk.bf16.mxu0 %vm11352_vm2, %v15138_v36 }
 0x2d0   : > { %9890 = vmatprep.mubr.msk.bf16.mxu1 %vm11352_vm2, %v15138_v36  ;;  %v6548_v48 = vrot.slane %v6534_v13, %v11951_v63  ;;  %v14022_v59 = vsel %vm3751_vm4, %v7106_v39, %v7109_v27  ;;  %v6566_v13 = vcombine.low %v6558_v0, %v6565_v33  ;;  %v11063_v0 = vld [vmem:[#allocation9 + $0x98] sm:$0xff]   ;;  %v15337_v33 = vld [vmem:[#allocation131_spill] sm:$0xff] }
 0x2d2   : > { %v6549_v57 = vcombine.low %v6541_v3, %v6548_v48  ;;  %v15333_v3 = vld [vmem:[#allocation123_spill] sm:$0xff]  ;;  %v15334_v48 = vld [vmem:[#allocation120_spill] sm:$0xff]  ;;  %v7121_v42 = vshll.u32 %v6566_v13, 16 }
 0x2d3   : > { %v6568_v39 = vcombine.low %v15334_v48, %v15333_v3 }
 0x2d4   : > { %v7114_v32 = vshll.u32 %v6549_v57, 16  ;;  %v7123_v24 = vrot.slane %v7121_v42, 1 }
 0x2d5   : > { %v6582_v6 = vrot.slane %v6568_v39, %v11951_v63 }
 0x2d6   : > { %10231 = vmatmul.mubr.msk.bf16.gmra.mrb[24].mxu0 %vm2683_vm3, %v6515_v31  ;;  %v7111_v31 = vshrl.u32 %v6532_v46, 16  ;;  %v7116_v37 = vrot.slane %v7114_v32, 1  ;;  %v15336_v32 = vld [vmem:[#allocation126_spill] sm:$0xff] }
 0x2d7   : > { %9891 = vmatmul.mubr.msk.bf16.gmra.mrb[64].mxu1 %vm2683_vm3, %v4281_v26  ;;  %10234 = vmatprep.mubr.msk.bf16.mxu0 %vm11352_vm2, %v15138_v36  ;;  %v11060_v26 = vld [vmem:[#allocation9 + $0x80] sm:$0xff]  }
 0x2d8   : > { %9902 = vmatprep.mubr.msk.bf16.mxu1 %vm11352_vm2, %v15138_v36  ;;  %v7113_v21 = vor.u32 %v7111_v31, %v7109_v27  ;;  %v7118_v27 = vshrl.u32 %v6549_v57, 16  ;;  %v15335_v31 = vld [vmem:[#allocation127_spill] sm:$0xff] }
 0x2da   : > { %v7120_v8 = vor.u32 %v7118_v27, %v7116_v37 }
 0x2de   : > { %10235 = vmatmul.mubr.msk.bf16.gmra.mrb[28].mxu0 %vm2683_vm3, %v6532_v46  ;;  %v6567_v46 = vcombine.low %v15332_v16, %v15331_v62  ;;  %v15339_v62 = vld [vmem:[#allocation122_spill] sm:$0xff] }
 0x2df   : > { %9903 = vmatmul.mubr.msk.bf16.vlgmr.msra.gmra.mrb[0].mxu1 %vm2683_vm3, %v13705_v44  ;;  %10238 = vmatprep.mubr.msk.bf16.mxu0 %vm11352_vm2, %v15138_v36  ;;  %v14039_v44 = vsel %vm3751_vm4, %v7113_v21, %v7116_v37  ;;  %v15338_v21 = vld [vmem:[#allocation128_spill] sm:$0xff]  ;;  %v4569_v16 = vcombine.low %v15314_v9, %v15339_v62  ;;  %v7125_v37 = vshrl.u32 %v6566_v13, 16 }
 0x2e0   : > { %9906 = vmatprep.mubr.msk.bf16.mxu1 %vm11352_vm2, %v15138_v36  ;;  %10354 = vmatpush3.bf16.msra.mxu1 %v11060_v26  ;;  %v6575_v52 = vrot.slane %v6567_v46, %v11951_v63  ;;  %v6584_v26 = vcombine.low %v15336_v32, %v15335_v31  ;;  %v15342_v31 = vld [vmem:[#allocation38_spill] sm:$0xff] }
 0x2e1   : > { %10351 = vmatprep.subr.bf16.mxu1 %v15138_v36  ;;  %v14075_v39 = vrot.slane %v4569_v16, %v11951_v63  ;;  %v7127_v27 = vor.u32 %v7125_v37, %v7123_v24  ;;  %v4618_v32 = vcombine.low %v15342_v31, %v13463_v11 }
 0x2e2   : > { %v6592_v3 = vrot.slane %v6584_v26, %v11951_v63 }
 0x2e4   : > { %10355 = vmatpush3.bf16.msra.mxu1 %v11061_v1  ;;  %v6585_v1 = vcombine.low %v15338_v21, %v15337_v33  ;;  %v15344_v33 = vld [vmem:[#allocation132_spill] sm:$0xff]  ;;  %v15345_v21 = vld [vmem:[#allocation134_spill] sm:$0xff] }
 0x2e5   : > { %10352 = vmatprep.subr.bf16.mxu1 %v15138_v36 }
 0x2e6   : > { %10239 = vmatmul.mubr.msk.bf16.gmra.mrb[32].mxu0 %vm2683_vm3, %v6549_v57  ;;  %v6583_v57 = vcombine.low %v6575_v52, %v6582_v6  ;;  %v6599_v48 = vrot.slane %v6585_v1, %v11951_v63  ;;  %v15340_v52 = vld [vmem:[#allocation36_spill] sm:$0xff]  ;;  %v15341_v6 = vld [vmem:[#allocation114_spill] sm:$0xff]  ;;  %v6602_v1 = vcombine.low %v15345_v21, %v14075_v39 }
 0x2e7   : > { %9907 = vmatmul.mubr.msk.bf16.gmra.mrb[4].mxu1 %vm2683_vm3, %v13726_v28  ;;  %10242 = vmatprep.mubr.msk.bf16.mxu0 %vm11352_vm2, %v15138_v36  ;;  %v14057_v28 = vsel %vm3751_vm4, %v7120_v8, %v7123_v24  ;;  %v4571_v8 = vcombine.low %v15341_v6, %v15340_v52 }
 0x2e8   : > { %9910 = vmatprep.mubr.msk.bf16.mxu1 %vm11352_vm2, %v15138_v36  ;;  %10356 = vmatpush3.bf16.msra.mxu1 %v11062_v61  ;;  %v7128_v46 = vshll.u32 %v6583_v57, 16  ;;  %v6600_v26 = vcombine.low %v6592_v3, %v6599_v48  ;;  %v14109_v3 = vrot.slane %v4618_v32, %v11951_v63  ;;  %v6616_v48 = vrot.slane %v6602_v1, %v11951_v63 }
 0x2e9   : > { %10353 = vmatprep.subr.bf16.mxu1 %v15138_v36  ;;  %v14103_v37 = vrot.slane %v4571_v8, %v11951_v63  ;;  %v1731_v1 = vcombine.high %v13729_v54, %v13729_v54 }
 0x2ea   : > { %v7130_v42 = vrot.slane %v7128_v46, 1 }
 0x2ec   : > { %10357 = vmatpush3.bf16.msra.mxu1 %v11063_v0  ;;  %v14078_v61 = vsel %vm3751_vm4, %v7127_v27, %v7130_v42  ;;  %v15343_v0 = vld [vmem:[#allocation133_spill] sm:$0xff] }
 0x2ed   : > { %v6601_v24 = vcombine.low %v15344_v33, %v15343_v0  ;;  %v6635_v0 = vcombine.low %v13472_v5, %v13514_v45  ;;  %v7139_v33 = vshrl.u32 %v6600_v26, 16 }
 0x2ee   : > { %10243 = vmatmul.mubr.msk.bf16.gmra.mrb[36].mxu0 %vm2683_vm3, %v6566_v13  ;;  %v9269_v13 = vcombine.high %v15341_v6, %v15340_v52 }
 0x2ef   : > { %9911 = vmatmul.mubr.msk.bf16.gmra.mrb[8].mxu1 %vm2683_vm3, %v13751_v4  ;;  %10246 = vmatprep.mubr.msk.bf16.mxu0 %vm11352_vm2, %v15138_v36  ;;  %v9268_v4 = vcombine.high %v15314_v9, %v15339_v62  ;;  %v7132_v9 = vshrl.u32 %v6583_v57, 16  ;;  %v7135_v62 = vshll.u32 %v6600_v26, 16 }
 0x2f0   : > { %9914 = vmatprep.mubr.msk.bf16.mxu1 %vm11352_vm2, %v15138_v36  ;;  %v14106_v46 = vrot.slane %v9269_v13, %v11951_v63 }
 0x2f1   : > { %v14100_v16 = vrot.slane %v9268_v4, %v11951_v63  ;;  %v7134_v27 = vor.u32 %v7132_v9, %v7130_v42  ;;  %v7137_v52 = vrot.slane %v7135_v62, 1  ;;  %v4620_v4 = vcombine.low %v13466_v22, %v13469_v23 }
 0x2f2   : > { %v6619_v13 = vcombine.low %v14106_v46, %v14109_v3  ;;  %v9271_v42 = vcombine.high %v13466_v22, %v13469_v23  ;;  %v1707_v22 = vcombine.high %v13514_v45, %v13514_v45  ;;  %v1708_v23 = vcombine.high %v13723_v58, %v13723_v58 }
 0x2f3   : > { %v14118_v6 = vsel %vm3751_vm4, %v7134_v27, %v7137_v52  ;;  %v6618_v8 = vcombine.low %v14100_v16, %v14103_v37  ;;  %v1732_v9 = vcombine.high %v13732_v7, %v13732_v7  ;;  %v6642_v45 = vrot.slane %v6635_v0, %v11951_v63 }
 0x2f4   : > { %v6633_v21 = vrot.slane %v6619_v13, %v11951_v63  ;;  %v14152_v62 = vrot.slane %v9271_v42, %v11951_v63  ;;  %v6660_v27 = vcombine.low %v13723_v58, %v1707_v22 }
 0x2f5   : > { %v6663_v13 = vcombine.low %v1732_v9, %v13758_v34 }
 0x2f6   : > { %10247 = vmatmul.mubr.msk.bf16.gmra.mrb[40].mxu0 %vm2683_vm3, %v6583_v57  ;;  %v9270_v57 = vcombine.high %v15342_v31, %v13463_v11  ;;  %v14135_v31 = vrot.slane %v4620_v4, %v11951_v63  ;;  %v6644_v14 = vcombine.low %v14152_v62, %v6642_v45 }
 0x2f7   : > { %9915 = vmatmul.mubr.msk.bf16.gmra.mrb[12].mxu1 %vm2683_vm3, %v13789_v56  ;;  %10250 = vmatprep.mubr.msk.bf16.mxu0 %vm11352_vm2, %v15138_v36  ;;  %v6609_v56 = vrot.slane %v6601_v24, %v11951_v63  ;;  %v6626_v24 = vrot.slane %v6618_v8, %v11951_v63  ;;  %v6662_v8 = vcombine.low %v13732_v7, %v1731_v1 }
 0x2f8   : > { %9918 = vmatprep.mubr.msk.bf16.mxu1 %vm11352_vm2, %v15138_v36  ;;  %v14132_v11 = vrot.slane %v9270_v57, %v11951_v63  ;;  %v6661_v57 = vcombine.low %v1708_v23, %v13729_v54  ;;  %v6670_v54 = vrot.slane %v6660_v27, %v11951_v63 }
 0x2f9   : > { %v6617_v32 = vcombine.low %v6609_v56, %v6616_v48  ;;  %v7141_v56 = vor.u32 %v7139_v33, %v7137_v52  ;;  %v6634_v42 = vcombine.low %v6626_v24, %v6633_v21  ;;  %v1780_v52 = vcombine.high %v13769_v12, %v13769_v12 }
 0x2fa   : > { %v6677_v7 = vrot.slane %v6661_v57, %v11951_v63  ;;  %v6684_v23 = vrot.slane %v6662_v8, %v11951_v63  ;;  %v6691_v33 = vrot.slane %v6663_v13, %v11951_v63  ;;  %v6658_v24 = vrot.slane %v6644_v14, %v11951_v63 }
 0x2fb   : > { %v7146_v0 = vshrl.u32 %v6617_v32, 16  ;;  %v7149_v22 = vshll.u32 %v6634_v42, 16  ;;  %v1779_v21 = vcombine.high %v13766_v17, %v13766_v17  ;;  %v7153_v14 = vshrl.u32 %v6634_v42, 16 }
 0x2fc   : > { %v6692_v45 = vcombine.low %v6670_v54, %v6677_v7 }
 0x2fd   : > { %v7151_v9 = vrot.slane %v7149_v22, 1  ;;  %v6711_v8 = vcombine.low %v13769_v12, %v1779_v21 }
 0x2fe   : > { %10251 = vmatmul.mubr.msk.bf16.gmra.mrb[44].mxu0 %vm2683_vm3, %v6600_v26  ;;  %v6643_v26 = vcombine.low %v14132_v11, %v14135_v31 }
 0x2ff   : > { %9919 = vmatmul.mubr.msk.bf16.gmra.mrb[16].mxu1 %vm2683_vm3, %v13809_v41  ;;  %10254 = vmatprep.mubr.msk.bf16.mxu0 %vm11352_vm2, %v15138_v36  ;;  %v7142_v41 = vshll.u32 %v6617_v32, 16  ;;  %v6733_v13 = vrot.slane %v6711_v8, %v11951_v63 }
 0x300   : > { %9922 = vmatprep.mubr.msk.bf16.mxu1 %vm11352_vm2, %v15138_v36  ;;  %v6651_v58 = vrot.slane %v6643_v26, %v11951_v63 }
 0x301   : > { %v7144_v48 = vrot.slane %v7142_v41, 1  ;;  %v1756_v41 = vcombine.high %v13761_v49, %v13761_v49 }
 0x302   : > { %v6659_v57 = vcombine.low %v6651_v58, %v6658_v24 }
 0x303   : > { %v14160_v4 = vsel %vm3751_vm4, %v7141_v56, %v7144_v48  ;;  %v7148_v1 = vor.u32 %v7146_v0, %v7144_v48  ;;  %v6693_v56 = vcombine.low %v6684_v23, %v6691_v33  ;;  %v6710_v27 = vcombine.low %v1756_v41, %v13766_v17 }
 0x304   : > { %v6700_v17 = vrot.slane %v6692_v45, %v11951_v63  ;;  %v7160_v22 = vshrl.u32 %v6659_v57, 16 }
 0x305   : > { %v6726_v12 = vrot.slane %v6710_v27, %v11951_v63  ;;  %v7065_v27 = vshll.u32 %v13891_v35, 16 }
 0x306   : > { %10255 = vmatmul.mubr.msk.bf16.gmra.mrb[48].mxu0 %vm2683_vm3, %v6617_v32  ;;  %v14187_v32 = vsel %vm3751_vm4, %v7148_v1, %v7151_v9 }
 0x307   : > { %9923 = vmatmul.mubr.msk.bf16.gmra.mrb[20].mxu1 %vm2683_vm3, %v13825_v43  ;;  %10258 = vmatprep.mubr.msk.bf16.mxu0 %vm11352_vm2, %v15138_v36  ;;  %v1755_v43 = vcombine.high %v13758_v34, %v13758_v34  ;;  %v6712_v34 = vcombine.low %v1780_v52, %v13822_v19  ;;  %v6707_v19 = vrot.slane %v6693_v56, %v11951_v63  ;;  %v7067_v8 = vrot.slane %v7065_v27, 1 }
 0x308   : > { %9926 = vmatprep.mubr.msk.bf16.mxu1 %vm11352_vm2, %v15138_v36  ;;  %v7155_v52 = vor.u32 %v7153_v14, %v7151_v9 }
 0x309   : > { %v6709_v26 = vcombine.low %v13761_v49, %v1755_v43  ;;  %v7156_v49 = vshll.u32 %v6659_v57, 16  ;;  %v6708_v7 = vcombine.low %v6700_v17, %v6707_v19 }
 0x30b   : > { %v6719_v48 = vrot.slane %v6709_v26, %v11951_v63  ;;  %v7158_v58 = vrot.slane %v7156_v49, 1  ;;  %v7163_v23 = vshll.u32 %v6708_v7, 16  ;;  %v7167_v9 = vshrl.u32 %v6708_v7, 16 }
 0x30c   : > { %v7069_v49 = vshrl.u32 %v13891_v35, 16  ;;  %v4601_v35 = vcombine.low %v14075_v39, %v14100_v16  ;;  %v4650_v39 = vcombine.low %v14109_v3, %v14132_v11  ;;  %v4651_v16 = vcombine.low %v14135_v31, %v14152_v62 }
 0x30d   : > { %v14207_v54 = vsel %vm3751_vm4, %v7155_v52, %v7158_v58  ;;  %v7162_v41 = vor.u32 %v7160_v22, %v7158_v58  ;;  %v7165_v24 = vrot.slane %v7163_v23, 1 }
 0x30e   : > { %10259 = vmatmul.mubr.msk.bf16.gmra.mrb[52].mxu0 %vm2683_vm3, %v6634_v42  ;;  %v6741_v42 = vcombine.low %v6719_v48, %v6726_v12  ;;  %v4609_v19 = vrot.slane %v4601_v35, %v11951_v63  ;;  %v4673_v48 = vrot.slane %v13472_v5, %v11951_v63 }
 0x30f   : > { %9927 = vmatmul.mubr.msk.bf16.gmra.mrb[24].mxu1 %vm2683_vm3, %v13845_v53  ;;  %10262 = vmatprep.mubr.msk.bf16.mxu0 %vm11352_vm2, %v15138_v36  ;;  %v6740_v53 = vrot.slane %v6712_v34, %v11951_v63  ;;  %v14219_v21 = vsel %vm3751_vm4, %v7162_v41, %v7165_v24  ;;  %v7169_v56 = vor.u32 %v7167_v9, %v7165_v24  ;;  %v7059_v34 = vshrl.u32 %v13636_v60, 16 }
 0x310   : > { %9930 = vmatprep.mubr.msk.bf16.mxu1 %vm11352_vm2, %v15138_v36  ;;  %v6749_v33 = vrot.slane %v6741_v42, %v11951_v63 }
 0x311   : > { %v6742_v0 = vcombine.low %v6733_v13, %v6740_v53 }
 0x313   : > { %v6756_v43 = vrot.slane %v6742_v0, %v11951_v63 }
 0x315   : > { %v14221_v1 = vcombine.low %v6749_v33, %v6756_v43 }
 0x316   : > { %10263 = vmatmul.mubr.msk.bf16.gmra.mrb[56].mxu0 %vm2683_vm3, %v6659_v57 }
 0x317   : > { %9931 = vmatmul.mubr.msk.bf16.gmra.mrb[28].mxu1 %vm2683_vm3, %v13856_v18  ;;  %10266 = vmatprep.mubr.msk.bf16.mxu0 %vm11352_vm2, %v15138_v36  ;;  %v7061_v18 = vshll.u32 %v13636_v60, 16  ;;  %v7170_v45 = vshll.u32 %v14221_v1, 16 }
 0x318   : > { %9934 = vmatprep.mubr.msk.bf16.mxu1 %vm11352_vm2, %v15138_v36 }
 0x319   : > { %v14232_v26 = vrot.slane %v7170_v45, 1  ;;  %v7063_v57 = vrot.slane %v7061_v18, 1 }
 0x31b   : > { %v7064_v14 = vor.u32 %v7063_v57, %v7059_v34 }
 0x31d   : > { %v7068_v60 = vsel %vm3751_vm4, %v7064_v14, %v7067_v8 }
 0x31e   : > { %10267 = vmatmul.mubr.msk.bf16.gmra.mrb[60].mxu0 %vm2683_vm3, %v6708_v7  ;;  %v15352_v7 = vld [vmem:[#allocation47_spill] sm:$0xff] }
 0x31f   : > { %9935 = vmatmul.mubr.msk.bf16.gmra.mrb[32].mxu1 %vm2683_vm3, %v13872_v51  ;;  %10270 = vmatprep.mubr.msk.bf16.mxu0 %vm11352_vm2, %v15138_v36  ;;  %v14238_v51 = vsel %vm3751_vm4, %v7169_v56, %v14232_v26 }
 0x320   : > { %9938 = vmatprep.mubr.msk.bf16.mxu1 %vm11352_vm2, %v15138_v36 }
 0x326   : > { %10271 = vmatmul.mubr.msk.bf16.gmra.mrb[64].mxu0 %vm2683_vm3, %v14221_v1 }
 0x327   : > { %9939 = vmatmul.mubr.msk.bf16.gmra.mrb[36].mxu1 %vm2683_vm3, %v13894_v30  ;;  %10282 = vmatprep.mubr.msk.bf16.mxu0 %vm11352_vm2, %v15138_v36  ;;  %v7071_v30 = vor.u32 %v7069_v49, %v7067_v8 }
 0x328   : > { %9942 = vmatprep.mubr.msk.bf16.mxu1 %vm11352_vm2, %v15138_v36 }
 0x329   : > { %v7075_v17 = vsel %vm3751_vm4, %v7071_v30, %v13932_v47 }
 0x32e   : > { %10283 = vmatmul.mubr.msk.bf16.vlgmr.msra.gmra.mrb[0].mxu0 %vm2683_vm3, %v7068_v60 }
 0x32f   : > { %9943 = vmatmul.mubr.msk.bf16.gmra.mrb[40].mxu1 %vm2683_vm3, %v13918_v25  ;;  %10286 = vmatprep.mubr.msk.bf16.mxu0 %vm11352_vm2, %v15138_v36  ;;  %v4602_v25 = vcombine.low %v14103_v37, %v14106_v46  ;;  %v4658_v46 = vrot.slane %v4650_v39, %v11951_v63 }
 0x330   : > { %9946 = vmatprep.mubr.msk.bf16.mxu1 %vm11352_vm2, %v15138_v36 }
 0x331   : > { %v4616_v47 = vrot.slane %v4602_v25, %v11951_v63 }
 0x336   : > { %10287 = vmatmul.mubr.msk.bf16.gmra.mrb[4].mxu0 %vm2683_vm3, %v7075_v17 }
 0x337   : > { %9947 = vmatmul.mubr.msk.bf16.gmra.mrb[44].mxu1 %vm2683_vm3, %v13938_v2  ;;  %10290 = vmatprep.mubr.msk.bf16.mxu0 %vm11352_vm2, %v15138_v36  ;;  %v4617_v2 = vcombine.low %v4609_v19, %v4616_v47 }
 0x338   : > { %9950 = vmatprep.mubr.msk.bf16.mxu1 %vm11352_vm2, %v15138_v36 }
 0x339   : > { %v4682_v37 = vshll.u32 %v4617_v2, 16  ;;  %v4686_v31 = vshrl.u32 %v4617_v2, 16 }
 0x33e   : > { %10291 = vmatmul.mubr.msk.bf16.gmra.mrb[8].mxu0 %vm2683_vm3, %v13943_v15  ;;  %v4665_v15 = vrot.slane %v4651_v16, %v11951_v63 }
 0x33f   : > { %9951 = vmatmul.mubr.msk.bf16.gmra.mrb[48].mxu1 %vm2683_vm3, %v13960_v55  ;;  %10294 = vmatprep.mubr.msk.bf16.mxu0 %vm11352_vm2, %v15138_v36  ;;  %v4684_v55 = vrot.slane %v4682_v37, 1 }
 0x340   : > { %9954 = vmatprep.mubr.msk.bf16.mxu1 %vm11352_vm2, %v15138_v36  ;;  %v4666_v3 = vcombine.low %v4658_v46, %v4665_v15 }
 0x341   : > { %v4685_v11 = vsel %vm3751_vm4, %v14000_v10, %v4684_v55  ;;  %v4680_v10 = vrot.slane %v4673_v48, %v11951_v63 }
 0x342   : > { %v4690_v62 = vshll.u32 %v4666_v3, 16  ;;  %v4694_v13 = vshrl.u32 %v4666_v3, 16 }
 0x343   : > { %v4698_v53 = vshll.u32 %v4680_v10, 16 }
 0x346   : > { %10295 = vmatmul.mubr.msk.bf16.gmra.mrb[12].mxu0 %vm2683_vm3, %v13966_v29  ;;  %v4688_v29 = vor.u32 %v4686_v31, %v4684_v55  ;;  %v11354_v31 = vmov 1983009808  }
 0x347   : > { %9955 = vmatmul.mubr.msk.bf16.gmra.mrb[52].mxu1 %vm2683_vm3, %v13983_v50  ;;  %10298 = vmatprep.mubr.msk.bf16.mxu0 %vm11352_vm2, %v15138_v36  ;;  %v4692_v50 = vrot.slane %v4690_v62, 1  ;;  %v7612_v62 = vunpack.c.l.s4 %v11354_v31 }
 0x348   : > { %9958 = vmatprep.mubr.msk.bf16.mxu1 %vm11352_vm2, %v15138_v36 }
 0x349   : > { %v4693_v12 = vsel %vm3751_vm4, %v4688_v29, %v4692_v50  ;;  %v4696_v5 = vor.u32 %v4694_v13, %v4692_v50  ;;  %v14426_v29 = vld [vmem:[%s15353_s20] ss:$0 sm:$0xff]  ;;  %v7613_v10 = vunpack.c.0.s8 %v7612_v62 }
 0x34a   : > { %v14431_v13 = vld [vmem:[%s15354_s24] ss:$0 sm:$0xff]  ;;  %s14784_s24 = scalar_lea.sflag [#allocation5], %s359_s1 }
 0x34e   : > { %10299 = vmatmul.mubr.msk.bf16.gmra.mrb[16].mxu0 %vm2683_vm3, %v13987_v40  ;;  %v4700_v40 = vrot.slane %v4698_v53, 1 }
 0x34f   : > { %9959 = vmatmul.mubr.msk.bf16.gmra.mrb[56].mxu1 %vm2683_vm3, %v4685_v11  ;;  %10302 = vmatprep.mubr.msk.bf16.mxu0 %vm11352_vm2, %v15138_v36 }
 0x350   : > { %9962 = vmatprep.mubr.msk.bf16.mxu1 %vm11352_vm2, %v15138_v36  ;;  %v4701_v52 = vsel %vm3751_vm4, %v4696_v5, %v4700_v40 }
 0x356   : > { %10303 = vmatmul.mubr.msk.bf16.gmra.mrb[20].mxu0 %vm2683_vm3, %v14007_v38  ;;  %v15346_v38 = vld [vmem:[#allocation137_spill] sm:$0xff] }
 0x357   : > { %9963 = vmatmul.mubr.msk.bf16.gmra.mrb[60].mxu1 %vm2683_vm3, %v4693_v12  ;;  %10306 = vmatprep.mubr.msk.bf16.mxu0 %vm11352_vm2, %v15138_v36 }
 0x358   : > { %9966 = vmatprep.mubr.msk.bf16.mxu1 %vm11352_vm2, %v15138_v36 }
 0x35e   : > { %10307 = vmatmul.mubr.msk.bf16.gmra.mrb[24].mxu0 %vm2683_vm3, %v14022_v59  ;;  %v15347_v59 = vld [vmem:[#allocation138_spill] sm:$0xff] }
 0x35f   : > { %9967 = vmatmul.mubr.msk.bf16.gmra.mrb[64].mxu1 %vm2683_vm3, %v4701_v52  ;;  %10310 = vmatprep.mubr.msk.bf16.mxu0 %vm11352_vm2, %v15138_v36 }
 0x360   : > { %10014 = vmatprep.mubr.msk.bf16.mxu1 %vm11352_vm2, %v15138_v36 }
 0x366   : > { %10311 = vmatmul.mubr.msk.bf16.gmra.mrb[28].mxu0 %vm2683_vm3, %v14039_v44  ;;  %v15348_v44 = vld [vmem:[#allocation37_spill] sm:$0xff] }
 0x367   : > { %10015 = vmatmul.mubr.msk.bf16.vlgmr.msra.gmra.mrb[36].mxu1 %vm2683_vm3, %v15346_v38  ;;  %10314 = vmatprep.mubr.msk.bf16.mxu0 %vm11352_vm2, %v15138_v36 }
 0x368   : > { %10018 = vmatprep.mubr.msk.bf16.mxu1 %vm11352_vm2, %v15138_v36 }
 0x36e   : > { %10315 = vmatmul.mubr.msk.bf16.gmra.mrb[32].mxu0 %vm2683_vm3, %v14057_v28  ;;  %v15349_v28 = vld [vmem:[#allocation35_spill] sm:$0xff] }
 0x36f   : > { %10019 = vmatmul.mubr.msk.bf16.gmra.mrb[40].mxu1 %vm2683_vm3, %v15347_v59  ;;  %10318 = vmatprep.mubr.msk.bf16.mxu0 %vm11352_vm2, %v15138_v36  ;;  %v15356_v59 = vld [vmem:[#allocation31_spill] sm:$0xff] }
 0x370   : > { %10022 = vmatprep.mubr.msk.bf16.mxu1 %vm11352_vm2, %v15138_v36 }
 0x376   : > { %10319 = vmatmul.mubr.msk.bf16.gmra.mrb[36].mxu0 %vm2683_vm3, %v14078_v61  ;;  %v15350_v61 = vld [vmem:[#allocation111_spill] sm:$0xff] }
 0x377   : > { %10023 = vmatmul.mubr.msk.bf16.gmra.mrb[44].mxu1 %vm2683_vm3, %v15348_v44  ;;  %10322 = vmatprep.mubr.msk.bf16.mxu0 %vm11352_vm2, %v15138_v36  ;;  %v14436_v44 = vsub.s32 %v7613_v10, %v15356_v59 }
 0x378   : > { %10026 = vmatprep.mubr.msk.bf16.mxu1 %vm11352_vm2, %v15138_v36 }
 0x37e   : > { %10323 = vmatmul.mubr.msk.bf16.gmra.mrb[40].mxu0 %vm2683_vm3, %v14118_v6  ;;  %v15351_v6 = vld [vmem:[#allocation41_spill] sm:$0xff] }
 0x37f   : > { %10027 = vmatmul.mubr.msk.bf16.gmra.mrb[48].mxu1 %vm2683_vm3, %v15349_v28  ;;  %10326 = vmatprep.mubr.msk.bf16.mxu0 %vm11352_vm2, %v15138_v36 }
 0x380   : > { %10030 = vmatprep.mubr.msk.bf16.mxu1 %vm11352_vm2, %v15138_v36 }
 0x386   : > { %10327 = vmatmul.mubr.msk.bf16.gmra.mrb[44].mxu0 %vm2683_vm3, %v14160_v4  ;;  %v9172_v4 = vld.sshfl [vmem:[#allocation2 + $0xdc] sm:$0x33 pattern:$0x75316420] }
 0x387   : > { %10031 = vmatmul.mubr.msk.bf16.gmra.mrb[52].mxu1 %vm2683_vm3, %v15350_v61  ;;  %10330 = vmatprep.mubr.msk.bf16.mxu0 %vm11352_vm2, %v15138_v36 }
 0x388   : > { %10034 = vmatprep.mubr.msk.bf16.mxu1 %vm11352_vm2, %v15138_v36 }
 0x38e   : > { %10331 = vmatmul.mubr.msk.bf16.gmra.mrb[48].mxu0 %vm2683_vm3, %v14187_v32  ;;  %v1808_v32 = vrot.slane %v9172_v4, %v11951_v63 }
 0x38f   : > { %10035 = vmatmul.mubr.msk.bf16.gmra.mrb[56].mxu1 %vm2683_vm3, %v15351_v6  ;;  %10334 = vmatprep.mubr.msk.bf16.mxu0 %vm11352_vm2, %v15138_v36 }
 0x390   : > { %10038 = vmatprep.mubr.msk.bf16.mxu1 %vm11352_vm2, %v15138_v36  ;;  %v7051_v58 = vrot.slane %v1808_v32, %v11951_v63 }
 0x396   : > { %10335 = vmatmul.mubr.msk.bf16.gmra.mrb[52].mxu0 %vm2683_vm3, %v14207_v54  ;;  %v7174_v54 = vshrl.u32 %v14221_v1, 16 }
 0x397   : > { %10039 = vmatmul.mubr.msk.bf16.gmra.mrb[60].mxu1 %vm2683_vm3, %v13492_v20  ;;  %10338 = vmatprep.mubr.msk.bf16.mxu0 %vm11352_vm2, %v15138_v36  ;;  %v7058_v20 = vrot.slane %v7051_v58, %v11951_v63 }
 0x398   : > { %10042 = vmatprep.mubr.msk.bf16.mxu1 %vm11352_vm2, %v15138_v36  ;;  %v7176_v0 = vor.u32 %v7174_v54, %v14232_v26 }
 0x399   : > { %v7178_v42 = vshll.u32 %v7058_v20, 16 }
 0x39b   : > { %v7180_v22 = vrot.slane %v7178_v42, 1 }
 0x39d   : > { %v7181_v23 = vsel %vm3751_vm4, %v7176_v0, %v7180_v22 }
 0x39e   : > { %10339 = vmatmul.mubr.msk.bf16.gmra.mrb[56].mxu0 %vm2683_vm3, %v14219_v21 }
 0x39f   : > { %10043 = vmatmul.mubr.msk.bf16.gmra.mrb[64].mxu1 %vm2683_vm3, %v15352_v7  ;;  %10342 = vmatprep.mubr.msk.bf16.mxu0 %vm11352_vm2, %v15138_v36 }
 0x3a6   : > { %10343 = vmatmul.mubr.msk.bf16.gmra.mrb[60].mxu0 %vm2683_vm3, %v14238_v51 }
 0x3a7   : > { %10346 = vmatprep.mubr.msk.bf16.mxu0 %vm11352_vm2, %v15138_v36 }
 0x3ae   : > { %10347 = vmatmul.mubr.msk.bf16.gmra.mrb[64].mxu0 %vm2683_vm3, %v7181_v23 }
 0x3b2   : > { %v4769_v33 = vpop.f32.mrb[0].mxu1 }
 0x3b3   : > { %v9904_v43 = vpop.f32.mrb[1].mxu1 }
 0x3b4   : > { %v4772_v41 = vpop.f32.mrb[2].mxu1 }
 0x3b5   : > { %v9905_v63 = vpop.f32.mrb[3].mxu1 }
 0x3ba   : > { %v4777_v24 = vpop.f32.mrb[4].mxu1 }
 0x3bb   : > { %v9908_v21 = vpop.f32.mrb[5].mxu1 }
 0x3bc   : > { %v4780_v1 = vpop.f32.mrb[6].mxu1 }
 0x3bd   : > { %v9909_v18 = vpop.f32.mrb[7].mxu1 }
 0x3c2   : > { %v14395_v9 = vpop.f32.mrb[8].mxu1 }
 0x3c3   : > { %v9912_v45 = vpop.f32.mrb[9].mxu1 }
 0x3c4   : > { %v14397_v56 = vpop.f32.mrb[10].mxu1 }
 0x3c5   : > { %v9913_v36 = vpop.f32.mrb[11].mxu1 }
 0x3ca   : > { %v14399_v26 = vpop.f32.mrb[12].mxu1 }
 0x3cb   : > { %v9916_v27 = vpop.f32.mrb[13].mxu1 }
 0x3cc   : > { %v14401_v34 = vpop.f32.mrb[14].mxu1 }
 0x3cd   : > { %v9917_v57 = vpop.f32.mrb[15].mxu1 }
 0x3d2   : > { %v14403_v51 = vpop.f32.mrb[16].mxu1 }
 0x3d3   : > { %v9920_v8 = vpop.f32.mrb[17].mxu1 }
 0x3d4   : > { %v14405_v14 = vpop.f32.mrb[18].mxu1 }
 0x3d5   : > { %v9921_v60 = vpop.f32.mrb[19].mxu1 }
 0x3da   : > { %v14407_v49 = vpop.f32.mrb[20].mxu1 }
 0x3db   : > { %v9924_v30 = vpop.f32.mrb[21].mxu1 }
 0x3dc   : > { %v14409_v17 = vpop.f32.mrb[22].mxu1 }
 0x3dd   : > { %v9925_v35 = vpop.f32.mrb[23].mxu1 }
 0x3e2   : > { %v14411_v25 = vpop.f32.mrb[24].mxu1 }
 0x3e3   : > { %v9928_v19 = vpop.f32.mrb[25].mxu1 }
 0x3e4   : > { %v14413_v47 = vpop.f32.mrb[26].mxu1 }
 0x3e5   : > { %v9929_v2 = vpop.f32.mrb[27].mxu1 }
 0x3ea   : > { %v14415_v39 = vpop.f32.mrb[28].mxu1 }
 0x3eb   : > { %v9932_v16 = vpop.f32.mrb[29].mxu1 }
 0x3ec   : > { %v14417_v37 = vpop.f32.mrb[30].mxu1 }
 0x3ed   : > { %v9933_v46 = vpop.f32.mrb[31].mxu1 }
 0x3f2   : > { %v14419_v15 = vpop.f32.mrb[32].mxu1 }
 0x3f3   : > { %v9936_v55 = vpop.f32.mrb[33].mxu1 }
 0x3f4   : > { %v14421_v3 = vpop.f32.mrb[34].mxu1 }
 0x3f5   : > { %v9937_v11 = vpop.f32.mrb[35].mxu1 }
 0x401   : > { %v7291_v48 = vpop.f32.mrb[0].mxu0 }
 0x402   : > { %v10358_v50 = vadd.f32 %v7291_v48, %v4769_v33  ;;  %v10284_v12 = vpop.f32.mrb[1].mxu0 }
 0x403   : > { %v7294_v53 = vpop.f32.mrb[2].mxu0 }
 0x404   : > { %v7467_v5 = vmul.f32 %v10358_v50, %v14426_v29  ;;  %v10359_v40 = vadd.f32 %v7294_v53, %v4772_v41  ;;  %v10285_v52 = vpop.f32.mrb[3].mxu0 }
 0x406   : > { %v7508_v38 = vadd.f32 %v14431_v13, %v7467_v5  ;;  %v7468_v28 = vmul.f32 %v10359_v40, %v14426_v29 }
 0x408   : > { %v7542_v61 = vmax.f32 %v7508_v38, 0.0  ;;  %v7509_v6 = vadd.f32 %v14431_v13, %v7468_v28 }
 0x409   : > { %v7299_v4 = vpop.f32.mrb[4].mxu0 }
 0x40a   : > { %v7610_v32 = vcombine.high %v7542_v61, %v7542_v61  ;;  %v7617_v58 = vrot.slane %v7542_v61, %v14436_v44  ;;  %v7543_v7 = vmax.f32 %v7509_v6, 0.0  ;;  %v10360_v20 = vadd.f32 %v7299_v4, %v4777_v24  ;;  %v10288_v54 = vpop.f32.mrb[5].mxu0 }
 0x40b   : > { %v7302_v42 = vpop.f32.mrb[6].mxu0 }
 0x40c   : > { %v7624_v0 = vrot.slane %v7610_v32, %v14436_v44  ;;  %v7625_v22 = vcombine.high %v7617_v58, %v7617_v58  ;;  %v7627_v23 = vcombine.high %v7543_v7, %v7543_v7  ;;  %v7634_v33 = vrot.slane %v7543_v7, %v14436_v44  ;;  %v10289_v43 = vpop.f32.mrb[7].mxu0 }
 0x40d   : > { %v7469_v41 = vmul.f32 %v10360_v20, %v14426_v29  ;;  %v10361_v63 = vadd.f32 %v7302_v42, %v4780_v1 }
 0x40e   : > { %v7626_v21 = vcombine.high %v7624_v0, %v7624_v0  ;;  %v8184_v18 = vcombine.low %v7617_v58, %v7625_v22  ;;  %v7641_v45 = vrot.slane %v7627_v23, %v14436_v44  ;;  %v7642_v36 = vcombine.high %v7634_v33, %v7634_v33 }
 0x40f   : > { %v7510_v27 = vadd.f32 %v14431_v13, %v7469_v41  ;;  %v7470_v24 = vmul.f32 %v10361_v63, %v14426_v29 }
 0x410   : > { %v8185_v57 = vcombine.low %v7624_v0, %v7626_v21  ;;  %v7643_v8 = vcombine.high %v7641_v45, %v7641_v45  ;;  %v8201_v60 = vcombine.low %v7634_v33, %v7642_v36  ;;  %v8192_v2 = vrot.slane %v8184_v18, %v14436_v44 }
 0x411   : > { %v7544_v30 = vmax.f32 %v7510_v27, 0.0  ;;  %v7511_v35 = vadd.f32 %v14431_v13, %v7470_v24  ;;  %v7307_v19 = vpop.f32.mrb[8].mxu0 }
 0x412   : > { %v8199_v1 = vrot.slane %v8185_v57, %v14436_v44  ;;  %v8202_v16 = vcombine.low %v7641_v45, %v7643_v8  ;;  %v10362_v46 = vadd.f32 %v7307_v19, %v14395_v9  ;;  %v10292_v55 = vpop.f32.mrb[9].mxu0  ;;  %v8209_v11 = vrot.slane %v8201_v60, %v14436_v44 }
 0x413   : > { %v7644_v31 = vcombine.high %v7544_v30, %v7544_v30  ;;  %v7651_v62 = vrot.slane %v7544_v30, %v14436_v44  ;;  %v7545_v48 = vmax.f32 %v7511_v35, 0.0  ;;  %v7310_v50 = vpop.f32.mrb[10].mxu0 }
 0x414   : > { %v8200_v10 = vcombine.low %v8192_v2, %v8199_v1  ;;  %v8216_v12 = vrot.slane %v8202_v16, %v14436_v44  ;;  %v7471_v53 = vmul.f32 %v10362_v46, %v14426_v29  ;;  %v10363_v5 = vadd.f32 %v7310_v50, %v14397_v56  ;;  %v10293_v40 = vpop.f32.mrb[11].mxu0 }
 0x415   : > { %v7658_v52 = vrot.slane %v7644_v31, %v14436_v44  ;;  %v7659_v9 = vcombine.high %v7651_v62, %v7651_v62  ;;  %v7661_v38 = vcombine.high %v7545_v48, %v7545_v48  ;;  %v7668_v59 = vrot.slane %v7545_v48, %v14436_v44 }
 0x416   : > { %v9444_v28 = vpack.c.bf16 %v8200_v10, %v8200_v10  ;;  %v8217_v61 = vcombine.low %v8209_v11, %v8216_v12  ;;  %v7512_v6 = vadd.f32 %v14431_v13, %v7471_v53  ;;  %v7472_v4 = vmul.f32 %v10363_v5, %v14426_v29 }
 0x417   : > { %v7660_v32 = vcombine.high %v7658_v52, %v7658_v52  ;;  %v8218_v58 = vcombine.low %v7651_v62, %v7659_v9  ;;  %v7675_v7 = vrot.slane %v7661_v38, %v14436_v44  ;;  %v7676_v20 = vcombine.high %v7668_v59, %v7668_v59 }
 0x418   : > { %8888 = vst.msk [vmem:[%s11916_s15] sm:$0xf] %vm424_vm0, %v9444_v28  ;;  %v9445_v56 = vpack.c.bf16 %v8217_v61, %v8217_v61  ;;  %v7546_v54 = vmax.f32 %v7512_v6, 0.0  ;;  %v7513_v42 = vadd.f32 %v14431_v13, %v7472_v4 }
 0x419   : > { %v8219_v0 = vcombine.low %v7658_v52, %v7660_v32  ;;  %v7677_v22 = vcombine.high %v7675_v7, %v7675_v7  ;;  %v8235_v23 = vcombine.low %v7668_v59, %v7676_v20  ;;  %v7315_v33 = vpop.f32.mrb[12].mxu0  ;;  %v8226_v45 = vrot.slane %v8218_v58, %v14436_v44 }
 0x41a   : > { %8889 = vst.msk [vmem:[%s11916_s15 + $0x4] sm:$0xf] %vm424_vm0, %v9445_v56  ;;  %v7678_v43 = vcombine.high %v7546_v54, %v7546_v54  ;;  %v7685_v41 = vrot.slane %v7546_v54, %v14436_v44  ;;  %v7547_v63 = vmax.f32 %v7513_v42, 0.0  ;;  %v10364_v21 = vadd.f32 %v7315_v33, %v14399_v26  ;;  %v10296_v18 = vpop.f32.mrb[13].mxu0 }
 0x41b   : > { %v8233_v36 = vrot.slane %v8219_v0, %v14436_v44  ;;  %v8236_v27 = vcombine.low %v7675_v7, %v7677_v22  ;;  %v8243_v24 = vrot.slane %v8235_v23, %v14436_v44  ;;  %v7318_v57 = vpop.f32.mrb[14].mxu0 }
 0x41c   : > { %v7692_v8 = vrot.slane %v7678_v43, %v14436_v44  ;;  %v7693_v60 = vcombine.high %v7685_v41, %v7685_v41  ;;  %v7695_v30 = vcombine.high %v7547_v63, %v7547_v63  ;;  %v7702_v35 = vrot.slane %v7547_v63, %v14436_v44  ;;  %v10297_v19 = vpop.f32.mrb[15].mxu0 }
 0x41d   : > { %v8234_v2 = vcombine.low %v8226_v45, %v8233_v36  ;;  %v8250_v26 = vrot.slane %v8236_v27, %v14436_v44  ;;  %v7473_v1 = vmul.f32 %v10364_v21, %v14426_v29  ;;  %v10365_v16 = vadd.f32 %v7318_v57, %v14401_v34 }
 0x41e   : > { %v8252_v46 = vcombine.low %v7693_v60, %v7692_v8  ;;  %v7694_v55 = vcombine.high %v7692_v8, %v7692_v8  ;;  %v7709_v11 = vrot.slane %v7695_v30, %v14436_v44  ;;  %v7710_v31 = vcombine.high %v7702_v35, %v7702_v35 }
 0x41f   : > { %v9446_v62 = vpack.c.bf16 %v8234_v2, %v8234_v2  ;;  %v8251_v48 = vcombine.low %v8243_v24, %v8250_v26  ;;  %v7514_v50 = vadd.f32 %v14431_v13, %v7473_v1  ;;  %v7474_v10 = vmul.f32 %v10365_v16, %v14426_v29 }
 0x420   : > { %v8253_v12 = vcombine.low %v7694_v55, %v7702_v35  ;;  %v8269_v53 = vcombine.low %v7710_v31, %v7709_v11  ;;  %v8260_v9 = vrot.slane %v8252_v46, %v14436_v44  ;;  %v7711_v61 = vcombine.high %v7709_v11, %v7709_v11 }
 0x421   : > { %8890 = vst.msk [vmem:[%s11916_s15 + $0x8] sm:$0xf] %vm424_vm0, %v9446_v62  ;;  %v9447_v5 = vpack.c.bf16 %v8251_v48, %v8251_v48  ;;  %v7548_v40 = vmax.f32 %v7514_v50, 0.0  ;;  %v7515_v34 = vadd.f32 %v14431_v13, %v7474_v10  ;;  %v7323_v52 = vpop.f32.mrb[16].mxu0 }
 0x422   : > { %v8267_v38 = vrot.slane %v8253_v12, %v14436_v44  ;;  %v10366_v59 = vadd.f32 %v7323_v52, %v14403_v51  ;;  %v10300_v28 = vpop.f32.mrb[17].mxu0  ;;  %v8277_v20 = vrot.slane %v8269_v53, %v14436_v44 }
 0x423   : > { %8891 = vst.msk [vmem:[%s11916_s15 + $0xc] sm:$0xf] %vm424_vm0, %v9447_v5  ;;  %v7712_v6 = vcombine.high %v7548_v40, %v7548_v40  ;;  %v7719_v4 = vrot.slane %v7548_v40, %v14436_v44  ;;  %v7549_v32 = vmax.f32 %v7515_v34, 0.0  ;;  %v7326_v58 = vpop.f32.mrb[18].mxu0 }
 0x424   : > { %v8268_v7 = vcombine.low %v8260_v9, %v8267_v38  ;;  %v7475_v56 = vmul.f32 %v10366_v59, %v14426_v29  ;;  %v10367_v54 = vadd.f32 %v7326_v58, %v14405_v14  ;;  %v10301_v42 = vpop.f32.mrb[19].mxu0 }
 0x425   : > { %v7726_v51 = vrot.slane %v7712_v6, %v14436_v44  ;;  %v7727_v0 = vcombine.high %v7719_v4, %v7719_v4  ;;  %v8270_v22 = vcombine.low %v7711_v61, %v7719_v4  ;;  %v7729_v23 = vcombine.high %v7549_v32, %v7549_v32 }
 0x426   : > { %v9448_v33 = vpack.c.bf16 %v8268_v7, %v8268_v7  ;;  %v7736_v43 = vrot.slane %v7549_v32, %v14436_v44  ;;  %v7516_v41 = vadd.f32 %v14431_v13, %v7475_v56  ;;  %v7476_v63 = vmul.f32 %v10367_v54, %v14426_v29 }
 0x427   : > { %v8284_v21 = vrot.slane %v8270_v22, %v14436_v44  ;;  %v8286_v18 = vcombine.low %v7727_v0, %v7726_v51  ;;  %v7728_v45 = vcombine.high %v7726_v51, %v7726_v51  ;;  %v7743_v36 = vrot.slane %v7729_v23, %v14436_v44 }
 0x428   : > { %8892 = vst.msk [vmem:[%s11916_s15 + $0x10] sm:$0xf] %vm424_vm0, %v9448_v33  ;;  %v7744_v14 = vcombine.high %v7736_v43, %v7736_v43  ;;  %v7550_v27 = vmax.f32 %v7516_v41, 0.0  ;;  %v7517_v24 = vadd.f32 %v14431_v13, %v7476_v63 }
 0x429   : > { %v8285_v57 = vcombine.low %v8277_v20, %v8284_v21  ;;  %v8287_v8 = vcombine.low %v7728_v45, %v7736_v43  ;;  %v7745_v60 = vcombine.high %v7743_v36, %v7743_v36  ;;  %v7331_v30 = vpop.f32.mrb[20].mxu0  ;;  %v8294_v16 = vrot.slane %v8286_v18, %v14436_v44 }
 0x42a   : > { %v8303_v35 = vcombine.low %v7744_v14, %v7743_v36  ;;  %v7746_v19 = vcombine.high %v7550_v27, %v7550_v27  ;;  %v7753_v2 = vrot.slane %v7550_v27, %v14436_v44  ;;  %v7551_v26 = vmax.f32 %v7517_v24, 0.0  ;;  %v10304_v1 = vpop.f32.mrb[21].mxu0 }
 0x42b   : > { %v9449_v46 = vpack.c.bf16 %v8285_v57, %v8285_v57  ;;  %v8301_v55 = vrot.slane %v8287_v8, %v14436_v44  ;;  %v10368_v11 = vadd.f32 %v7331_v30, %v14407_v49  ;;  %v7334_v31 = vpop.f32.mrb[22].mxu0 }
 0x42c   : > { %v7760_v62 = vrot.slane %v7746_v19, %v14436_v44  ;;  %v8304_v48 = vcombine.low %v7745_v60, %v7753_v2  ;;  %v7762_v50 = vcombine.high %v7551_v26, %v7551_v26  ;;  %v10305_v10 = vpop.f32.mrb[23].mxu0  ;;  %v7769_v53 = vrot.slane %v7551_v26, %v14436_v44 }
 0x42d   : > { %8893 = vst.msk [vmem:[%s11916_s15 + $0x14] sm:$0xf] %vm424_vm0, %v9449_v46  ;;  %v8302_v12 = vcombine.low %v8294_v16, %v8301_v55  ;;  %v7477_v5 = vmul.f32 %v10368_v11, %v14426_v29  ;;  %v10369_v40 = vadd.f32 %v7334_v31, %v14409_v17  ;;  %v8311_v34 = vrot.slane %v8303_v35, %v14436_v44 }
 0x42e   : > { %v7761_v52 = vcombine.high %v7760_v62, %v7760_v62  ;;  %v8318_v49 = vrot.slane %v8304_v48, %v14436_v44  ;;  %v7776_v9 = vrot.slane %v7762_v50, %v14436_v44  ;;  %v7777_v59 = vcombine.high %v7769_v53, %v7769_v53 }
 0x42f   : > { %v9450_v38 = vpack.c.bf16 %v8302_v12, %v8302_v12  ;;  %v7518_v28 = vadd.f32 %v14431_v13, %v7477_v5  ;;  %v7478_v61 = vmul.f32 %v10369_v40, %v14426_v29 }
 0x430   : > { %v8319_v6 = vcombine.low %v8311_v34, %v8318_v49  ;;  %v8320_v4 = vcombine.low %v7760_v62, %v7761_v52  ;;  %v7778_v32 = vcombine.high %v7776_v9, %v7776_v9  ;;  %v8321_v17 = vcombine.low %v7769_v53, %v7777_v59 }
 0x431   : > { %8894 = vst.msk [vmem:[%s11916_s15 + $0x18] sm:$0xf] %vm424_vm0, %v9450_v38  ;;  %v7552_v58 = vmax.f32 %v7518_v28, 0.0  ;;  %v7519_v7 = vadd.f32 %v14431_v13, %v7478_v61  ;;  %v7339_v20 = vpop.f32.mrb[24].mxu0 }
 0x432   : > { %v8328_v56 = vrot.slane %v8320_v4, %v14436_v44  ;;  %v9451_v54 = vpack.c.bf16 %v8319_v6, %v8319_v6  ;;  %v10370_v42 = vadd.f32 %v7339_v20, %v14411_v25  ;;  %v10308_v51 = vpop.f32.mrb[25].mxu0  ;;  %v8335_v0 = vrot.slane %v8321_v17, %v14436_v44 }
 0x433   : > { %v7779_v22 = vcombine.high %v7552_v58, %v7552_v58  ;;  %v7786_v23 = vrot.slane %v7552_v58, %v14436_v44  ;;  %v7553_v33 = vmax.f32 %v7519_v7, 0.0  ;;  %v7342_v43 = vpop.f32.mrb[26].mxu0  ;;  %v8337_v41 = vcombine.low %v7776_v9, %v7778_v32 }
 0x434   : > { %8895 = vst.msk [vmem:[%s11916_s15 + $0x1c] sm:$0xf] %vm424_vm0, %v9451_v54  ;;  %v7479_v63 = vmul.f32 %v10370_v42, %v14426_v29  ;;  %v10371_v21 = vadd.f32 %v7342_v43, %v14413_v47  ;;  %v10309_v18 = vpop.f32.mrb[27].mxu0  ;;  %v8336_v45 = vcombine.low %v8328_v56, %v8335_v0 }
 0x435   : > { %v7793_v25 = vrot.slane %v7779_v22, %v14436_v44  ;;  %v7794_v36 = vcombine.high %v7786_v23, %v7786_v23  ;;  %v7796_v14 = vcombine.high %v7553_v33, %v7553_v33  ;;  %v7803_v27 = vrot.slane %v7553_v33, %v14436_v44 }
 0x436   : > { %v7520_v24 = vadd.f32 %v14431_v13, %v7479_v63  ;;  %v7480_v57 = vmul.f32 %v10371_v21, %v14426_v29  ;;  %v9452_v8 = vpack.c.bf16 %v8336_v45, %v8336_v45  ;;  %v8345_v26 = vrot.slane %v8337_v41, %v14436_v44 }
 0x437   : > { %v7795_v60 = vcombine.high %v7793_v25, %v7793_v25  ;;  %v8338_v30 = vcombine.low %v7786_v23, %v7794_v36  ;;  %v7810_v35 = vrot.slane %v7796_v14, %v14436_v44  ;;  %v7811_v19 = vcombine.high %v7803_v27, %v7803_v27 }
 0x438   : > { %v7554_v47 = vmax.f32 %v7520_v24, 0.0  ;;  %v7521_v2 = vadd.f32 %v14431_v13, %v7480_v57  ;;  %8896 = vst.msk [vmem:[%s11916_s15 + $0x20] sm:$0xf] %vm424_vm0, %v9452_v8 }
 0x439   : > { %v8352_v1 = vrot.slane %v8338_v30, %v14436_v44  ;;  %v8354_v16 = vcombine.low %v7793_v25, %v7795_v60  ;;  %v7812_v46 = vcombine.high %v7810_v35, %v7810_v35  ;;  %v7347_v55 = vpop.f32.mrb[28].mxu0  ;;  %v8355_v31 = vcombine.low %v7803_v27, %v7811_v19 }
 0x43a   : > { %v14536_v11 = vpop.f32.mrb[36].mxu1  ;;  %v7813_v62 = vcombine.high %v7554_v47, %v7554_v47  ;;  %v7820_v48 = vrot.slane %v7554_v47, %v14436_v44  ;;  %v7555_v50 = vmax.f32 %v7521_v2, 0.0  ;;  %v10312_v10 = vpop.f32.mrb[29].mxu0  ;;  %v10372_v34 = vadd.f32 %v7347_v55, %v14415_v39 }
 0x43b   : > { %v10016_v12 = vpop.f32.mrb[37].mxu1  ;;  %v8353_v53 = vcombine.low %v8345_v26, %v8352_v1  ;;  %v8362_v5 = vrot.slane %v8354_v16, %v14436_v44  ;;  %v8371_v40 = vcombine.low %v7810_v35, %v7812_v46  ;;  %v7350_v52 = vpop.f32.mrb[30].mxu0  ;;  %v8369_v9 = vrot.slane %v8355_v31, %v14436_v44 }
 0x43c   : > { %v14541_v49 = vpop.f32.mrb[38].mxu1  ;;  %v7827_v38 = vrot.slane %v7813_v62, %v14436_v44  ;;  %v7828_v59 = vcombine.high %v7820_v48, %v7820_v48  ;;  %v7830_v28 = vcombine.high %v7555_v50, %v7555_v50  ;;  %v10313_v61 = vpop.f32.mrb[31].mxu0  ;;  %v7837_v32 = vrot.slane %v7555_v50, %v14436_v44 }
 0x43d   : > { %v10017_v6 = vpop.f32.mrb[39].mxu1  ;;  %v9453_v4 = vpack.c.bf16 %v8353_v53, %v8353_v53  ;;  %v7481_v17 = vmul.f32 %v10372_v34, %v14426_v29  ;;  %v8370_v58 = vcombine.low %v8362_v5, %v8369_v9  ;;  %v10373_v42 = vadd.f32 %v7350_v52, %v14417_v37 }
 0x43e   : > { %v7829_v7 = vcombine.high %v7827_v38, %v7827_v38  ;;  %v8372_v39 = vcombine.low %v7820_v48, %v7828_v59  ;;  %v7844_v20 = vrot.slane %v7830_v28, %v14436_v44  ;;  %v7845_v56 = vcombine.high %v7837_v32, %v7837_v32 }
 0x43f   : > { %8897 = vst.msk [vmem:[%s11916_s15 + $0x24] sm:$0xf] %vm424_vm0, %v9453_v4  ;;  %v7522_v54 = vadd.f32 %v14431_v13, %v7481_v17  ;;  %v8379_v51 = vrot.slane %v8371_v40, %v14436_v44  ;;  %v9454_v0 = vpack.c.bf16 %v8370_v58, %v8370_v58  ;;  %v7482_v41 = vmul.f32 %v10373_v42, %v14426_v29 }
 0x440   : > { %v8386_v22 = vrot.slane %v8372_v39, %v14436_v44  ;;  %v8388_v23 = vcombine.low %v7829_v7, %v7837_v32  ;;  %v8389_v33 = vcombine.low %v7845_v56, %v7844_v20  ;;  %v7846_v25 = vcombine.high %v7844_v20, %v7844_v20 }
 0x441   : > { %v7556_v43 = vmax.f32 %v7522_v54, 0.0  ;;  %v7355_v63 = vpop.f32.mrb[32].mxu0  ;;  %8898 = vst.msk [vmem:[%s11916_s15 + $0x28] sm:$0xf] %vm424_vm0, %v9454_v0  ;;  %v7523_v8 = vadd.f32 %v14431_v13, %v7482_v41 }
 0x442   : > { %v14555_v21 = vpop.f32.mrb[40].mxu1  ;;  %v8387_v18 = vcombine.low %v8379_v51, %v8386_v22  ;;  %v8396_v45 = vrot.slane %v8388_v23, %v14436_v44  ;;  %v10374_v37 = vadd.f32 %v7355_v63, %v14419_v15  ;;  %v10316_v36 = vpop.f32.mrb[33].mxu0  ;;  %v8403_v27 = vrot.slane %v8389_v33, %v14436_v44 }
 0x443   : > { %v10020_v14 = vpop.f32.mrb[41].mxu1  ;;  %v7847_v24 = vcombine.high %v7556_v43, %v7556_v43  ;;  %v7854_v57 = vrot.slane %v7556_v43, %v14436_v44  ;;  %v7358_v60 = vpop.f32.mrb[34].mxu0  ;;  %v7557_v55 = vmax.f32 %v7523_v8, 0.0 }
 0x444   : > { %v14564_v30 = vpop.f32.mrb[42].mxu1  ;;  %v9455_v35 = vpack.c.bf16 %v8387_v18, %v8387_v18  ;;  %v7483_v19 = vmul.f32 %v10374_v37, %v14426_v29  ;;  %v10375_v47 = vadd.f32 %v7358_v60, %v14421_v3  ;;  %v10317_v2 = vpop.f32.mrb[35].mxu0  ;;  %v8404_v26 = vcombine.low %v8396_v45, %v8403_v27 }
 0x445   : > { %v10021_v15 = vpop.f32.mrb[43].mxu1  ;;  %v7861_v1 = vrot.slane %v7847_v24, %v14436_v44  ;;  %v7862_v16 = vcombine.high %v7854_v57, %v7854_v57  ;;  %v8405_v46 = vcombine.low %v7846_v25, %v7854_v57  ;;  %v7864_v12 = vcombine.high %v7557_v55, %v7557_v55 }
 0x446   : > { %8899 = vst.msk [vmem:[%s11916_s15 + $0x2c] sm:$0xf] %vm424_vm0, %v9455_v35  ;;  %v7524_v31 = vadd.f32 %v14431_v13, %v7483_v19  ;;  %v7484_v62 = vmul.f32 %v10375_v47, %v14426_v29  ;;  %v9456_v48 = vpack.c.bf16 %v8404_v26, %v8404_v26  ;;  %v7871_v3 = vrot.slane %v7557_v55, %v14436_v44 }
 0x447   : > { %v8406_v50 = vcombine.low %v7862_v16, %v7861_v1  ;;  %v7863_v10 = vcombine.high %v7861_v1, %v7861_v1  ;;  %v8413_v40 = vrot.slane %v8405_v46, %v14436_v44  ;;  %v7878_v38 = vrot.slane %v7864_v12, %v14436_v44 }
 0x448   : > { %v7558_v53 = vmax.f32 %v7524_v31, 0.0  ;;  %v7525_v5 = vadd.f32 %v14431_v13, %v7484_v62  ;;  %8900 = vst.msk [vmem:[%s11916_s15 + $0x30] sm:$0xf] %vm424_vm0, %v9456_v48  ;;  %v7879_v59 = vcombine.high %v7871_v3, %v7871_v3 }
 0x449   : > { %v8420_v34 = vrot.slane %v8406_v50, %v14436_v44  ;;  %v7363_v52 = vpop.f32.mrb[36].mxu0  ;;  %v8422_v28 = vcombine.low %v7863_v10, %v7871_v3  ;;  %v7880_v42 = vcombine.high %v7878_v38, %v7878_v38 }
 0x44a   : > { %v14579_v9 = vpop.f32.mrb[44].mxu1  ;;  %v7881_v61 = vcombine.high %v7558_v53, %v7558_v53  ;;  %v10320_v6 = vpop.f32.mrb[37].mxu0  ;;  %v7888_v17 = vrot.slane %v7558_v53, %v14436_v44  ;;  %v7559_v58 = vmax.f32 %v7525_v5, 0.0  ;;  %v10376_v7 = vadd.f32 %v7363_v52, %v14536_v11 }
 0x44b   : > { %v10024_v4 = vpop.f32.mrb[45].mxu1  ;;  %v8421_v32 = vcombine.low %v8413_v40, %v8420_v34  ;;  %v7366_v39 = vpop.f32.mrb[38].mxu0  ;;  %v8423_v56 = vcombine.low %v7879_v59, %v7878_v38  ;;  %v8430_v54 = vrot.slane %v8422_v28, %v14436_v44 }
 0x44c   : > { %v14584_v20 = vpop.f32.mrb[46].mxu1  ;;  %v7895_v51 = vrot.slane %v7881_v61, %v14436_v44  ;;  %v10321_v0 = vpop.f32.mrb[39].mxu0  ;;  %v7896_v33 = vcombine.high %v7888_v17, %v7888_v17  ;;  %v7897_v43 = vcombine.high %v7559_v58, %v7559_v58  ;;  %v7904_v41 = vrot.slane %v7559_v58, %v14436_v44 }
 0x44d   : > { %v10025_v22 = vpop.f32.mrb[47].mxu1  ;;  %v9457_v23 = vpack.c.bf16 %v8421_v32, %v8421_v32  ;;  %v8437_v63 = vrot.slane %v8423_v56, %v14436_v44  ;;  %v8439_v11 = vcombine.low %v7880_v42, %v7888_v17  ;;  %v7485_v18 = vmul.f32 %v10376_v7, %v14426_v29 }
 0x44e   : > { %v10377_v45 = vadd.f32 %v7366_v39, %v14541_v49  ;;  %v8440_v25 = vcombine.low %v7896_v33, %v7895_v51  ;;  %v7911_v37 = vrot.slane %v7897_v43, %v14436_v44  ;;  %v7912_v36 = vcombine.high %v7904_v41, %v7904_v41 }
 0x44f   : > { %8901 = vst.msk [vmem:[%s11916_s15 + $0x34] sm:$0xf] %vm424_vm0, %v9457_v23  ;;  %v8438_v14 = vcombine.low %v8430_v54, %v8437_v63  ;;  %v7526_v27 = vadd.f32 %v14431_v13, %v7485_v18  ;;  %v8447_v57 = vrot.slane %v8439_v11, %v14436_v44 }
 0x450   : > { %v7486_v24 = vmul.f32 %v10377_v45, %v14426_v29  ;;  %v8454_v8 = vrot.slane %v8440_v25, %v14436_v44  ;;  %v7913_v60 = vcombine.high %v7911_v37, %v7911_v37  ;;  %v8456_v35 = vcombine.low %v7904_v41, %v7912_v36 }
 0x451   : > { %v7371_v19 = vpop.f32.mrb[40].mxu0  ;;  %v9458_v47 = vpack.c.bf16 %v8438_v14, %v8438_v14  ;;  %v7560_v2 = vmax.f32 %v7526_v27, 0.0 }
 0x452   : > { %v14599_v49 = vpop.f32.mrb[48].mxu1  ;;  %v7527_v15 = vadd.f32 %v14431_v13, %v7486_v24  ;;  %v10378_v26 = vadd.f32 %v7371_v19, %v14555_v21  ;;  %v10324_v1 = vpop.f32.mrb[41].mxu0  ;;  %v8455_v46 = vcombine.low %v8447_v57, %v8454_v8  ;;  %v8457_v55 = vcombine.low %v7911_v37, %v7913_v60 }
 0x453   : > { %v10028_v16 = vpop.f32.mrb[49].mxu1  ;;  %v7374_v31 = vpop.f32.mrb[42].mxu0  ;;  %8902 = vst.msk [vmem:[%s11916_s15 + $0x38] sm:$0xf] %vm424_vm0, %v9458_v47  ;;  %v7914_v48 = vcombine.high %v7560_v2, %v7560_v2  ;;  %v7921_v50 = vrot.slane %v7560_v2, %v14436_v44  ;;  %v8464_v21 = vrot.slane %v8456_v35, %v14436_v44 }
 0x454   : > { %v14603_v62 = vpop.f32.mrb[50].mxu1  ;;  %v7561_v10 = vmax.f32 %v7527_v15, 0.0  ;;  %v7487_v12 = vmul.f32 %v10378_v26, %v14426_v29  ;;  %v10325_v3 = vpop.f32.mrb[43].mxu0  ;;  %v9459_v5 = vpack.c.bf16 %v8455_v46, %v8455_v46  ;;  %v8471_v40 = vrot.slane %v8457_v55, %v14436_v44 }
 0x455   : > { %v10029_v53 = vpop.f32.mrb[51].mxu1  ;;  %v10379_v34 = vadd.f32 %v7374_v31, %v14564_v30  ;;  %v7928_v52 = vrot.slane %v7914_v48, %v14436_v44  ;;  %v7929_v38 = vcombine.high %v7921_v50, %v7921_v50 }
 0x456   : > { %v7931_v59 = vcombine.high %v7561_v10, %v7561_v10  ;;  %v7938_v28 = vrot.slane %v7561_v10, %v14436_v44  ;;  %8903 = vst.msk [vmem:[%s11916_s15 + $0x3c] sm:$0xf] %vm424_vm0, %v9459_v5  ;;  %v8472_v61 = vcombine.low %v8464_v21, %v8471_v40  ;;  %v7528_v6 = vadd.f32 %v14431_v13, %v7487_v12 }
 0x457   : > { %v7488_v4 = vmul.f32 %v10379_v34, %v14426_v29  ;;  %v7930_v32 = vcombine.high %v7928_v52, %v7928_v52  ;;  %v8473_v17 = vcombine.low %v7921_v50, %v7929_v38 }
 0x458   : > { %v7945_v58 = vrot.slane %v7931_v59, %v14436_v44  ;;  %v7946_v7 = vcombine.high %v7938_v28, %v7938_v28  ;;  %v9460_v30 = vpack.c.bf16 %v8472_v61, %v8472_v61  ;;  %v7562_v39 = vmax.f32 %v7528_v6, 0.0 }
 0x459   : > { %v7529_v56 = vadd.f32 %v14431_v13, %v7488_v4  ;;  %v7379_v54 = vpop.f32.mrb[44].mxu0  ;;  %v8474_v51 = vcombine.low %v7928_v52, %v7930_v32  ;;  %v8481_v0 = vrot.slane %v8473_v17, %v14436_v44 }
 0x45a   : > { %v14620_v42 = vpop.f32.mrb[52].mxu1  ;;  %v7947_v22 = vcombine.high %v7945_v58, %v7945_v58  ;;  %v8490_v23 = vcombine.low %v7938_v28, %v7946_v7  ;;  %v10328_v33 = vpop.f32.mrb[45].mxu0  ;;  %8904 = vst.msk [vmem:[%s11916_s15 + $0x40] sm:$0xf] %vm424_vm0, %v9460_v30  ;;  %v7948_v41 = vcombine.high %v7562_v39, %v7562_v39  ;;  %v7955_v63 = vrot.slane %v7562_v39, %v14436_v44 }
 0x45b   : > { %v10032_v43 = vpop.f32.mrb[53].mxu1  ;;  %v7563_v11 = vmax.f32 %v7529_v56, 0.0  ;;  %v10380_v18 = vadd.f32 %v7379_v54, %v14579_v9  ;;  %v7382_v45 = vpop.f32.mrb[46].mxu0  ;;  %v8488_v37 = vrot.slane %v8474_v51, %v14436_v44 }
 0x45c   : > { %v14627_v25 = vpop.f32.mrb[54].mxu1  ;;  %v8491_v36 = vcombine.low %v7945_v58, %v7947_v22  ;;  %v8498_v14 = vrot.slane %v8490_v23, %v14436_v44  ;;  %v10381_v27 = vadd.f32 %v7382_v45, %v14584_v20  ;;  %v10329_v24 = vpop.f32.mrb[47].mxu0  ;;  %v7962_v8 = vrot.slane %v7948_v41, %v14436_v44 }
 0x45d   : > { %v10033_v57 = vpop.f32.mrb[55].mxu1  ;;  %v7963_v60 = vcombine.high %v7955_v63, %v7955_v63  ;;  %v7965_v35 = vcombine.high %v7563_v11, %v7563_v11  ;;  %v7972_v19 = vrot.slane %v7563_v11, %v14436_v44  ;;  %v8489_v9 = vcombine.low %v8481_v0, %v8488_v37 }
 0x45e   : > { %v8505_v47 = vrot.slane %v8491_v36, %v14436_v44  ;;  %v7489_v2 = vmul.f32 %v10380_v18, %v14426_v29  ;;  %v7490_v15 = vmul.f32 %v10381_v27, %v14426_v29  ;;  %v7964_v26 = vcombine.high %v7962_v8, %v7962_v8 }
 0x45f   : > { %v8507_v1 = vcombine.low %v7955_v63, %v7963_v60  ;;  %v7979_v20 = vrot.slane %v7965_v35, %v14436_v44  ;;  %v7980_v16 = vcombine.high %v7972_v19, %v7972_v19  ;;  %v9461_v46 = vpack.c.bf16 %v8489_v9, %v8489_v9 }
 0x460   : > { %v8506_v55 = vcombine.low %v8498_v14, %v8505_v47  ;;  %v7530_v31 = vadd.f32 %v14431_v13, %v7489_v2  ;;  %v7531_v48 = vadd.f32 %v14431_v13, %v7490_v15  ;;  %v8508_v50 = vcombine.low %v7962_v8, %v7964_v26 }
 0x461   : > { %v7387_v10 = vpop.f32.mrb[48].mxu0  ;;  %8905 = vst.msk [vmem:[%s11916_s15 + $0x44] sm:$0xf] %vm424_vm0, %v9461_v46  ;;  %v8515_v52 = vrot.slane %v8507_v1, %v14436_v44  ;;  %v8524_v59 = vcombine.low %v7980_v16, %v7979_v20  ;;  %v7981_v28 = vcombine.high %v7979_v20, %v7979_v20 }
 0x462   : > { %v14640_v12 = vpop.f32.mrb[56].mxu1  ;;  %v9462_v3 = vpack.c.bf16 %v8506_v55, %v8506_v55  ;;  %v7564_v53 = vmax.f32 %v7530_v31, 0.0  ;;  %v7565_v5 = vmax.f32 %v7531_v48, 0.0  ;;  %v10382_v21 = vadd.f32 %v7387_v10, %v14599_v49  ;;  %v10332_v40 = vpop.f32.mrb[49].mxu0 }
 0x463   : > { %v10036_v34 = vpop.f32.mrb[57].mxu1  ;;  %v8522_v38 = vrot.slane %v8508_v50, %v14436_v44  ;;  %v7390_v61 = vpop.f32.mrb[50].mxu0  ;;  %v8532_v63 = vrot.slane %v8524_v59, %v14436_v44 }
 0x464   : > { %v14647_v6 = vpop.f32.mrb[58].mxu1  ;;  %8906 = vst.msk [vmem:[%s11916_s15 + $0x48] sm:$0xf] %vm424_vm0, %v9462_v3  ;;  %v7982_v4 = vcombine.high %v7564_v53, %v7564_v53  ;;  %v7989_v32 = vrot.slane %v7564_v53, %v14436_v44  ;;  %v7999_v17 = vcombine.high %v7565_v5, %v7565_v5  ;;  %v8006_v58 = vrot.slane %v7565_v5, %v14436_v44  ;;  %v10333_v49 = vpop.f32.mrb[51].mxu0 }
 0x465   : > { %v10037_v7 = vpop.f32.mrb[59].mxu1  ;;  %v8523_v30 = vcombine.low %v8515_v52, %v8522_v38  ;;  %v7491_v39 = vmul.f32 %v10382_v21, %v14426_v29  ;;  %v10383_v56 = vadd.f32 %v7390_v61, %v14603_v62 }
 0x466   : > { %v7996_v54 = vrot.slane %v7982_v4, %v14436_v44  ;;  %v7997_v51 = vcombine.high %v7989_v32, %v7989_v32  ;;  %v8525_v0 = vcombine.low %v7981_v28, %v7989_v32  ;;  %v8013_v22 = vrot.slane %v7999_v17, %v14436_v44 }
 0x467   : > { %v9463_v23 = vpack.c.bf16 %v8523_v30, %v8523_v30  ;;  %v8014_v33 = vcombine.high %v8006_v58, %v8006_v58  ;;  %v7532_v43 = vadd.f32 %v14431_v13, %v7491_v39  ;;  %v7492_v41 = vmul.f32 %v10383_v56, %v14426_v29 }
 0x468   : > { %v8539_v11 = vrot.slane %v8525_v0, %v14436_v44  ;;  %v8541_v18 = vcombine.low %v7997_v51, %v7996_v54  ;;  %v7998_v45 = vcombine.high %v7996_v54, %v7996_v54  ;;  %v8015_v36 = vcombine.high %v8013_v22, %v8013_v22 }
 0x469   : > { %8907 = vst.msk [vmem:[%s11916_s15 + $0x4c] sm:$0xf] %vm424_vm0, %v9463_v23  ;;  %v8558_v62 = vcombine.low %v8014_v33, %v8013_v22  ;;  %v7566_v37 = vmax.f32 %v7532_v43, 0.0  ;;  %v7533_v14 = vadd.f32 %v14431_v13, %v7492_v41  ;;  %v7395_v27 = vpop.f32.mrb[52].mxu0 }
 0x46a   : > { %v14664_v24 = vpop.f32.mrb[60].mxu1  ;;  %v8540_v57 = vcombine.low %v8532_v63, %v8539_v11  ;;  %v8549_v8 = vrot.slane %v8541_v18, %v14436_v44  ;;  %v8542_v60 = vcombine.low %v7998_v45, %v8006_v58  ;;  %v10384_v35 = vadd.f32 %v7395_v27, %v14620_v42  ;;  %v10336_v19 = vpop.f32.mrb[53].mxu0 }
 0x46b   : > { %v10040_v9 = vpop.f32.mrb[61].mxu1  ;;  %v8566_v47 = vrot.slane %v8558_v62, %v14436_v44  ;;  %v8016_v2 = vcombine.high %v7566_v37, %v7566_v37  ;;  %v8023_v15 = vrot.slane %v7566_v37, %v14436_v44  ;;  %v7567_v26 = vmax.f32 %v7533_v14, 0.0  ;;  %v7398_v1 = vpop.f32.mrb[54].mxu0 }
 0x46c   : > { %v14670_v20 = vpop.f32.mrb[62].mxu1  ;;  %v9464_v16 = vpack.c.bf16 %v8540_v57, %v8540_v57  ;;  %v8556_v46 = vrot.slane %v8542_v60, %v14436_v44  ;;  %v7493_v55 = vmul.f32 %v10384_v35, %v14426_v29  ;;  %v10385_v31 = vadd.f32 %v7398_v1, %v14627_v25  ;;  %v10337_v42 = vpop.f32.mrb[55].mxu0  ;;  %v14705_v9 = vld [vmem:[%s15355_s18] ss:$0 sm:$0xff] }
 0x46d   : > { %v10041_v48 = vpop.f32.mrb[63].mxu1  ;;  %v8030_v50 = vrot.slane %v8016_v2, %v14436_v44  ;;  %v8031_v10 = vcombine.high %v8023_v15, %v8023_v15  ;;  %v8559_v3 = vcombine.low %v8015_v36, %v8023_v15  ;;  %v8033_v53 = vcombine.high %v7567_v26, %v7567_v26 }
 0x46e   : > { %8908 = vst.msk [vmem:[%s11916_s15 + $0x50] sm:$0xf] %vm424_vm0, %v9464_v16  ;;  %v8557_v5 = vcombine.low %v8549_v8, %v8556_v46  ;;  %v8040_v21 = vrot.slane %v7567_v26, %v14436_v44  ;;  %v7534_v40 = vadd.f32 %v14431_v13, %v7493_v55  ;;  %v7494_v34 = vmul.f32 %v10385_v31, %v14426_v29 }
 0x46f   : > { %v8573_v52 = vrot.slane %v8559_v3, %v14436_v44  ;;  %v8575_v25 = vcombine.low %v8031_v10, %v8030_v50  ;;  %v8032_v38 = vcombine.high %v8030_v50, %v8030_v50  ;;  %v8047_v59 = vrot.slane %v8033_v53, %v14436_v44 }
 0x470   : > { %v9465_v28 = vpack.c.bf16 %v8557_v5, %v8557_v5  ;;  %v7568_v61 = vmax.f32 %v7534_v40, 0.0  ;;  %v7535_v4 = vadd.f32 %v14431_v13, %v7494_v34 }
 0x471   : > { %v8574_v32 = vcombine.low %v8566_v47, %v8573_v52  ;;  %v8048_v17 = vcombine.high %v8047_v59, %v8047_v59  ;;  %v8576_v58 = vcombine.low %v8032_v38, %v8040_v21  ;;  %v7403_v49 = vpop.f32.mrb[56].mxu0  ;;  %v8583_v22 = vrot.slane %v8575_v25, %v14436_v44 }
 0x472   : > { %v14684_v7 = vpop.f32.mrb[64].mxu1  ;;  %8909 = vst.msk [vmem:[%s11916_s15 + $0x54] sm:$0xf] %vm424_vm0, %v9465_v28  ;;  %v8049_v30 = vcombine.high %v7568_v61, %v7568_v61  ;;  %v8056_v39 = vrot.slane %v7568_v61, %v14436_v44  ;;  %v7569_v56 = vmax.f32 %v7535_v4, 0.0  ;;  %v10386_v54 = vadd.f32 %v7403_v49, %v14640_v12  ;;  %v10340_v51 = vpop.f32.mrb[57].mxu0 }
 0x473   : > { %v10044_v0 = vpop.f32.mrb[65].mxu1  ;;  %v9466_v13 = vpack.c.bf16 %v8574_v32, %v8574_v32  ;;  %v8590_v23 = vrot.slane %v8576_v58, %v14436_v44  ;;  %v8592_v33 = vcombine.low %v8047_v59, %v8048_v17  ;;  %v7406_v43 = vpop.f32.mrb[58].mxu0 }
 0x474   : > { %v14692_v41 = vpop.f32.mrb[66].mxu1  ;;  %v8063_v63 = vrot.slane %v8049_v30, %v14436_v44  ;;  %v8064_v11 = vcombine.high %v8056_v39, %v8056_v39  ;;  %v8066_v18 = vcombine.high %v7569_v56, %v7569_v56  ;;  %v8073_v45 = vrot.slane %v7569_v56, %v14436_v44  ;;  %v10341_v62 = vpop.f32.mrb[59].mxu0 }
 0x475   : > { %v10045_v37 = vpop.f32.mrb[67].mxu1  ;;  %8910 = vst.msk [vmem:[%s11916_s15 + $0x58] sm:$0xf] %vm424_vm0, %v9466_v13  ;;  %v8591_v12 = vcombine.low %v8583_v22, %v8590_v23  ;;  %v7495_v36 = vmul.f32 %v10386_v54, %v14426_v29  ;;  %v10387_v14 = vadd.f32 %v7406_v43, %v14647_v6  ;;  %v8600_v35 = vrot.slane %v8592_v33, %v14436_v44  ;;  %v14711_v29 = vld [vmem:[%s15353_s20] ss:$0 sm:$0xff] }
 0x476   : > { %v8065_v27 = vcombine.high %v8063_v63, %v8063_v63  ;;  %v8593_v57 = vcombine.low %v8056_v39, %v8064_v11  ;;  %v8080_v8 = vrot.slane %v8066_v18, %v14436_v44  ;;  %v8081_v60 = vcombine.high %v8073_v45, %v8073_v45 }
 0x477   : > { %v9467_v19 = vpack.c.bf16 %v8591_v12, %v8591_v12  ;;  %v7536_v47 = vadd.f32 %v14705_v9, %v7495_v36  ;;  %v7496_v6 = vmul.f32 %v14711_v29, %v10387_v14 }
 0x478   : > { %v8607_v2 = vrot.slane %v8593_v57, %v14436_v44  ;;  %v8609_v15 = vcombine.low %v8063_v63, %v8065_v27  ;;  %v8082_v26 = vcombine.high %v8080_v8, %v8080_v8  ;;  %v8610_v1 = vcombine.low %v8073_v45, %v8081_v60 }
 0x479   : > { %8911 = vst.msk [vmem:[%s11916_s15 + $0x5c] sm:$0xf] %vm424_vm0, %v9467_v19  ;;  %v7570_v16 = vmax.f32 %v7536_v47, 0.0  ;;  %v7537_v46 = vadd.f32 %v14705_v9, %v7496_v6  ;;  %v7411_v55 = vpop.f32.mrb[60].mxu0 }
 0x47a   : > { %v8608_v31 = vcombine.low %v8600_v35, %v8607_v2  ;;  %v8617_v42 = vrot.slane %v8609_v15, %v14436_v44  ;;  %v8624_v48 = vrot.slane %v8610_v1, %v14436_v44  ;;  %v10344_v50 = vpop.f32.mrb[61].mxu0  ;;  %v10388_v5 = vadd.f32 %v7411_v55, %v14664_v24 }
 0x47b   : > { %v8083_v10 = vcombine.high %v7570_v16, %v7570_v16  ;;  %v8090_v3 = vrot.slane %v7570_v16, %v14436_v44  ;;  %v7571_v53 = vmax.f32 %v7537_v46, 0.0  ;;  %v7414_v21 = vpop.f32.mrb[62].mxu0  ;;  %v8626_v52 = vcombine.low %v8080_v8, %v8082_v26 }
 0x47c   : > { %v9468_v40 = vpack.c.bf16 %v8608_v31, %v8608_v31  ;;  %v8625_v34 = vcombine.low %v8617_v42, %v8624_v48  ;;  %v10389_v25 = vadd.f32 %v7414_v21, %v14670_v20  ;;  %v10345_v38 = vpop.f32.mrb[63].mxu0  ;;  %v7497_v17 = vmul.f32 %v14711_v29, %v10388_v5 }
 0x47d   : > { %v8097_v59 = vrot.slane %v8083_v10, %v14436_v44  ;;  %v8098_v28 = vcombine.high %v8090_v3, %v8090_v3  ;;  %v8100_v61 = vcombine.high %v7571_v53, %v7571_v53  ;;  %v8107_v4 = vrot.slane %v7571_v53, %v14436_v44 }
 0x47e   : > { %8912 = vst.msk [vmem:[%s11916_s15 + $0x60] sm:$0xf] %vm424_vm0, %v9468_v40  ;;  %v9469_v32 = vpack.c.bf16 %v8625_v34, %v8625_v34  ;;  %v7498_v24 = vmul.f32 %v14711_v29, %v10389_v25  ;;  %v7538_v20 = vadd.f32 %v14705_v9, %v7497_v17  ;;  %v8634_v54 = vrot.slane %v8626_v52, %v14436_v44 }
 0x47f   : > { %v8099_v58 = vcombine.high %v8097_v59, %v8097_v59  ;;  %v8627_v49 = vcombine.low %v8090_v3, %v8098_v28  ;;  %v8114_v30 = vrot.slane %v8100_v61, %v14436_v44  ;;  %v8115_v39 = vcombine.high %v8107_v4, %v8107_v4 }
 0x480   : > { %8913 = vst.msk [vmem:[%s11916_s15 + $0x64] sm:$0xf] %vm424_vm0, %v9469_v32  ;;  %v7539_v56 = vadd.f32 %v14705_v9, %v7498_v24  ;;  %v7572_v23 = vmax.f32 %v7538_v20, 0.0 }
 0x481   : > { %v8641_v51 = vrot.slane %v8627_v49, %v14436_v44  ;;  %v8643_v0 = vcombine.low %v8097_v59, %v8099_v58  ;;  %v8644_v22 = vcombine.low %v8107_v4, %v8115_v39  ;;  %v7419_v13 = vpop.f32.mrb[64].mxu0  ;;  %v8116_v45 = vcombine.high %v8114_v30, %v8114_v30 }
 0x482   : > { %v7573_v33 = vmax.f32 %v7539_v56, 0.0  ;;  %v10390_v43 = vadd.f32 %v7419_v13, %v14684_v7  ;;  %v10348_v63 = vpop.f32.mrb[65].mxu0  ;;  %v8117_v12 = vcombine.high %v7572_v23, %v7572_v23  ;;  %v8124_v36 = vrot.slane %v7572_v23, %v14436_v44 }
 0x483   : > { %v8642_v11 = vcombine.low %v8634_v54, %v8641_v51  ;;  %v8651_v18 = vrot.slane %v8643_v0, %v14436_v44  ;;  %v8658_v62 = vrot.slane %v8644_v22, %v14436_v44  ;;  %v7422_v37 = vpop.f32.mrb[66].mxu0 }
 0x484   : > { %v8134_v14 = vcombine.high %v7573_v33, %v7573_v33  ;;  %v8141_v27 = vrot.slane %v7573_v33, %v14436_v44  ;;  %v10349_v57 = vpop.f32.mrb[67].mxu0  ;;  %v7499_v7 = vmul.f32 %v14711_v29, %v10390_v43  ;;  %v10391_v35 = vadd.f32 %v7422_v37, %v14692_v41 }
 0x485   : > { %v9470_v8 = vpack.c.bf16 %v8642_v11, %v8642_v11  ;;  %v8659_v60 = vcombine.low %v8651_v18, %v8658_v62  ;;  %v8131_v19 = vrot.slane %v8117_v12, %v14436_v44  ;;  %v8132_v47 = vcombine.high %v8124_v36, %v8124_v36 }
 0x486   : > { %v8660_v6 = vcombine.low %v8116_v45, %v8124_v36  ;;  %v8148_v2 = vrot.slane %v8134_v14, %v14436_v44  ;;  %v8149_v26 = vcombine.high %v8141_v27, %v8141_v27  ;;  %v7540_v1 = vadd.f32 %v14705_v9, %v7499_v7 }
 0x487   : > { %8914 = vst.msk [vmem:[%s11916_s15 + $0x68] sm:$0xf] %vm424_vm0, %v9470_v8  ;;  %v9471_v15 = vpack.c.bf16 %v8659_v60, %v8659_v60  ;;  %v7500_v16 = vmul.f32 %v14711_v29, %v10391_v35  ;;  %v8661_v46 = vcombine.low %v8132_v47, %v8131_v19  ;;  %v8133_v55 = vcombine.high %v8131_v19, %v8131_v19 }
 0x488   : > { %v8678_v31 = vcombine.low %v8149_v26, %v8148_v2  ;;  %v7574_v41 = vmax.f32 %v7540_v1, 0.0  ;;  %v8668_v48 = vrot.slane %v8660_v6, %v14436_v44  ;;  %v8150_v3 = vcombine.high %v8148_v2, %v8148_v2 }
 0x489   : > { %8915 = vst.msk [vmem:[%s11916_s15 + $0x6c] sm:$0xf] %vm424_vm0, %v9471_v15  ;;  %v7541_v42 = vadd.f32 %v14705_v9, %v7500_v16  ;;  %v8675_v50 = vrot.slane %v8661_v46, %v14436_v44  ;;  %v8677_v10 = vcombine.low %v8133_v55, %v8141_v27 }
 0x48a   : > { %v8692_v53 = vrot.slane %v8678_v31, %v14436_v44  ;;  %v8151_v5 = vcombine.high %v7574_v41, %v7574_v41  ;;  %v8158_v29 = vrot.slane %v7574_v41, %v14436_v44 }
 0x48b   : > { %v7575_v21 = vmax.f32 %v7541_v42, 0.0  ;;  %v8676_v40 = vcombine.low %v8668_v48, %v8675_v50  ;;  %v8685_v34 = vrot.slane %v8677_v10, %v14436_v44 }
 0x48c   : > { %v8165_v9 = vrot.slane %v8151_v5, %v14436_v44  ;;  %v8166_v52 = vcombine.high %v8158_v29, %v8158_v29  ;;  %v8694_v25 = vcombine.low %v8150_v3, %v8158_v29 }
 0x48d   : > { %v8168_v38 = vcombine.high %v7575_v21, %v7575_v21  ;;  %v9472_v59 = vpack.c.bf16 %v8676_v40, %v8676_v40  ;;  %v8693_v28 = vcombine.low %v8685_v34, %v8692_v53  ;;  %v8175_v61 = vrot.slane %v7575_v21, %v14436_v44 }
 0x48e   : > { %v8695_v4 = vcombine.low %v8166_v52, %v8165_v9  ;;  %v8167_v32 = vcombine.high %v8165_v9, %v8165_v9  ;;  %v8702_v49 = vrot.slane %v8694_v25, %v14436_v44 }
 0x48f   : > { %v8182_v17 = vrot.slane %v8168_v38, %v14436_v44  ;;  %8916 = vst.msk [vmem:[%s11916_s15 + $0x70] sm:$0xf] %vm424_vm0, %v9472_v59  ;;  %v9473_v24 = vpack.c.bf16 %v8693_v28, %v8693_v28  ;;  %v8183_v58 = vcombine.high %v8175_v61, %v8175_v61 }
 0x490   : > { %v8709_v30 = vrot.slane %v8695_v4, %v14436_v44  ;;  %v8711_v39 = vcombine.low %v8167_v32, %v8175_v61 }
 0x491   : > { %8917 = vst.msk [vmem:[%s11916_s15 + $0x74] sm:$0xf] %vm424_vm0, %v9473_v24  ;;  %v8712_v20 = vcombine.low %v8183_v58, %v8182_v17 }
 0x492   : > { %v8710_v56 = vcombine.low %v8702_v49, %v8709_v30  ;;  %v8719_v54 = vrot.slane %v8711_v39, %v14436_v44 }
 0x493   : > { %v8726_v51 = vrot.slane %v8712_v20, %v14436_v44 }
 0x494   : > { %v9474_v0 = vpack.c.bf16 %v8710_v56, %v8710_v56 }
 0x495   : > { %v8727_v22 = vcombine.low %v8719_v54, %v8726_v51 }
 0x496   : > { %8918 = vst.msk [vmem:[%s11916_s15 + $0x78] sm:$0xf] %vm424_vm0, %v9474_v0 }
 0x497   : > { %v9475_v13 = vpack.c.bf16 %v8727_v22, %v8727_v22 }
 0x499   : > { %8919 = vst.msk [vmem:[%s11916_s15 + $0x7c] sm:$0xf] %vm424_vm0, %v9475_v13 }
 0x49a   : > { %11197 = shalt.err (!%p11194_p4)
}
 0x49b   : > { %s11198_s1 = scalar_lea.hbm %s14776_s12, 2048  ;;  %s11202_s2 = scalar_lea.hbm %s15361_s3, 16384 }
 0x49c   : > { %p11199_p9 = scmp.ne.s32.totalorder %s14776_s12, %s11198_s1  ;;  %p11203_p5 = scmp.lt.u32.totalorder %s14776_s12, %s15361_s3 }
 0x49d   : > { %p11204_p7 = scmp.lt.u32.totalorder %s11202_s2, %s11198_s1  ;;  %p11206_p2 = scmp.lt.u32.totalorder %s11198_s1, %s14776_s12 }
 0x49e   : > { %p11200_p3 = pnand %p11199_p9, %p15362_p6 }
 0x49f   : > { %p11205_p11 = por %p11204_p7, %p11203_p5 }
 0x4a0   : > { %p11201_p13 = pneg %p11200_p3 }
 0x4a1   : > { %p11207_p0 = por %p11206_p2, %p11205_p11 }
 0x4a3   : > { %p11208_p10 = pnand %p11207_p0, %p11201_p13 }
 0x4a5   : > { %11211 = shalt.err (!%p11208_p10)
}
 0x4a6   : > { %s11356_s5 = smov 64   ;;  %s11357_s9 = smov 4  }
 0x4a7   : > { %10878 = dma.vmem_to_hbm [thread:$0]  (%p15362_p6), %s14778_s11, 2048, %s14776_s12, %s14784_s24, %s11356_s5, %s11356_s5, %s11357_s9  }
 0x4a8 PF: > { %s15363_s16 = sld [smem:[#allocation17_spill]]  ;;  %s15364_s14 = sld [smem:[#allocation25_spill]] }
 0x4a9   : > { %p10901_p12 = scmp.ge.s32.totalorder %s11342_s10, 2 }
 0x4ae   : > { %s8952_s4 = sand.u32 1, %s15363_s16   ;;  %p15365_p8 = scmp.ne.s32.totalorder %s15364_s14, 0 }
 0x4af   : > { %s8953_s17 = scalar_lea.sflag [#allocation5], %s8952_s4 }
 0x4b0   : > { %p10895_p1 = pnand %p10901_p12, %p15365_p8 }
 0x4b2   : > { %11285 = dma.done.wait (!%p10895_p1), %s8953_s17, 2048  }
 0x4b3   : > { %11287 = vsyncadd (!%p10895_p1), %s8953_s17, 4294965248  ;;  %s26_s10 = sadd.s32 1, %s11342_s10   ;;  %s15367_s24 = sld [smem:[#allocation18_spill]] }
 0x4b4   : > { %p14813_p4 = scmp.ge.s32.totalorder %s26_s10, 10   ;;  %s15368_s27 = sld [smem:[#allocation19_spill]] }
 0x4b5   : > { %s15369_s13 = sld [smem:[#allocation30_spill]]  ;;  %s15370_s30 = sld [smem:[#allocation22_spill]] }
 0x4b6   : > { %s15371_s7 = sld [smem:[#allocation23_spill]]  ;;  %s15372_s11 = sld [smem:[#allocation24_spill]] }
 0x4b7   : > { %s15373_s9 = sld [smem:[#allocation28_spill]]  ;;  %s15375_s21 = smov %s11294_s22 }
 0x4b8   : > { %s15376_s22 = smov %s11298_s23  ;;  %s15377_s23 = smov %s11721_s25 }
 0x4b9   : > { %s15378_s25 = smov %s11310_s26  ;;  %s15379_s26 = smov %s11645_s6 }
 0x4ba   : > { %s15380_s28 = smov %s11322_s29  ;;  %25 = sbr.rel (!%p14813_p4) target bundleno = 20 (0x14), region = 136 }
 0x4bb   : > { %s15381_s29 = smov %s15369_s13 }
 0x4bc   : > { %s15382_s8 = smov %s15372_s11 }
 0x4c1   :  { %8958 = vsyncpa [#allocation4], 1 }
 0x4c2   :  { %8960 = vsyncpa [#allocation4 + $0x1], 1 }
 0x4c3   :  { %8961 = vsyncpa [#allocation7], 1 }
 0x4c4   :  { %8963 = vsyncpa [#allocation7 + $0x1], 1 }
 0x4c5   :  { %8964 = vsyncpa [#allocation10], 1 }
 0x4c6   :  { %8965 = vsyncpa [#allocation5], 1 }
 0x4c7   :  { %8967 = vsyncpa [#allocation5 + $0x1], 1 }

</bundles_post_ra>
